<compile_context>
chip_gen: v6e
topology: v6e:2x2x1
jax: 0.10.0
libtpu: 0.0.40
codegen_flags: <defaults>
</compile_context>

<pallas_src>
import jax
import jax.numpy as jnp
from jax import lax
from jax.experimental import pallas as pl
from jax.experimental.pallas import tpu as pltpu

K = 7      # conv kernel size
PAD = 3    # conv padding ("same" for stride 1)


def fused_conv_kernel(x2_ref, x6_ref, x5_ref,
                      w2_ref, b2_ref, w1_ref, b1_ref,
                      out_ref, x2pad_ref, v3pad_ref):
    # x2_ref, x6_ref, x5_ref : (N, H, W*C)   lane-dense activations
    # w2_ref, w1_ref         : (K, W*C, W*C) banded (Toeplitz-over-w) weights
    # b2_ref, b1_ref         : (1, W*C)      channel bias tiled across w
    # out_ref                : (N, H, W*C)
    # x2pad_ref, v3pad_ref   : (N, H+2*PAD, W*C) VMEM scratch (height-padded)
    N, H, WC = out_ref.shape
    M = N * H
    f32 = jnp.float32

    # ---- stage height-zero-padded conv2 input (w-padding is in the weights) ----
    x2pad_ref[...] = jnp.zeros(x2pad_ref.shape, f32)
    x2pad_ref[:, PAD:PAD + H, :] = x2_ref[...]

    # ---- conv2(x2): K banded matmuls, (kw, cin) taps live in the contraction ----
    acc = jnp.zeros((M, WC), f32)
    for kh in range(K):
        slab = x2pad_ref[:, kh:kh + H, :].reshape(M, WC)
        acc = acc + jnp.dot(slab, w2_ref[kh], preferred_element_type=f32)

    # ---- + bias, + x6, relu ----
    v3 = jnp.maximum(acc + b2_ref[...] + x6_ref[...].reshape(M, WC), 0.0)

    # ---- stage height-zero-padded relu activation for conv1 ----
    v3pad_ref[...] = jnp.zeros(v3pad_ref.shape, f32)
    v3pad_ref[:, PAD:PAD + H, :] = v3.reshape(N, H, WC)

    # ---- conv1(v3) ----
    acc2 = jnp.zeros((M, WC), f32)
    for kh in range(K):
        slab = v3pad_ref[:, kh:kh + H, :].reshape(M, WC)
        acc2 = acc2 + jnp.dot(slab, w1_ref[kh], preferred_element_type=f32)

    # ---- + bias, + x5 ----
    out = acc2 + b1_ref[...] + x5_ref[...].reshape(M, WC)
    out_ref[...] = out.reshape(N, H, WC).astype(out_ref.dtype)


def _pack_banded_weight(w_hwio, W):
    """HWIO (K, K, Ci, Co) -> banded (K, W*Ci, W*Co).

    big[kh, w'*Ci + ci, w*Co + co] = w[kh, w' - w + PAD, ci, co]
    for |w' - w| <= PAD (band clipped at the edges == zero width-padding).
    """
    Kh, Kw, Ci, Co = w_hwio.shape
    big = jnp.zeros((Kh, W * Ci, W * Co), w_hwio.dtype)
    for w in range(W):
        lo = max(0, w - PAD)            # first contributing input column
        hi = min(W, w + PAD + 1)        # one past the last
        taps = w_hwio[:, lo - w + PAD: hi - w + PAD]       # (Kh, hi-lo, Ci, Co)
        taps = taps.reshape(Kh, (hi - lo) * Ci, Co)
        big = big.at[:, lo * Ci: hi * Ci, w * Co:(w + 1) * Co].set(taps)
    return big


@jax.jit
def model_forward(x6, x2, x5, w1, b1, w2, b2):
    """Activations NHWC (N, H, W, C) f32; weights HWIO (7,7,C,C); biases (C,)."""
    N, H, W, C = x2.shape
    Hp = H + 2 * PAD
    WC = W * C

    # lane-dense flattening (w, c) -> w*C + c
    x2f = x2.reshape(N, H, WC)
    x6f = x6.reshape(N, H, WC)
    x5f = x5.reshape(N, H, WC)

    bw2 = _pack_banded_weight(w2, W)          # (K, WC, WC)
    bw1 = _pack_banded_weight(w1, W)
    b2t = jnp.tile(b2, W).reshape(1, WC)      # bias tiled across w
    b1t = jnp.tile(b1, W).reshape(1, WC)

    grid_spec = pltpu.PrefetchScalarGridSpec(
        num_scalar_prefetch=0,
        grid=(1,),                            # whole batch in a single step
        in_specs=[
            pl.BlockSpec((N, H, WC), lambda i: (0, 0, 0)),    # x2
            pl.BlockSpec((N, H, WC), lambda i: (0, 0, 0)),    # x6
            pl.BlockSpec((N, H, WC), lambda i: (0, 0, 0)),    # x5
            pl.BlockSpec((K, WC, WC), lambda i: (0, 0, 0)),   # w2 banded
            pl.BlockSpec((1, WC), lambda i: (0, 0)),          # b2 tiled
            pl.BlockSpec((K, WC, WC), lambda i: (0, 0, 0)),   # w1 banded
            pl.BlockSpec((1, WC), lambda i: (0, 0)),          # b1 tiled
        ],
        out_specs=pl.BlockSpec((N, H, WC), lambda i: (0, 0, 0)),
        scratch_shapes=[pltpu.VMEM((N, Hp, WC), jnp.float32),
                        pltpu.VMEM((N, Hp, WC), jnp.float32)],
    )

    outf = pl.pallas_call(
        fused_conv_kernel,
        out_shape=jax.ShapeDtypeStruct((N, H, WC), jnp.float32),
        grid_spec=grid_spec,
        compiler_params=pltpu.CompilerParams(
            dimension_semantics=("arbitrary",),
            vmem_limit_bytes=32 * 1024 * 1024),
    )(x2f, x6f, x5f, bw2, b2t, bw1, b1t)

    return outf.reshape(N, H, W, C)


def reference_forward(x6, x2, x5, w1, b1, w2, b2):
    """Pure-JAX reference (NHWC / HWIO), mirrors the PyTorch forward."""
    dn = lax.conv_dimension_numbers(x2.shape, w2.shape,
                                    ("NHWC", "HWIO", "NHWC"))
    v1 = lax.conv_general_dilated(x2, w2, (1, 1), [(PAD, PAD), (PAD, PAD)],
                                  dimension_numbers=dn) + b2
    v3 = jnp.maximum(v1 + x6, 0.0)
    v4 = lax.conv_general_dilated(v3, w1, (1, 1), [(PAD, PAD), (PAD, PAD)],
                                  dimension_numbers=dn) + b1
    return v4 + x5


if __name__ == "__main__":
    # Small shapes consistent with the module (channels must be 16).
    N, C, H, W = 2, 16, 16, 16

    key = jax.random.PRNGKey(0)
    k1, k2, k3, k4, k5, k6, k7 = jax.random.split(key, 7)

    # Inputs in PyTorch NCHW convention, then transposed to NHWC for the kernel.
    x6_nchw = jax.random.normal(k1, (N, C, H, W), jnp.float32)
    x2_nchw = jax.random.normal(k2, (N, C, H, W), jnp.float32)
    x5_nchw = jax.random.normal(k3, (N, C, H, W), jnp.float32)
    x6 = jnp.transpose(x6_nchw, (0, 2, 3, 1))
    x2 = jnp.transpose(x2_nchw, (0, 2, 3, 1))
    x5 = jnp.transpose(x5_nchw, (0, 2, 3, 1))

    # Deterministic parameter init (Conv2d(16,16,7): weight HWIO, bias (16,)).
    fan_in = C * K * K
    bound = 1.0 / (fan_in ** 0.5)
    w1 = jax.random.uniform(k4, (K, K, C, C), jnp.float32, -bound, bound)
    b1 = jax.random.uniform(k5, (C,), jnp.float32, -bound, bound)
    w2 = jax.random.uniform(k6, (K, K, C, C), jnp.float32, -bound, bound)
    b2 = jax.random.uniform(k7, (C,), jnp.float32, -bound, bound)

    out = model_forward(x6, x2, x5, w1, b1, w2, b2)
    out = jax.block_until_ready(out)

    ref = reference_forward(x6, x2, x5, w1, b1, w2, b2)
    assert jnp.allclose(out, ref, atol=1e-3, rtol=1e-3), "mismatch vs reference"

    # (output is NHWC; the NCHW result would be jnp.transpose(out, (0, 3, 1, 2)))
    print("KERNEL_OK")
</pallas_src>

<mosaic_0001>
module attributes {stable_mosaic.version = 11 : i64} {
  func.func @fused_conv_kernel(%arg0: i32, %arg1: memref<2x16x256xf32, #tpu.memory_space<vmem>>, %arg2: memref<2x16x256xf32, #tpu.memory_space<vmem>>, %arg3: memref<2x16x256xf32, #tpu.memory_space<vmem>>, %arg4: memref<7x256x256xf32, #tpu.memory_space<vmem>>, %arg5: memref<1x256xf32, #tpu.memory_space<vmem>>, %arg6: memref<7x256x256xf32, #tpu.memory_space<vmem>>, %arg7: memref<1x256xf32, #tpu.memory_space<vmem>>, %arg8: memref<2x16x256xf32, #tpu.memory_space<vmem>>, %arg9: memref<2x22x256xf32, #tpu.memory_space<vmem>>, %arg10: memref<2x22x256xf32, #tpu.memory_space<vmem>>) attributes {dimension_semantics = [#tpu.dimension_semantics<arbitrary>], iteration_bounds = array<i64: 1>, scalar_prefetch = 0 : i64, scratch_operands = 2 : i64, tpu.core_type = #tpu.core_type<tc>, window_params = [{pipeline_mode = #tpu.pipeline_mode<synchronous>, transform_indices = @transform_0, window_bounds = array<i64: 2, 16, 256>}, {pipeline_mode = #tpu.pipeline_mode<synchronous>, transform_indices = @transform_1, window_bounds = array<i64: 2, 16, 256>}, {pipeline_mode = #tpu.pipeline_mode<synchronous>, transform_indices = @transform_2, window_bounds = array<i64: 2, 16, 256>}, {pipeline_mode = #tpu.pipeline_mode<synchronous>, transform_indices = @transform_3, window_bounds = array<i64: 7, 256, 256>}, {pipeline_mode = #tpu.pipeline_mode<synchronous>, transform_indices = @transform_4, window_bounds = array<i64: 1, 256>}, {pipeline_mode = #tpu.pipeline_mode<synchronous>, transform_indices = @transform_5, window_bounds = array<i64: 7, 256, 256>}, {pipeline_mode = #tpu.pipeline_mode<synchronous>, transform_indices = @transform_6, window_bounds = array<i64: 1, 256>}, {pipeline_mode = #tpu.pipeline_mode<synchronous>, transform_indices = @transform_7, window_bounds = array<i64: 2, 16, 256>}]} {
    %cst = arith.constant 0.000000e+00 : f32
    %0 = vector.broadcast %cst : f32 to vector<2x22x256xf32>
    %c0 = arith.constant 0 : index
    %c0_0 = arith.constant 0 : index
    %c0_1 = arith.constant 0 : index
    %1 = vector.load %arg9[%c0, %c0_0, %c0_1] : memref<2x22x256xf32, #tpu.memory_space<vmem>>, vector<2x22x256xf32>
    tpu.vector_store %arg9[%c0, %c0_0, %c0_1], %0 {strides = array<i32>} : memref<2x22x256xf32, #tpu.memory_space<vmem>>, vector<2x22x256xf32>,
    %c0_2 = arith.constant 0 : index
    %c0_3 = arith.constant 0 : index
    %c0_4 = arith.constant 0 : index
    %2 = vector.load %arg1[%c0_2, %c0_3, %c0_4] : memref<2x16x256xf32, #tpu.memory_space<vmem>>, vector<2x16x256xf32>
    %c0_5 = arith.constant 0 : index
    %c3 = arith.constant 3 : index
    %c0_6 = arith.constant 0 : index
    %3 = vector.load %arg9[%c0_5, %c3, %c0_6] : memref<2x22x256xf32, #tpu.memory_space<vmem>>, vector<2x16x256xf32>
    tpu.vector_store %arg9[%c0_5, %c3, %c0_6], %2 {strides = array<i32>} : memref<2x22x256xf32, #tpu.memory_space<vmem>>, vector<2x16x256xf32>,
    %cst_7 = arith.constant 0.000000e+00 : f32
    %4 = vector.broadcast %cst_7 : f32 to vector<32x256xf32>
    %c0_8 = arith.constant 0 : index
    %c0_9 = arith.constant 0 : index
    %c0_10 = arith.constant 0 : index
    %5 = vector.load %arg9[%c0_8, %c0_9, %c0_10] : memref<2x22x256xf32, #tpu.memory_space<vmem>>, vector<2x16x256xf32>
    %6 = vector.shape_cast %5 : vector<2x16x256xf32> to vector<32x256xf32>
    %c0_11 = arith.constant 0 : index
    %c0_12 = arith.constant 0 : index
    %c0_13 = arith.constant 0 : index
    %7 = vector.load %arg4[%c0_11, %c0_12, %c0_13] : memref<7x256x256xf32, #tpu.memory_space<vmem>>, vector<1x256x256xf32>
    %8 = vector.shape_cast %7 : vector<1x256x256xf32> to vector<256x256xf32>
    %cst_14 = arith.constant dense<0.000000e+00> : vector<32x256xf32>
    %9 = tpu.matmul %6, %8, %cst_14 {dimension_numbers = #tpu.dot_dimension_numbers<[1], [0], [0], [1], [0, 0, 1, 1], [], []>} : vector<32x256xf32>, vector<256x256xf32>, vector<32x256xf32> -> vector<32x256xf32>
    %10 = arith.addf %4, %9 : vector<32x256xf32>
    %c0_15 = arith.constant 0 : index
    %c1 = arith.constant 1 : index
    %c0_16 = arith.constant 0 : index
    %11 = vector.load %arg9[%c0_15, %c1, %c0_16] : memref<2x22x256xf32, #tpu.memory_space<vmem>>, vector<2x16x256xf32>
    %12 = vector.shape_cast %11 : vector<2x16x256xf32> to vector<32x256xf32>
    %c1_17 = arith.constant 1 : index
    %c0_18 = arith.constant 0 : index
    %c0_19 = arith.constant 0 : index
    %13 = vector.load %arg4[%c1_17, %c0_18, %c0_19] : memref<7x256x256xf32, #tpu.memory_space<vmem>>, vector<1x256x256xf32>
    %14 = vector.shape_cast %13 : vector<1x256x256xf32> to vector<256x256xf32>
    %cst_20 = arith.constant dense<0.000000e+00> : vector<32x256xf32>
    %15 = tpu.matmul %12, %14, %cst_20 {dimension_numbers = #tpu.dot_dimension_numbers<[1], [0], [0], [1], [0, 0, 1, 1], [], []>} : vector<32x256xf32>, vector<256x256xf32>, vector<32x256xf32> -> vector<32x256xf32>
    %16 = arith.addf %10, %15 : vector<32x256xf32>
    %c0_21 = arith.constant 0 : index
    %c2 = arith.constant 2 : index
    %c0_22 = arith.constant 0 : index
    %17 = vector.load %arg9[%c0_21, %c2, %c0_22] : memref<2x22x256xf32, #tpu.memory_space<vmem>>, vector<2x16x256xf32>
    %18 = vector.shape_cast %17 : vector<2x16x256xf32> to vector<32x256xf32>
    %c2_23 = arith.constant 2 : index
    %c0_24 = arith.constant 0 : index
    %c0_25 = arith.constant 0 : index
    %19 = vector.load %arg4[%c2_23, %c0_24, %c0_25] : memref<7x256x256xf32, #tpu.memory_space<vmem>>, vector<1x256x256xf32>
    %20 = vector.shape_cast %19 : vector<1x256x256xf32> to vector<256x256xf32>
    %cst_26 = arith.constant dense<0.000000e+00> : vector<32x256xf32>
    %21 = tpu.matmul %18, %20, %cst_26 {dimension_numbers = #tpu.dot_dimension_numbers<[1], [0], [0], [1], [0, 0, 1, 1], [], []>} : vector<32x256xf32>, vector<256x256xf32>, vector<32x256xf32> -> vector<32x256xf32>
    %22 = arith.addf %16, %21 : vector<32x256xf32>
    %c0_27 = arith.constant 0 : index
    %c3_28 = arith.constant 3 : index
    %c0_29 = arith.constant 0 : index
    %23 = vector.load %arg9[%c0_27, %c3_28, %c0_29] : memref<2x22x256xf32, #tpu.memory_space<vmem>>, vector<2x16x256xf32>
    %24 = vector.shape_cast %23 : vector<2x16x256xf32> to vector<32x256xf32>
    %c3_30 = arith.constant 3 : index
    %c0_31 = arith.constant 0 : index
    %c0_32 = arith.constant 0 : index
    %25 = vector.load %arg4[%c3_30, %c0_31, %c0_32] : memref<7x256x256xf32, #tpu.memory_space<vmem>>, vector<1x256x256xf32>
    %26 = vector.shape_cast %25 : vector<1x256x256xf32> to vector<256x256xf32>
    %cst_33 = arith.constant dense<0.000000e+00> : vector<32x256xf32>
    %27 = tpu.matmul %24, %26, %cst_33 {dimension_numbers = #tpu.dot_dimension_numbers<[1], [0], [0], [1], [0, 0, 1, 1], [], []>} : vector<32x256xf32>, vector<256x256xf32>, vector<32x256xf32> -> vector<32x256xf32>
    %28 = arith.addf %22, %27 : vector<32x256xf32>
    %c0_34 = arith.constant 0 : index
    %c4 = arith.constant 4 : index
    %c0_35 = arith.constant 0 : index
    %29 = vector.load %arg9[%c0_34, %c4, %c0_35] : memref<2x22x256xf32, #tpu.memory_space<vmem>>, vector<2x16x256xf32>
    %30 = vector.shape_cast %29 : vector<2x16x256xf32> to vector<32x256xf32>
    %c4_36 = arith.constant 4 : index
    %c0_37 = arith.constant 0 : index
    %c0_38 = arith.constant 0 : index
    %31 = vector.load %arg4[%c4_36, %c0_37, %c0_38] : memref<7x256x256xf32, #tpu.memory_space<vmem>>, vector<1x256x256xf32>
    %32 = vector.shape_cast %31 : vector<1x256x256xf32> to vector<256x256xf32>
    %cst_39 = arith.constant dense<0.000000e+00> : vector<32x256xf32>
    %33 = tpu.matmul %30, %32, %cst_39 {dimension_numbers = #tpu.dot_dimension_numbers<[1], [0], [0], [1], [0, 0, 1, 1], [], []>} : vector<32x256xf32>, vector<256x256xf32>, vector<32x256xf32> -> vector<32x256xf32>
    %34 = arith.addf %28, %33 : vector<32x256xf32>
    %c0_40 = arith.constant 0 : index
    %c5 = arith.constant 5 : index
    %c0_41 = arith.constant 0 : index
    %35 = vector.load %arg9[%c0_40, %c5, %c0_41] : memref<2x22x256xf32, #tpu.memory_space<vmem>>, vector<2x16x256xf32>
    %36 = vector.shape_cast %35 : vector<2x16x256xf32> to vector<32x256xf32>
    %c5_42 = arith.constant 5 : index
    %c0_43 = arith.constant 0 : index
    %c0_44 = arith.constant 0 : index
    %37 = vector.load %arg4[%c5_42, %c0_43, %c0_44] : memref<7x256x256xf32, #tpu.memory_space<vmem>>, vector<1x256x256xf32>
    %38 = vector.shape_cast %37 : vector<1x256x256xf32> to vector<256x256xf32>
    %cst_45 = arith.constant dense<0.000000e+00> : vector<32x256xf32>
    %39 = tpu.matmul %36, %38, %cst_45 {dimension_numbers = #tpu.dot_dimension_numbers<[1], [0], [0], [1], [0, 0, 1, 1], [], []>} : vector<32x256xf32>, vector<256x256xf32>, vector<32x256xf32> -> vector<32x256xf32>
    %40 = arith.addf %34, %39 : vector<32x256xf32>
    %c0_46 = arith.constant 0 : index
    %c6 = arith.constant 6 : index
    %c0_47 = arith.constant 0 : index
    %41 = vector.load %arg9[%c0_46, %c6, %c0_47] : memref<2x22x256xf32, #tpu.memory_space<vmem>>, vector<2x16x256xf32>
    %42 = vector.shape_cast %41 : vector<2x16x256xf32> to vector<32x256xf32>
    %c6_48 = arith.constant 6 : index
    %c0_49 = arith.constant 0 : index
    %c0_50 = arith.constant 0 : index
    %43 = vector.load %arg4[%c6_48, %c0_49, %c0_50] : memref<7x256x256xf32, #tpu.memory_space<vmem>>, vector<1x256x256xf32>
    %44 = vector.shape_cast %43 : vector<1x256x256xf32> to vector<256x256xf32>
    %cst_51 = arith.constant dense<0.000000e+00> : vector<32x256xf32>
    %45 = tpu.matmul %42, %44, %cst_51 {dimension_numbers = #tpu.dot_dimension_numbers<[1], [0], [0], [1], [0, 0, 1, 1], [], []>} : vector<32x256xf32>, vector<256x256xf32>, vector<32x256xf32> -> vector<32x256xf32>
    %46 = arith.addf %40, %45 : vector<32x256xf32>
    %c0_52 = arith.constant 0 : index
    %c0_53 = arith.constant 0 : index
    %47 = vector.load %arg5[%c0_52, %c0_53] : memref<1x256xf32, #tpu.memory_space<vmem>>, vector<1x256xf32>
    %48 = vector.broadcast %47 : vector<1x256xf32> to vector<32x256xf32>
    %49 = arith.addf %46, %48 : vector<32x256xf32>
    %c0_54 = arith.constant 0 : index
    %c0_55 = arith.constant 0 : index
    %c0_56 = arith.constant 0 : index
    %50 = vector.load %arg2[%c0_54, %c0_55, %c0_56] : memref<2x16x256xf32, #tpu.memory_space<vmem>>, vector<2x16x256xf32>
    %51 = vector.shape_cast %50 : vector<2x16x256xf32> to vector<32x256xf32>
    %52 = arith.addf %49, %51 : vector<32x256xf32>
    %cst_57 = arith.constant 0.000000e+00 : f32
    %53 = vector.broadcast %cst_57 : f32 to vector<32x256xf32>
    %54 = arith.maximumf %52, %53 : vector<32x256xf32>
    %cst_58 = arith.constant 0.000000e+00 : f32
    %55 = vector.broadcast %cst_58 : f32 to vector<2x22x256xf32>
    %c0_59 = arith.constant 0 : index
    %c0_60 = arith.constant 0 : index
    %c0_61 = arith.constant 0 : index
    %56 = vector.load %arg10[%c0_59, %c0_60, %c0_61] : memref<2x22x256xf32, #tpu.memory_space<vmem>>, vector<2x22x256xf32>
    tpu.vector_store %arg10[%c0_59, %c0_60, %c0_61], %55 {strides = array<i32>} : memref<2x22x256xf32, #tpu.memory_space<vmem>>, vector<2x22x256xf32>,
    %57 = vector.shape_cast %54 : vector<32x256xf32> to vector<2x16x256xf32>
    %c0_62 = arith.constant 0 : index
    %c3_63 = arith.constant 3 : index
    %c0_64 = arith.constant 0 : index
    %58 = vector.load %arg10[%c0_62, %c3_63, %c0_64] : memref<2x22x256xf32, #tpu.memory_space<vmem>>, vector<2x16x256xf32>
    tpu.vector_store %arg10[%c0_62, %c3_63, %c0_64], %57 {strides = array<i32>} : memref<2x22x256xf32, #tpu.memory_space<vmem>>, vector<2x16x256xf32>,
    %cst_65 = arith.constant 0.000000e+00 : f32
    %59 = vector.broadcast %cst_65 : f32 to vector<32x256xf32>
    %c0_66 = arith.constant 0 : index
    %c0_67 = arith.constant 0 : index
    %c0_68 = arith.constant 0 : index
    %60 = vector.load %arg10[%c0_66, %c0_67, %c0_68] : memref<2x22x256xf32, #tpu.memory_space<vmem>>, vector<2x16x256xf32>
    %61 = vector.shape_cast %60 : vector<2x16x256xf32> to vector<32x256xf32>
    %c0_69 = arith.constant 0 : index
    %c0_70 = arith.constant 0 : index
    %c0_71 = arith.constant 0 : index
    %62 = vector.load %arg6[%c0_69, %c0_70, %c0_71] : memref<7x256x256xf32, #tpu.memory_space<vmem>>, vector<1x256x256xf32>
    %63 = vector.shape_cast %62 : vector<1x256x256xf32> to vector<256x256xf32>
    %cst_72 = arith.constant dense<0.000000e+00> : vector<32x256xf32>
    %64 = tpu.matmul %61, %63, %cst_72 {dimension_numbers = #tpu.dot_dimension_numbers<[1], [0], [0], [1], [0, 0, 1, 1], [], []>} : vector<32x256xf32>, vector<256x256xf32>, vector<32x256xf32> -> vector<32x256xf32>
    %65 = arith.addf %59, %64 : vector<32x256xf32>
    %c0_73 = arith.constant 0 : index
    %c1_74 = arith.constant 1 : index
    %c0_75 = arith.constant 0 : index
    %66 = vector.load %arg10[%c0_73, %c1_74, %c0_75] : memref<2x22x256xf32, #tpu.memory_space<vmem>>, vector<2x16x256xf32>
    %67 = vector.shape_cast %66 : vector<2x16x256xf32> to vector<32x256xf32>
    %c1_76 = arith.constant 1 : index
    %c0_77 = arith.constant 0 : index
    %c0_78 = arith.constant 0 : index
    %68 = vector.load %arg6[%c1_76, %c0_77, %c0_78] : memref<7x256x256xf32, #tpu.memory_space<vmem>>, vector<1x256x256xf32>
    %69 = vector.shape_cast %68 : vector<1x256x256xf32> to vector<256x256xf32>
    %cst_79 = arith.constant dense<0.000000e+00> : vector<32x256xf32>
    %70 = tpu.matmul %67, %69, %cst_79 {dimension_numbers = #tpu.dot_dimension_numbers<[1], [0], [0], [1], [0, 0, 1, 1], [], []>} : vector<32x256xf32>, vector<256x256xf32>, vector<32x256xf32> -> vector<32x256xf32>
    %71 = arith.addf %65, %70 : vector<32x256xf32>
    %c0_80 = arith.constant 0 : index
    %c2_81 = arith.constant 2 : index
    %c0_82 = arith.constant 0 : index
    %72 = vector.load %arg10[%c0_80, %c2_81, %c0_82] : memref<2x22x256xf32, #tpu.memory_space<vmem>>, vector<2x16x256xf32>
    %73 = vector.shape_cast %72 : vector<2x16x256xf32> to vector<32x256xf32>
    %c2_83 = arith.constant 2 : index
    %c0_84 = arith.constant 0 : index
    %c0_85 = arith.constant 0 : index
    %74 = vector.load %arg6[%c2_83, %c0_84, %c0_85] : memref<7x256x256xf32, #tpu.memory_space<vmem>>, vector<1x256x256xf32>
    %75 = vector.shape_cast %74 : vector<1x256x256xf32> to vector<256x256xf32>
    %cst_86 = arith.constant dense<0.000000e+00> : vector<32x256xf32>
    %76 = tpu.matmul %73, %75, %cst_86 {dimension_numbers = #tpu.dot_dimension_numbers<[1], [0], [0], [1], [0, 0, 1, 1], [], []>} : vector<32x256xf32>, vector<256x256xf32>, vector<32x256xf32> -> vector<32x256xf32>
    %77 = arith.addf %71, %76 : vector<32x256xf32>
    %c0_87 = arith.constant 0 : index
    %c3_88 = arith.constant 3 : index
    %c0_89 = arith.constant 0 : index
    %78 = vector.load %arg10[%c0_87, %c3_88, %c0_89] : memref<2x22x256xf32, #tpu.memory_space<vmem>>, vector<2x16x256xf32>
    %79 = vector.shape_cast %78 : vector<2x16x256xf32> to vector<32x256xf32>
    %c3_90 = arith.constant 3 : index
    %c0_91 = arith.constant 0 : index
    %c0_92 = arith.constant 0 : index
    %80 = vector.load %arg6[%c3_90, %c0_91, %c0_92] : memref<7x256x256xf32, #tpu.memory_space<vmem>>, vector<1x256x256xf32>
    %81 = vector.shape_cast %80 : vector<1x256x256xf32> to vector<256x256xf32>
    %cst_93 = arith.constant dense<0.000000e+00> : vector<32x256xf32>
    %82 = tpu.matmul %79, %81, %cst_93 {dimension_numbers = #tpu.dot_dimension_numbers<[1], [0], [0], [1], [0, 0, 1, 1], [], []>} : vector<32x256xf32>, vector<256x256xf32>, vector<32x256xf32> -> vector<32x256xf32>
    %83 = arith.addf %77, %82 : vector<32x256xf32>
    %c0_94 = arith.constant 0 : index
    %c4_95 = arith.constant 4 : index
    %c0_96 = arith.constant 0 : index
    %84 = vector.load %arg10[%c0_94, %c4_95, %c0_96] : memref<2x22x256xf32, #tpu.memory_space<vmem>>, vector<2x16x256xf32>
    %85 = vector.shape_cast %84 : vector<2x16x256xf32> to vector<32x256xf32>
    %c4_97 = arith.constant 4 : index
    %c0_98 = arith.constant 0 : index
    %c0_99 = arith.constant 0 : index
    %86 = vector.load %arg6[%c4_97, %c0_98, %c0_99] : memref<7x256x256xf32, #tpu.memory_space<vmem>>, vector<1x256x256xf32>
    %87 = vector.shape_cast %86 : vector<1x256x256xf32> to vector<256x256xf32>
    %cst_100 = arith.constant dense<0.000000e+00> : vector<32x256xf32>
    %88 = tpu.matmul %85, %87, %cst_100 {dimension_numbers = #tpu.dot_dimension_numbers<[1], [0], [0], [1], [0, 0, 1, 1], [], []>} : vector<32x256xf32>, vector<256x256xf32>, vector<32x256xf32> -> vector<32x256xf32>
    %89 = arith.addf %83, %88 : vector<32x256xf32>
    %c0_101 = arith.constant 0 : index
    %c5_102 = arith.constant 5 : index
    %c0_103 = arith.constant 0 : index
    %90 = vector.load %arg10[%c0_101, %c5_102, %c0_103] : memref<2x22x256xf32, #tpu.memory_space<vmem>>, vector<2x16x256xf32>
    %91 = vector.shape_cast %90 : vector<2x16x256xf32> to vector<32x256xf32>
    %c5_104 = arith.constant 5 : index
    %c0_105 = arith.constant 0 : index
    %c0_106 = arith.constant 0 : index
    %92 = vector.load %arg6[%c5_104, %c0_105, %c0_106] : memref<7x256x256xf32, #tpu.memory_space<vmem>>, vector<1x256x256xf32>
    %93 = vector.shape_cast %92 : vector<1x256x256xf32> to vector<256x256xf32>
    %cst_107 = arith.constant dense<0.000000e+00> : vector<32x256xf32>
    %94 = tpu.matmul %91, %93, %cst_107 {dimension_numbers = #tpu.dot_dimension_numbers<[1], [0], [0], [1], [0, 0, 1, 1], [], []>} : vector<32x256xf32>, vector<256x256xf32>, vector<32x256xf32> -> vector<32x256xf32>
    %95 = arith.addf %89, %94 : vector<32x256xf32>
    %c0_108 = arith.constant 0 : index
    %c6_109 = arith.constant 6 : index
    %c0_110 = arith.constant 0 : index
    %96 = vector.load %arg10[%c0_108, %c6_109, %c0_110] : memref<2x22x256xf32, #tpu.memory_space<vmem>>, vector<2x16x256xf32>
    %97 = vector.shape_cast %96 : vector<2x16x256xf32> to vector<32x256xf32>
    %c6_111 = arith.constant 6 : index
    %c0_112 = arith.constant 0 : index
    %c0_113 = arith.constant 0 : index
    %98 = vector.load %arg6[%c6_111, %c0_112, %c0_113] : memref<7x256x256xf32, #tpu.memory_space<vmem>>, vector<1x256x256xf32>
    %99 = vector.shape_cast %98 : vector<1x256x256xf32> to vector<256x256xf32>
    %cst_114 = arith.constant dense<0.000000e+00> : vector<32x256xf32>
    %100 = tpu.matmul %97, %99, %cst_114 {dimension_numbers = #tpu.dot_dimension_numbers<[1], [0], [0], [1], [0, 0, 1, 1], [], []>} : vector<32x256xf32>, vector<256x256xf32>, vector<32x256xf32> -> vector<32x256xf32>
    %101 = arith.addf %95, %100 : vector<32x256xf32>
    %c0_115 = arith.constant 0 : index
    %c0_116 = arith.constant 0 : index
    %102 = vector.load %arg7[%c0_115, %c0_116] : memref<1x256xf32, #tpu.memory_space<vmem>>, vector<1x256xf32>
    %103 = vector.broadcast %102 : vector<1x256xf32> to vector<32x256xf32>
    %104 = arith.addf %101, %103 : vector<32x256xf32>
    %c0_117 = arith.constant 0 : index
    %c0_118 = arith.constant 0 : index
    %c0_119 = arith.constant 0 : index
    %105 = vector.load %arg3[%c0_117, %c0_118, %c0_119] : memref<2x16x256xf32, #tpu.memory_space<vmem>>, vector<2x16x256xf32>
    %106 = vector.shape_cast %105 : vector<2x16x256xf32> to vector<32x256xf32>
    %107 = arith.addf %104, %106 : vector<32x256xf32>
    %108 = vector.shape_cast %107 : vector<32x256xf32> to vector<2x16x256xf32>
    %c0_120 = arith.constant 0 : index
    %c0_121 = arith.constant 0 : index
    %c0_122 = arith.constant 0 : index
    %109 = vector.load %arg8[%c0_120, %c0_121, %c0_122] : memref<2x16x256xf32, #tpu.memory_space<vmem>>, vector<2x16x256xf32>
    tpu.vector_store %arg8[%c0_120, %c0_121, %c0_122], %108 {strides = array<i32>} : memref<2x16x256xf32, #tpu.memory_space<vmem>>, vector<2x16x256xf32>,
    return
  }
  func.func @transform_0(%arg0: i32) -> (i32, i32, i32) {
    %c0_i32 = arith.constant 0 : i32
    %c0_i32_0 = arith.constant 0 : i32
    %c0_i32_1 = arith.constant 0 : i32
    %c0_i32_2 = arith.constant 0 : i32
    return %c0_i32, %c0_i32_0, %c0_i32_1 : i32, i32, i32
  }
  func.func @transform_1(%arg0: i32) -> (i32, i32, i32) {
    %c0_i32 = arith.constant 0 : i32
    %c0_i32_0 = arith.constant 0 : i32
    %c0_i32_1 = arith.constant 0 : i32
    %c0_i32_2 = arith.constant 0 : i32
    return %c0_i32, %c0_i32_0, %c0_i32_1 : i32, i32, i32
  }
  func.func @transform_2(%arg0: i32) -> (i32, i32, i32) {
    %c0_i32 = arith.constant 0 : i32
    %c0_i32_0 = arith.constant 0 : i32
    %c0_i32_1 = arith.constant 0 : i32
    %c0_i32_2 = arith.constant 0 : i32
    return %c0_i32, %c0_i32_0, %c0_i32_1 : i32, i32, i32
  }
  func.func @transform_3(%arg0: i32) -> (i32, i32, i32) {
    %c0_i32 = arith.constant 0 : i32
    %c0_i32_0 = arith.constant 0 : i32
    %c0_i32_1 = arith.constant 0 : i32
    %c0_i32_2 = arith.constant 0 : i32
    return %c0_i32, %c0_i32_0, %c0_i32_1 : i32, i32, i32
  }
  func.func @transform_4(%arg0: i32) -> (i32, i32) {
    %c0_i32 = arith.constant 0 : i32
    %c0_i32_0 = arith.constant 0 : i32
    %c0_i32_1 = arith.constant 0 : i32
    return %c0_i32, %c0_i32_0 : i32, i32
  }
  func.func @transform_5(%arg0: i32) -> (i32, i32, i32) {
    %c0_i32 = arith.constant 0 : i32
    %c0_i32_0 = arith.constant 0 : i32
    %c0_i32_1 = arith.constant 0 : i32
    %c0_i32_2 = arith.constant 0 : i32
    return %c0_i32, %c0_i32_0, %c0_i32_1 : i32, i32, i32
  }
  func.func @transform_6(%arg0: i32) -> (i32, i32) {
    %c0_i32 = arith.constant 0 : i32
    %c0_i32_0 = arith.constant 0 : i32
    %c0_i32_1 = arith.constant 0 : i32
    return %c0_i32, %c0_i32_0 : i32, i32
  }
  func.func @transform_7(%arg0: i32) -> (i32, i32, i32) {
    %c0_i32 = arith.constant 0 : i32
    %c0_i32_0 = arith.constant 0 : i32
    %c0_i32_1 = arith.constant 0 : i32
    %c0_i32_2 = arith.constant 0 : i32
    return %c0_i32, %c0_i32_0, %c0_i32_1 : i32, i32, i32
  }
}

</mosaic_0001>

<bundles_post_ra>
// kernel: tile.13
= control target key start
LH: loop header
LB: loop body
LE: loop exit
PB: predicated region body
PF: predicated region fallthrough
CT: control target
= control target key end

     0   :  { %s28_s0 = inlined_call_operand.vmem [shape: f32[16], index: 0, kind: input, shape index: {}]   ;;  %s29_s1 = inlined_call_operand.vmem [shape: f32[16,16], index: 1, kind: output, shape index: {}]  }
   0x1   :  { %v4_v0 = vld [vmem:[%s28_s0] ss:$0 sm:$0xff] }
   0x2   :  { %5 = vst [vmem:[%s29_s1] sm:$0xff] %v4_v0  ;;  %8 = vst [vmem:[%s29_s1 + $0x8] sm:$0xff] %v4_v0 }

// kernel: tile.14
= control target key start
LH: loop header
LB: loop body
LE: loop exit
PB: predicated region body
PF: predicated region fallthrough
CT: control target
= control target key end

     0   :  { %s7_s6 = smov 3  ;;  %s21_s9 = smov 3  ;;  %vm4_vm0 = vcmask 130048   ;;  %vm11_vm1 = vcmask 1048448   ;;  %vm18_vm2 = vcmask 917248   ;;  %vm25_vm3 = vcmask 786048   ;;  %s131_s0 = inlined_call_operand.vmem [shape: f32[16,16], index: 0, kind: input, shape index: {}]   ;;  %s132_s1 = inlined_call_operand.vmem [shape: f32[1,256], index: 1, kind: output, shape index: {}]  }
   0x1   :  { %v69_v0 = vld [vmem:[%s131_s0 + $0x7] ss:$8 sm:%s7_s6]   ;;  %s84_s10 = smov 112   ;;  %v71_v1 = vld [vmem:[%s131_s0 + $0x5] ss:$8 sm:%s21_s9]   ;;  %s14_s13 = smov 3 }
   0x2   :  { %9 = vrot.lane.b32.xlu0 %v69_v0, %s84_s10  ;;  %s85_s14 = smov 80   ;;  %v70_v2 = vld [vmem:[%s131_s0 + $0x6] ss:$8 sm:%s14_s13]   ;;  %s28_s17 = smov 3  ;;  %vm32_vm4 = vcmask 654848   ;;  %vm39_vm5 = vcmask 523648  }
   0x3   :  { %23 = vrot.lane.b32.xlu1 %v71_v1, %s85_s14  ;;  %v72_v3 = vld [vmem:[%s131_s0 + $0x4] ss:$8 sm:%s28_s17]   ;;  %s35_s20 = smov 3  ;;  %s42_s21 = smov 3  ;;  %vm46_vm6 = vcmask 392448   ;;  %vm53_vm7 = vcmask 261248  }
   0x4   :  { %s86_s22 = smov 96   ;;  %s87_s23 = smov 64   ;;  %v73_v4 = vld [vmem:[%s131_s0 + $0x3] ss:$8 sm:%s35_s20]   ;;  %v74_v5 = vld [vmem:[%s131_s0 + $0x2] ss:$8 sm:%s42_s21]  }
   0x5   :  { %s2_s26 = smov 3  ;;  %s49_s29 = smov 3 }
   0x6   :  { %16 = vrot.lane.b32.xlu0 %v70_v2, %s86_s22  ;;  %v3_v6 = vld [vmem:[%s131_s0] ss:$8 sm:%s2_s26]   ;;  %s88_s3 = smov 48   ;;  %s89_s4 = smov 32  }
   0x7   :  { %30 = vrot.lane.b32.xlu1 %v72_v3, %s87_s23  ;;  %5 = vst.msk [vmem:[#allocation0] ss:$8 sm:$0x3] %vm4_vm0, %v3_v6   ;;  %v75_v7 = vld [vmem:[%s131_s0 + $0x1] ss:$8 sm:%s49_s29]   ;;  %s90_s0 = smov 16  }
   0xa   :  { %37 = vrot.lane.b32.xlu0 %v73_v4, %s88_s3 }
   0xb   :  { %44 = vrot.lane.b32.xlu1 %v74_v5, %s89_s4 }
   0xe   :  { %51 = vrot.lane.b32.xlu0 %v75_v7, %s90_s0 }
  0x74   :  { %v10_v8 = vpop.permute.xlu0 %9  }
  0x75   :  { %12 = vst.msk [vmem:[#allocation0] ss:$8 sm:$0x3] %vm11_vm1, %v10_v8   ;;  %v24_v9 = vpop.permute.xlu1 %23  }
  0x78   :  { %v17_v10 = vpop.permute.xlu0 %16  }
  0x79   :  { %19 = vst.msk [vmem:[#allocation0] ss:$8 sm:$0x3] %vm18_vm2, %v17_v10   ;;  %v31_v11 = vpop.permute.xlu1 %30  }
  0x7a   :  { %26 = vst.msk [vmem:[#allocation0] ss:$8 sm:$0x3] %vm25_vm3, %v24_v9  }
  0x7b   :  { %33 = vst.msk [vmem:[#allocation0] ss:$8 sm:$0x3] %vm32_vm4, %v31_v11  }
  0x7c   :  { %v38_v12 = vpop.permute.xlu0 %37  }
  0x7d   :  { %40 = vst.msk [vmem:[#allocation0] ss:$8 sm:$0x3] %vm39_vm5, %v38_v12   ;;  %v45_v13 = vpop.permute.xlu1 %44  }
  0x7e   :  { %47 = vst.msk [vmem:[#allocation0] ss:$8 sm:$0x3] %vm46_vm6, %v45_v13  }
  0x80   :  { %v52_v14 = vpop.permute.xlu0 %51  }
  0x81   :  { %54 = vst.msk [vmem:[#allocation0] ss:$8 sm:$0x3] %vm53_vm7, %v52_v14  }
  0x88   :  { %v59_v15 = vld [vmem:[#allocation0] sm:$0x1]  ;;  %v64_v16 = vld [vmem:[#allocation0 + $0x8] sm:$0x1] }
  0x89   :  { %62 = vst [vmem:[%s132_s1] sm:$0x1] %v59_v15  ;;  %76 = vst [vmem:[%s132_s1 + $0x1] sm:$0x1] %v64_v16 }

// kernel: model_forward.1
= control target key start
LH: loop header
LB: loop body
LE: loop exit
PB: predicated region body
PF: predicated region fallthrough
CT: control target
= control target key end

     0   :  { %v3807_v3 = vmov 0.0   ;;  %vm54_vm0 = vcmask 1042432   ;;  %vm183_vm1 = vcmask 1046528   ;;  %vm471_vm2 = vcmask 1045504   ;;  %s6914_s3 = inlined_call_operand.vmem [shape: f32[7,256,256], index: 3, kind: input, shape index: {}]   ;;  %s6915_s0 = inlined_call_operand.vmem [shape: f32[2,16,256], index: 0, kind: input, shape index: {}]   ;;  %s6916_s5 = inlined_call_operand.vmem [shape: f32[7,256,256], index: 5, kind: input, shape index: {}]   ;;  %s6917_s4 = inlined_call_operand.vmem [shape: f32[1,256], index: 4, kind: input, shape index: {}]   ;;  %s6918_s1 = inlined_call_operand.vmem [shape: f32[2,16,256], index: 1, kind: input, shape index: {}]   ;;  %s6919_s6 = inlined_call_operand.vmem [shape: f32[1,256], index: 6, kind: input, shape index: {}]   ;;  %s6920_s2 = inlined_call_operand.vmem [shape: f32[2,16,256], index: 2, kind: input, shape index: {}]   ;;  %s6921_s7 = inlined_call_operand.vmem [shape: f32[2,16,256], index: 7, kind: output, shape index: {}]  }
   0x1   :  { %v3061_v0 = vld [vmem:[%s6914_s3 + $0x2f8] sm:$0xff]  ;;  %v3060_v2 = vld [vmem:[%s6914_s3 + $0x2f0] sm:$0xff]  ;;  %27 = vst [vmem:[#allocation2] sm:$0xff] %v3807_v3  ;;  %26 = vst [vmem:[#allocation2 + $0x30] sm:$0xff] %v3807_v3  ;;  %vm678_vm3 = vcmask 1044480   ;;  %vm885_vm4 = vcmask 1043456  }
   0x2   :  { %v130_v1 = vld [vmem:[%s6914_s3 + $0xf8] sm:$0xff]  ;;  %30 = vst [vmem:[#allocation2 + $0x50] sm:$0x3f] %v3807_v3  ;;  %31 = vst [vmem:[#allocation2 + $0x20] sm:$0x3f] %v3807_v3  ;;  %277 = vmatprep.subr.mxu0 %v3061_v0  ;;  %v129_v4 = vld [vmem:[%s6914_s3 + $0xf0] sm:$0xff] }
   0x3   :  { %32 = vst [vmem:[#allocation2 + $0x8] sm:$0xff] %v3807_v3  ;;  %33 = vst [vmem:[#allocation2 + $0x38] sm:$0xff] %v3807_v3  ;;  %366 = vmatprep.subr.mxu1 %v130_v1  ;;  %v3059_v5 = vld [vmem:[%s6914_s3 + $0x2e8] sm:$0xff]  ;;  %278 = vmatpush1.msra.mxu0 %v3060_v2  ;;  %v3058_v7 = vld [vmem:[%s6914_s3 + $0x2e0] sm:$0xff]  ;;  %vm1298_vm5 = vcmask 1041408  }
   0x4   :  { %36 = vst [vmem:[#allocation2 + $0x10] sm:$0x3f] %v3807_v3  ;;  %37 = vst [vmem:[#allocation2 + $0x40] sm:$0x3f] %v3807_v3  ;;  %v128_v6 = vld [vmem:[%s6914_s3 + $0xe8] sm:$0xff]  ;;  %367 = vmatpush1.msra.mxu1 %v129_v4  ;;  %v127_v8 = vld [vmem:[%s6914_s3 + $0xe0] sm:$0xff]  ;;  %279 = vmatprep.subr.mxu0 %v3059_v5 }
   0x5   :  { %1533 = vst [vmem:[#allocation3 + $0x48] sm:$0xff] %v3807_v3  ;;  %1534 = vst [vmem:[#allocation3] sm:$0xff] %v3807_v3  ;;  %v3057_v9 = vld [vmem:[%s6914_s3 + $0x2d8] sm:$0xff]  ;;  %368 = vmatprep.subr.mxu1 %v128_v6  ;;  %v3056_v11 = vld [vmem:[%s6914_s3 + $0x2d0] sm:$0xff]  ;;  %280 = vmatpush1.msra.mxu0 %v3058_v7 }
   0x6   :  { %1537 = vst [vmem:[#allocation3 + $0x8] sm:$0x3f] %v3807_v3  ;;  %1538 = vst [vmem:[#allocation3 + $0x20] sm:$0x3f] %v3807_v3  ;;  %v126_v10 = vld [vmem:[%s6914_s3 + $0xd8] sm:$0xff]  ;;  %v125_v12 = vld [vmem:[%s6914_s3 + $0xd0] sm:$0xff]  ;;  %369 = vmatpush1.msra.mxu1 %v127_v8  ;;  %281 = vmatprep.subr.mxu0 %v3057_v9 }
   0x7   :  { %1539 = vst [vmem:[#allocation3 + $0x18] sm:$0xff] %v3807_v3  ;;  %1540 = vst [vmem:[#allocation3 + $0x40] sm:$0xff] %v3807_v3  ;;  %v3055_v13 = vld [vmem:[%s6914_s3 + $0x2c8] sm:$0xff]  ;;  %370 = vmatprep.subr.mxu1 %v126_v10  ;;  %v3054_v15 = vld [vmem:[%s6914_s3 + $0x2c0] sm:$0xff]  ;;  %282 = vmatpush1.msra.mxu0 %v3056_v11 }
   0x8   :  { %1543 = vst [vmem:[#allocation3 + $0x58] sm:$0x3f] %v3807_v3  ;;  %1544 = vst [vmem:[#allocation3 + $0x10] sm:$0x3f] %v3807_v3  ;;  %v124_v14 = vld [vmem:[%s6914_s3 + $0xc8] sm:$0xff]  ;;  %v123_v16 = vld [vmem:[%s6914_s3 + $0xc0] sm:$0xff]  ;;  %371 = vmatpush1.msra.mxu1 %v125_v12  ;;  %283 = vmatprep.subr.mxu0 %v3055_v13 }
   0x9   :  { %v3053_v17 = vld [vmem:[%s6914_s3 + $0x2b8] sm:$0xff]  ;;  %372 = vmatprep.subr.mxu1 %v124_v14  ;;  %v3052_v19 = vld [vmem:[%s6914_s3 + $0x2b0] sm:$0xff]  ;;  %284 = vmatpush1.msra.mxu0 %v3054_v15  ;;  %v3051_v21 = vld [vmem:[%s6914_s3 + $0x2a8] sm:$0xff] }
   0xa   :  { %v122_v18 = vld [vmem:[%s6914_s3 + $0xb8] sm:$0xff]  ;;  %v121_v20 = vld [vmem:[%s6914_s3 + $0xb0] sm:$0xff]  ;;  %373 = vmatpush1.msra.mxu1 %v123_v16  ;;  %v120_v22 = vld [vmem:[%s6914_s3 + $0xa8] sm:$0xff]  ;;  %285 = vmatprep.subr.mxu0 %v3053_v17 }
   0xb   :  { %374 = vmatprep.subr.mxu1 %v122_v18  ;;  %v3050_v23 = vld [vmem:[%s6914_s3 + $0x2a0] sm:$0xff]  ;;  %286 = vmatpush1.msra.mxu0 %v3052_v19  ;;  %v3049_v25 = vld [vmem:[%s6914_s3 + $0x298] sm:$0xff]  ;;  %v3048_v27 = vld [vmem:[%s6914_s3 + $0x290] sm:$0xff] }
   0xc   :  { %v119_v24 = vld [vmem:[%s6914_s3 + $0xa0] sm:$0xff]  ;;  %375 = vmatpush1.msra.mxu1 %v121_v20  ;;  %v118_v26 = vld [vmem:[%s6914_s3 + $0x98] sm:$0xff]  ;;  %287 = vmatprep.subr.mxu0 %v3051_v21  ;;  %v117_v28 = vld [vmem:[%s6914_s3 + $0x90] sm:$0xff] }
   0xd   :  { %376 = vmatprep.subr.mxu1 %v120_v22  ;;  %288 = vmatpush1.msra.mxu0 %v3050_v23  ;;  %v3047_v29 = vld [vmem:[%s6914_s3 + $0x288] sm:$0xff]  ;;  %v3046_v31 = vld [vmem:[%s6914_s3 + $0x280] sm:$0xff]  ;;  %v3045_v33 = vld [vmem:[%s6914_s3 + $0x278] sm:$0xff] }
   0xe   :  { %377 = vmatpush1.msra.mxu1 %v119_v24  ;;  %v116_v30 = vld [vmem:[%s6914_s3 + $0x88] sm:$0xff]  ;;  %289 = vmatprep.subr.mxu0 %v3049_v25  ;;  %v115_v32 = vld [vmem:[%s6914_s3 + $0x80] sm:$0xff]  ;;  %v114_v34 = vld [vmem:[%s6914_s3 + $0x78] sm:$0xff] }
   0xf   :  { %378 = vmatprep.subr.mxu1 %v118_v26  ;;  %290 = vmatpush1.msra.mxu0 %v3048_v27  ;;  %v3044_v35 = vld [vmem:[%s6914_s3 + $0x270] sm:$0xff]  ;;  %v3043_v37 = vld [vmem:[%s6914_s3 + $0x268] sm:$0xff]  ;;  %v3042_v39 = vld [vmem:[%s6914_s3 + $0x260] sm:$0xff] }
  0x10   :  { %379 = vmatpush1.msra.mxu1 %v117_v28  ;;  %291 = vmatprep.subr.mxu0 %v3047_v29  ;;  %v113_v36 = vld [vmem:[%s6914_s3 + $0x70] sm:$0xff]  ;;  %v112_v38 = vld [vmem:[%s6914_s3 + $0x68] sm:$0xff]  ;;  %v111_v40 = vld [vmem:[%s6914_s3 + $0x60] sm:$0xff] }
  0x11   :  { %380 = vmatprep.subr.mxu1 %v116_v30  ;;  %292 = vmatpush1.msra.mxu0 %v3046_v31  ;;  %v3041_v41 = vld [vmem:[%s6914_s3 + $0x258] sm:$0xff]  ;;  %v3040_v43 = vld [vmem:[%s6914_s3 + $0x250] sm:$0xff]  ;;  %v3039_v45 = vld [vmem:[%s6914_s3 + $0x248] sm:$0xff] }
  0x12   :  { %381 = vmatpush1.msra.mxu1 %v115_v32  ;;  %293 = vmatprep.subr.mxu0 %v3045_v33  ;;  %v110_v42 = vld [vmem:[%s6914_s3 + $0x58] sm:$0xff]  ;;  %v109_v44 = vld [vmem:[%s6914_s3 + $0x50] sm:$0xff]  ;;  %v108_v46 = vld [vmem:[%s6914_s3 + $0x48] sm:$0xff] }
  0x13   :  { %382 = vmatprep.subr.mxu1 %v114_v34  ;;  %294 = vmatpush1.msra.mxu0 %v3044_v35  ;;  %v3038_v47 = vld [vmem:[%s6914_s3 + $0x240] sm:$0xff]  ;;  %v3037_v49 = vld [vmem:[%s6914_s3 + $0x238] sm:$0xff]  ;;  %v3036_v51 = vld [vmem:[%s6914_s3 + $0x230] sm:$0xff] }
  0x14   :  { %383 = vmatpush1.msra.mxu1 %v113_v36  ;;  %295 = vmatprep.subr.mxu0 %v3043_v37  ;;  %v107_v48 = vld [vmem:[%s6914_s3 + $0x40] sm:$0xff]  ;;  %v106_v50 = vld [vmem:[%s6914_s3 + $0x38] sm:$0xff]  ;;  %v105_v52 = vld [vmem:[%s6914_s3 + $0x30] sm:$0xff] }
  0x15   :  { %384 = vmatprep.subr.mxu1 %v112_v38  ;;  %296 = vmatpush1.msra.mxu0 %v3042_v39  ;;  %v3035_v53 = vld [vmem:[%s6914_s3 + $0x228] sm:$0xff]  ;;  %v3034_v55 = vld [vmem:[%s6914_s3 + $0x220] sm:$0xff]  ;;  %v3033_v57 = vld [vmem:[%s6914_s3 + $0x218] sm:$0xff] }
  0x16   :  { %385 = vmatpush1.msra.mxu1 %v111_v40  ;;  %297 = vmatprep.subr.mxu0 %v3041_v41  ;;  %v104_v54 = vld [vmem:[%s6914_s3 + $0x28] sm:$0xff]  ;;  %v103_v56 = vld [vmem:[%s6914_s3 + $0x20] sm:$0xff]  ;;  %v102_v58 = vld [vmem:[%s6914_s3 + $0x18] sm:$0xff] }
  0x17   :  { %386 = vmatprep.subr.mxu1 %v110_v42  ;;  %298 = vmatpush1.msra.mxu0 %v3040_v43  ;;  %v3032_v59 = vld [vmem:[%s6914_s3 + $0x210] sm:$0xff]  ;;  %v3031_v61 = vld [vmem:[%s6914_s3 + $0x208] sm:$0xff]  ;;  %v3030_v63 = vld [vmem:[%s6914_s3 + $0x200] sm:$0xff] }
  0x18   :  { %387 = vmatpush1.msra.mxu1 %v109_v44  ;;  %299 = vmatprep.subr.mxu0 %v3039_v45  ;;  %v101_v60 = vld [vmem:[%s6914_s3 + $0x10] sm:$0xff]  ;;  %v100_v62 = vld [vmem:[%s6914_s3 + $0x8] sm:$0xff]  ;;  %v99_v0 = vld [vmem:[%s6914_s3] sm:$0xff] }
  0x19   :  { %388 = vmatprep.subr.mxu1 %v108_v46  ;;  %300 = vmatpush1.msra.mxu0 %v3038_v47  ;;  %v3093_v1 = vld [vmem:[%s6914_s3 + $0x3f8] sm:$0xff]  ;;  %v3092_v3 = vld [vmem:[%s6914_s3 + $0x3f0] sm:$0xff]  ;;  %v3091_v5 = vld [vmem:[%s6914_s3 + $0x3e8] sm:$0xff] }
  0x1a   :  { %389 = vmatpush1.msra.mxu1 %v107_v48  ;;  %301 = vmatprep.subr.mxu0 %v3037_v49  ;;  %v162_v2 = vld [vmem:[%s6914_s3 + $0x1f8] sm:$0xff]  ;;  %v161_v4 = vld [vmem:[%s6914_s3 + $0x1f0] sm:$0xff]  ;;  %v160_v6 = vld [vmem:[%s6914_s3 + $0x1e8] sm:$0xff] }
  0x1b   :  { %390 = vmatprep.subr.mxu1 %v106_v50  ;;  %302 = vmatpush1.msra.mxu0 %v3036_v51  ;;  %v3090_v7 = vld [vmem:[%s6914_s3 + $0x3e0] sm:$0xff]  ;;  %v3089_v9 = vld [vmem:[%s6914_s3 + $0x3d8] sm:$0xff]  ;;  %v3088_v11 = vld [vmem:[%s6914_s3 + $0x3d0] sm:$0xff] }
  0x1c   :  { %391 = vmatpush1.msra.mxu1 %v105_v52  ;;  %303 = vmatprep.subr.mxu0 %v3035_v53  ;;  %v159_v8 = vld [vmem:[%s6914_s3 + $0x1e0] sm:$0xff]  ;;  %v158_v10 = vld [vmem:[%s6914_s3 + $0x1d8] sm:$0xff]  ;;  %v157_v12 = vld [vmem:[%s6914_s3 + $0x1d0] sm:$0xff] }
  0x1d   :  { %392 = vmatprep.subr.mxu1 %v104_v54  ;;  %304 = vmatpush1.msra.mxu0 %v3034_v55  ;;  %v3087_v13 = vld [vmem:[%s6914_s3 + $0x3c8] sm:$0xff]  ;;  %v3086_v15 = vld [vmem:[%s6914_s3 + $0x3c0] sm:$0xff]  ;;  %v3085_v17 = vld [vmem:[%s6914_s3 + $0x3b8] sm:$0xff] }
  0x1e   :  { %393 = vmatpush1.msra.mxu1 %v103_v56  ;;  %305 = vmatprep.subr.mxu0 %v3033_v57  ;;  %v156_v14 = vld [vmem:[%s6914_s3 + $0x1c8] sm:$0xff]  ;;  %v155_v16 = vld [vmem:[%s6914_s3 + $0x1c0] sm:$0xff]  ;;  %v154_v18 = vld [vmem:[%s6914_s3 + $0x1b8] sm:$0xff] }
  0x1f   :  { %394 = vmatprep.subr.mxu1 %v102_v58  ;;  %306 = vmatpush1.msra.mxu0 %v3032_v59  ;;  %v3084_v19 = vld [vmem:[%s6914_s3 + $0x3b0] sm:$0xff]  ;;  %v3083_v21 = vld [vmem:[%s6914_s3 + $0x3a8] sm:$0xff]  ;;  %v3082_v23 = vld [vmem:[%s6914_s3 + $0x3a0] sm:$0xff] }
  0x20   :  { %395 = vmatpush1.msra.mxu1 %v101_v60  ;;  %307 = vmatprep.subr.mxu0 %v3031_v61  ;;  %v153_v20 = vld [vmem:[%s6914_s3 + $0x1b0] sm:$0xff]  ;;  %v152_v22 = vld [vmem:[%s6914_s3 + $0x1a8] sm:$0xff]  ;;  %v151_v24 = vld [vmem:[%s6914_s3 + $0x1a0] sm:$0xff] }
  0x21   :  { %396 = vmatprep.subr.mxu1 %v100_v62  ;;  %308 = vmatpush1.msra.mxu0 %v3030_v63  ;;  %v3081_v25 = vld [vmem:[%s6914_s3 + $0x398] sm:$0xff]  ;;  %v3080_v27 = vld [vmem:[%s6914_s3 + $0x390] sm:$0xff]  ;;  %v39_v28 = vld [vmem:[%s6915_s0 + $0x8] sm:$0xff] }
  0x22   :  { %397 = vmatpush1.msra.mxu1 %v99_v0  ;;  %309 = vmatprep.subr.mxu0 %v3093_v1  ;;  %v150_v26 = vld [vmem:[%s6914_s3 + $0x198] sm:$0xff]  ;;  %v149_v30 = vld [vmem:[%s6914_s3 + $0x190] sm:$0xff]  ;;  %v56_v31 = vrot.slane %v39_v28, 5  ;;  %v38_v33 = vld [vmem:[%s6915_s0] sm:$0xff] }
  0x23   :  { %398 = vmatprep.subr.mxu1 %v162_v2  ;;  %310 = vmatpush2.msra.mxu0 %v3092_v3  ;;  %v41_v29 = vld [vmem:[%s6915_s0 + $0x18] sm:$0xff]  ;;  %v40_v34 = vld [vmem:[%s6915_s0 + $0x10] sm:$0xff]  ;;  %v3079_v35 = vld [vmem:[%s6914_s3 + $0x388] sm:$0xff]  ;;  %v55_v37 = vrot.slane %v38_v33, 5 }
  0x24   :  { %399 = vmatpush2.msra.mxu1 %v161_v4  ;;  %311 = vmatprep.subr.mxu0 %v3091_v5  ;;  %v59_v32 = vrot.slane %v41_v29, 5  ;;  %v148_v36 = vld [vmem:[%s6914_s3 + $0x188] sm:$0xff]  ;;  %v57_v38 = vrot.slane %v40_v34, 5  ;;  %v3078_v39 = vld [vmem:[%s6914_s3 + $0x380] sm:$0xff]  ;;  %80 = vst [vmem:[#allocation2] sm:$0xf8] %v56_v31 }
  0x25   :  { %400 = vmatprep.subr.mxu1 %v160_v6  ;;  %312 = vmatpush2.msra.mxu0 %v3090_v7  ;;  %v147_v40 = vld [vmem:[%s6914_s3 + $0x180] sm:$0xff]  ;;  %v3077_v42 = vld [vmem:[%s6914_s3 + $0x378] sm:$0xff]  ;;  %79 = vst [vmem:[#allocation2 + $0x30] sm:$0xf8] %v55_v37  ;;  %v3076_v45 = vld [vmem:[%s6914_s3 + $0x370] sm:$0xff] }
  0x26   :  { %401 = vmatpush2.msra.mxu1 %v159_v8  ;;  %313 = vmatprep.subr.mxu0 %v3089_v9  ;;  %v4149_v41 = vsel %vm54_vm0, %v56_v31, %v59_v32  ;;  %84 = vst [vmem:[#allocation2 + $0x20] sm:$0x7] %v59_v32  ;;  %v146_v43 = vld [vmem:[%s6914_s3 + $0x178] sm:$0xff]  ;;  %v4159_v44 = vsel %vm54_vm0, %v55_v37, %v57_v38  ;;  %83 = vst [vmem:[#allocation2 + $0x50] sm:$0x7] %v57_v38  ;;  %v145_v46 = vld [vmem:[%s6914_s3 + $0x170] sm:$0xff] }
  0x27   :  { %402 = vmatprep.subr.mxu1 %v158_v10  ;;  %314 = vmatpush2.msra.mxu0 %v3088_v11  ;;  %82 = vst [vmem:[#allocation2 + $0x18] sm:$0xff] %v4149_v41  ;;  %81 = vst [vmem:[#allocation2 + $0x58] sm:$0xff] %v4159_v44  ;;  %v3075_v47 = vld [vmem:[%s6914_s3 + $0x368] sm:$0xff]  ;;  %v3074_v49 = vld [vmem:[%s6914_s3 + $0x360] sm:$0xff]  ;;  %v188_v6 = vrot.slane %v4149_v41, 1 }
  0x28   :  { %403 = vmatpush2.msra.mxu1 %v157_v12  ;;  %315 = vmatprep.subr.mxu0 %v3087_v13  ;;  %v144_v48 = vld [vmem:[%s6914_s3 + $0x168] sm:$0xff]  ;;  %v143_v50 = vld [vmem:[%s6914_s3 + $0x160] sm:$0xff]  ;;  %v3073_v51 = vld [vmem:[%s6914_s3 + $0x358] sm:$0xff]  ;;  %v185_v12 = vrot.slane %v4159_v44, 1 }
  0x29   :  { %404 = vmatprep.subr.mxu1 %v156_v14  ;;  %316 = vmatpush2.msra.mxu0 %v3086_v15  ;;  %v142_v52 = vld [vmem:[%s6914_s3 + $0x158] sm:$0xff]  ;;  %v3072_v53 = vld [vmem:[%s6914_s3 + $0x350] sm:$0xff]  ;;  %v3071_v55 = vld [vmem:[%s6914_s3 + $0x348] sm:$0xff] }
  0x2a   :  { %405 = vmatpush2.msra.mxu1 %v155_v16  ;;  %317 = vmatprep.subr.mxu0 %v3085_v17  ;;  %v141_v54 = vld [vmem:[%s6914_s3 + $0x150] sm:$0xff]  ;;  %v140_v56 = vld [vmem:[%s6914_s3 + $0x148] sm:$0xff]  ;;  %v3070_v57 = vld [vmem:[%s6914_s3 + $0x340] sm:$0xff] }
  0x2b   :  { %406 = vmatprep.subr.mxu1 %v154_v18  ;;  %318 = vmatpush2.msra.mxu0 %v3084_v19  ;;  %v139_v58 = vld [vmem:[%s6914_s3 + $0x140] sm:$0xff]  ;;  %v3069_v59 = vld [vmem:[%s6914_s3 + $0x338] sm:$0xff]  ;;  %v3068_v62 = vld [vmem:[%s6914_s3 + $0x330] sm:$0xff] }
  0x2c   :  { %407 = vmatpush2.msra.mxu1 %v153_v20  ;;  %319 = vmatprep.subr.mxu0 %v3083_v21  ;;  %v138_v60 = vld [vmem:[%s6914_s3 + $0x138] sm:$0xff]  ;;  %v164_v61 = vld [vmem:[#allocation2] sm:$0xfe]  ;;  %v137_v63 = vld [vmem:[%s6914_s3 + $0x130] sm:$0xff] }
  0x2d   :  { %408 = vmatprep.subr.mxu1 %v152_v22  ;;  %320 = vmatpush2.msra.mxu0 %v3082_v23  ;;  %v3067_v0 = vld [vmem:[%s6914_s3 + $0x328] sm:$0xff]  ;;  %v163_v2 = vld [vmem:[#allocation2 + $0x30] sm:$0xfe]  ;;  %v3066_v3 = vld [vmem:[%s6914_s3 + $0x320] sm:$0xff]  ;;  %v187_v5 = vrot.slane %v164_v61, 1 }
  0x2e   :  { %409 = vmatpush2.msra.mxu1 %v151_v24  ;;  %321 = vmatprep.subr.mxu0 %v3081_v25  ;;  %v136_v1 = vld [vmem:[%s6914_s3 + $0x128] sm:$0xff]  ;;  %v135_v4 = vld [vmem:[%s6914_s3 + $0x120] sm:$0xff]  ;;  %v3065_v7 = vld [vmem:[%s6914_s3 + $0x318] sm:$0xff]  ;;  %v184_v11 = vrot.slane %v163_v2, 1 }
  0x2f   :  { %410 = vmatprep.subr.mxu1 %v150_v26  ;;  %322 = vmatpush2.msra.mxu0 %v3080_v27  ;;  %v134_v8 = vld [vmem:[%s6914_s3 + $0x118] sm:$0xff]  ;;  %v3064_v9 = vld [vmem:[%s6914_s3 + $0x310] sm:$0xff]  ;;  %v3063_v13 = vld [vmem:[%s6914_s3 + $0x308] sm:$0xff]  ;;  %v189_v16 = vsel %vm183_vm1, %v187_v5, %v188_v6 }
  0x30   :  { %411 = vmatpush2.msra.mxu1 %v149_v30  ;;  %323 = vmatprep.subr.mxu0 %v3079_v35  ;;  %v133_v10 = vld [vmem:[%s6914_s3 + $0x110] sm:$0xff]  ;;  %v132_v14 = vld [vmem:[%s6914_s3 + $0x108] sm:$0xff]  ;;  %v3062_v15 = vld [vmem:[%s6914_s3 + $0x300] sm:$0xff]  ;;  %v186_v19 = vsel %vm183_vm1, %v184_v11, %v185_v12 }
  0x31   :  { %412 = vmatprep.subr.mxu1 %v148_v36  ;;  %324 = vmatpush2.msra.mxu0 %v3078_v39  ;;  %v131_v17 = vld [vmem:[%s6914_s3 + $0x100] sm:$0xff]  ;;  %v91_v20 = vld [vmem:[#allocation2 + $0x30] sm:$0xff]  ;;  %v3125_v21 = vld [vmem:[%s6914_s3 + $0x4f8] sm:$0xff] }
  0x32   :  { %413 = vmatpush2.msra.mxu1 %v147_v40  ;;  %325 = vmatprep.subr.mxu0 %v3077_v42  ;;  %v92_v18 = vld [vmem:[#allocation2] sm:$0xff]  ;;  %v3189_v22 = vld [vmem:[%s6914_s3 + $0x6f8] sm:$0xff]  ;;  %v3124_v23 = vld [vmem:[%s6914_s3 + $0x4f0] sm:$0xff] }
  0x33   :  { %414 = vmatprep.subr.mxu1 %v146_v43  ;;  %326 = vmatpush2.msra.mxu0 %v3076_v45  ;;  %v3188_v24 = vld [vmem:[%s6914_s3 + $0x6f0] sm:$0xff]  ;;  %v3123_v25 = vld [vmem:[%s6914_s3 + $0x4e8] sm:$0xff]  ;;  %v3122_v27 = vld [vmem:[%s6914_s3 + $0x4e0] sm:$0xff] }
  0x34   :  { %415 = vmatpush2.msra.mxu1 %v145_v46  ;;  %327 = vmatprep.subr.mxu0 %v3075_v47  ;;  %v3187_v26 = vld [vmem:[%s6914_s3 + $0x6e8] sm:$0xff]  ;;  %v3186_v28 = vld [vmem:[%s6914_s3 + $0x6e0] sm:$0xff]  ;;  %v3121_v29 = vld [vmem:[%s6914_s3 + $0x4d8] sm:$0xff] }
  0x35   :  { %416 = vmatprep.subr.mxu1 %v144_v48  ;;  %328 = vmatpush2.msra.mxu0 %v3074_v49  ;;  %v3185_v30 = vld [vmem:[%s6914_s3 + $0x6d8] sm:$0xff]  ;;  %v3120_v31 = vld [vmem:[%s6914_s3 + $0x4d0] sm:$0xff]  ;;  %v3119_v33 = vld [vmem:[%s6914_s3 + $0x4c8] sm:$0xff] }
  0x36   :  { %417 = vmatpush2.msra.mxu1 %v143_v50  ;;  %329 = vmatprep.subr.mxu0 %v3073_v51  ;;  %v3184_v32 = vld [vmem:[%s6914_s3 + $0x6d0] sm:$0xff]  ;;  %v3183_v34 = vld [vmem:[%s6914_s3 + $0x6c8] sm:$0xff]  ;;  %v3118_v35 = vld [vmem:[%s6914_s3 + $0x4c0] sm:$0xff] }
  0x37   :  { %418 = vmatprep.subr.mxu1 %v142_v52  ;;  %330 = vmatpush2.msra.mxu0 %v3072_v53  ;;  %v3182_v36 = vld [vmem:[%s6914_s3 + $0x6c0] sm:$0xff]  ;;  %v3117_v37 = vld [vmem:[%s6914_s3 + $0x4b8] sm:$0xff]  ;;  %v3116_v39 = vld [vmem:[%s6914_s3 + $0x4b0] sm:$0xff] }
  0x38   :  { %419 = vmatpush2.msra.mxu1 %v141_v54  ;;  %331 = vmatprep.subr.mxu0 %v3071_v55  ;;  %v3181_v38 = vld [vmem:[%s6914_s3 + $0x6b8] sm:$0xff]  ;;  %v3180_v40 = vld [vmem:[%s6914_s3 + $0x6b0] sm:$0xff]  ;;  %v3115_v42 = vld [vmem:[%s6914_s3 + $0x4a8] sm:$0xff] }
  0x39   :  { %420 = vmatprep.subr.mxu1 %v140_v56  ;;  %332 = vmatpush2.msra.mxu0 %v3070_v57  ;;  %v3179_v43 = vld [vmem:[%s6914_s3 + $0x6a8] sm:$0xff]  ;;  %v3114_v45 = vld [vmem:[%s6914_s3 + $0x4a0] sm:$0xff]  ;;  %v3113_v47 = vld [vmem:[%s6914_s3 + $0x498] sm:$0xff] }
  0x3a   :  { %421 = vmatpush2.msra.mxu1 %v139_v58  ;;  %333 = vmatprep.subr.mxu0 %v3069_v59  ;;  %v3178_v46 = vld [vmem:[%s6914_s3 + $0x6a0] sm:$0xff]  ;;  %v3177_v48 = vld [vmem:[%s6914_s3 + $0x698] sm:$0xff]  ;;  %v3112_v49 = vld [vmem:[%s6914_s3 + $0x490] sm:$0xff] }
  0x3b   :  { %422 = vmatprep.subr.mxu1 %v138_v60  ;;  %334 = vmatpush2.msra.mxu0 %v3068_v62  ;;  %v3176_v50 = vld [vmem:[%s6914_s3 + $0x690] sm:$0xff]  ;;  %v3111_v51 = vld [vmem:[%s6914_s3 + $0x488] sm:$0xff]  ;;  %v3110_v53 = vld [vmem:[%s6914_s3 + $0x480] sm:$0xff] }
  0x3c   :  { %423 = vmatpush2.msra.mxu1 %v137_v63  ;;  %335 = vmatprep.subr.mxu0 %v3067_v0  ;;  %v3175_v52 = vld [vmem:[%s6914_s3 + $0x688] sm:$0xff]  ;;  %v3174_v54 = vld [vmem:[%s6914_s3 + $0x680] sm:$0xff]  ;;  %v3109_v55 = vld [vmem:[%s6914_s3 + $0x478] sm:$0xff] }
  0x3d   :  { %424 = vmatprep.subr.mxu1 %v136_v1  ;;  %336 = vmatpush2.msra.mxu0 %v3066_v3  ;;  %v3108_v56 = vld [vmem:[%s6914_s3 + $0x470] sm:$0xff]  ;;  %v3173_v57 = vld [vmem:[%s6914_s3 + $0x678] sm:$0xff]  ;;  %v43_v59 = vld [vmem:[%s6915_s0 + $0x28] sm:$0xff] }
  0x3e   :  { %425 = vmatpush2.msra.mxu1 %v135_v4  ;;  %337 = vmatprep.subr.mxu0 %v3065_v7  ;;  %v3172_v58 = vld [vmem:[%s6914_s3 + $0x670] sm:$0xff]  ;;  %v45_v60 = vld [vmem:[%s6915_s0 + $0x38] sm:$0xff]  ;;  %v3107_v61 = vld [vmem:[%s6914_s3 + $0x468] sm:$0xff]  ;;  %v62_v63 = vrot.slane %v43_v59, 5 }
  0x3f   :  { %426 = vmatprep.subr.mxu1 %v134_v8  ;;  %338 = vmatpush2.msra.mxu0 %v3064_v9  ;;  %v3171_v62 = vld [vmem:[%s6914_s3 + $0x668] sm:$0xff]  ;;  %v65_v0 = vrot.slane %v45_v60, 5  ;;  %v42_v1 = vld [vmem:[%s6915_s0 + $0x20] sm:$0xff]  ;;  %v44_v4 = vld [vmem:[%s6915_s0 + $0x30] sm:$0xff] }
  0x40   :  { %427 = vmatpush2.msra.mxu1 %v133_v10  ;;  %339 = vmatprep.subr.mxu0 %v3063_v13  ;;  %v3106_v2 = vld [vmem:[%s6914_s3 + $0x460] sm:$0xff]  ;;  %v61_v5 = vrot.slane %v42_v1, 5  ;;  %v3105_v7 = vld [vmem:[%s6914_s3 + $0x458] sm:$0xff]  ;;  %86 = vst [vmem:[#allocation2 + $0x38] sm:$0xf8] %v62_v63  ;;  %v63_v10 = vrot.slane %v44_v4, 5 }
  0x41   :  { %428 = vmatprep.subr.mxu1 %v132_v14  ;;  %340 = vmatpush2.msra.mxu0 %v3062_v15  ;;  %v3170_v3 = vld [vmem:[%s6914_s3 + $0x660] sm:$0xff]  ;;  %v3169_v8 = vld [vmem:[%s6914_s3 + $0x658] sm:$0xff]  ;;  %v4399_v9 = vsel %vm54_vm0, %v62_v63, %v65_v0  ;;  %90 = vst [vmem:[#allocation2 + $0x40] sm:$0x7] %v65_v0  ;;  %v3104_v11 = vld [vmem:[%s6914_s3 + $0x450] sm:$0xff] }
  0x42   :  { %341 = vmatprep.mubr.f32.mxu0 %v189_v16  ;;  %429 = vmatpush2.msra.mxu1 %v131_v17  ;;  %v3168_v13 = vld [vmem:[%s6914_s3 + $0x650] sm:$0xff]  ;;  %88 = vst [vmem:[#allocation2 + $0x48] sm:$0xff] %v4399_v9  ;;  %85 = vst [vmem:[#allocation2 + $0x8] sm:$0xf8] %v61_v5  ;;  %v3103_v14 = vld [vmem:[%s6914_s3 + $0x448] sm:$0xff]  ;;  %v4415_v16 = vsel %vm54_vm0, %v61_v5, %v63_v10 }
  0x43   :  { %430 = vmatprep.mubr.f32.mxu1 %v92_v18  ;;  %342 = vmatmul.mubr.f32.vlgmr.msra.gmra.mxu0 %v186_v19  ;;  %v3167_v15 = vld [vmem:[%s6914_s3 + $0x648] sm:$0xff]  ;;  %89 = vst [vmem:[#allocation2 + $0x10] sm:$0x7] %v63_v10  ;;  %v3102_v17 = vld [vmem:[%s6914_s3 + $0x440] sm:$0xff]  ;;  %87 = vst [vmem:[#allocation2 + $0x28] sm:$0xff] %v4415_v16 }
  0x44   :  { %431 = vmatmul.mubr.f32.vlgmr.msra.gmra.mxu1 %v91_v20  ;;  %565 = vmatprep.subr.mxu0 %v3125_v21  ;;  %v3166_v18 = vld [vmem:[%s6914_s3 + $0x640] sm:$0xff]  ;;  %v3101_v19 = vld [vmem:[%s6914_s3 + $0x438] sm:$0xff]  ;;  %v3100_v21 = vld [vmem:[%s6914_s3 + $0x430] sm:$0xff] }
  0x45   :  { %772 = vmatprep.subr.mxu1 %v3189_v22  ;;  %566 = vmatpush1.msra.mxu0 %v3124_v23  ;;  %v3165_v20 = vld [vmem:[%s6914_s3 + $0x638] sm:$0xff]  ;;  %v3164_v22 = vld [vmem:[%s6914_s3 + $0x630] sm:$0xff]  ;;  %v3099_v23 = vld [vmem:[%s6914_s3 + $0x428] sm:$0xff] }
  0x46   :  { %773 = vmatpush1.msra.mxu1 %v3188_v24  ;;  %567 = vmatprep.subr.mxu0 %v3123_v25  ;;  %v3163_v24 = vld [vmem:[%s6914_s3 + $0x628] sm:$0xff]  ;;  %v3098_v25 = vld [vmem:[%s6914_s3 + $0x420] sm:$0xff]  ;;  %v3209_v63 = vld [vmem:[%s6914_s3 + $0x798] sm:$0xff] }
  0x47   :  { %774 = vmatprep.subr.mxu1 %v3187_v26  ;;  %568 = vmatpush1.msra.mxu0 %v3122_v27  ;;  %v3162_v26 = vld [vmem:[%s6914_s3 + $0x620] sm:$0xff]  ;;  %v3097_v27 = vld [vmem:[%s6914_s3 + $0x418] sm:$0xff]  ;;  %v3211_v59 = vld [vmem:[%s6914_s3 + $0x7a8] sm:$0xff] }
  0x48   :  { %775 = vmatpush1.msra.mxu1 %v3186_v28  ;;  %569 = vmatprep.subr.mxu0 %v3121_v29  ;;  %v3161_v28 = vld [vmem:[%s6914_s3 + $0x618] sm:$0xff]  ;;  %v3096_v29 = vld [vmem:[%s6914_s3 + $0x410] sm:$0xff]  ;;  %v3146_v60 = vld [vmem:[%s6914_s3 + $0x5a0] sm:$0xff] }
  0x49   :  { %776 = vmatprep.subr.mxu1 %v3185_v30  ;;  %570 = vmatpush1.msra.mxu0 %v3120_v31  ;;  %v3160_v30 = vld [vmem:[%s6914_s3 + $0x610] sm:$0xff]  ;;  %v3095_v31 = vld [vmem:[%s6914_s3 + $0x408] sm:$0xff] }
  0x4a   :  { %777 = vmatpush1.msra.mxu1 %v3184_v32  ;;  %571 = vmatprep.subr.mxu0 %v3119_v33  ;;  %v3159_v32 = vld [vmem:[%s6914_s3 + $0x608] sm:$0xff]  ;;  %v3094_v33 = vld [vmem:[%s6914_s3 + $0x400] sm:$0xff]  ;;  %v165_v1 = vld [vmem:[#allocation2 + $0x50] sm:$0x1] }
  0x4b   :  { %778 = vmatprep.subr.mxu1 %v3183_v34  ;;  %572 = vmatpush1.msra.mxu0 %v3118_v35  ;;  %v3158_v34 = vld [vmem:[%s6914_s3 + $0x600] sm:$0xff]  ;;  %v3157_v35 = vld [vmem:[%s6914_s3 + $0x5f8] sm:$0xff]  ;;  %v3143_v4 = vld [vmem:[%s6914_s3 + $0x588] sm:$0xff]  ;;  %v190_v10 = vrot.slane %v165_v1, 1 }
  0x4c   :  { %779 = vmatpush1.msra.mxu1 %v3182_v36  ;;  %573 = vmatprep.subr.mxu0 %v3117_v37  ;;  %v3221_v36 = vld [vmem:[%s6914_s3 + $0x7f8] sm:$0xff]  ;;  %v3156_v37 = vld [vmem:[%s6914_s3 + $0x5f0] sm:$0xff]  ;;  %v3207_v5 = vld [vmem:[%s6914_s3 + $0x788] sm:$0xff] }
  0x4d   :  { %780 = vmatprep.subr.mxu1 %v3181_v38  ;;  %574 = vmatpush1.msra.mxu0 %v3116_v39  ;;  %v3220_v38 = vld [vmem:[%s6914_s3 + $0x7f0] sm:$0xff]  ;;  %v3155_v39 = vld [vmem:[%s6914_s3 + $0x5e8] sm:$0xff] }
  0x4e   :  { %781 = vmatpush1.msra.mxu1 %v3180_v40  ;;  %575 = vmatprep.subr.mxu0 %v3115_v42  ;;  %v3219_v40 = vld [vmem:[%s6914_s3 + $0x7e8] sm:$0xff]  ;;  %v3154_v42 = vld [vmem:[%s6914_s3 + $0x5e0] sm:$0xff] }
  0x4f   :  { %782 = vmatprep.subr.mxu1 %v3179_v43  ;;  %576 = vmatpush1.msra.mxu0 %v3114_v45  ;;  %v3218_v43 = vld [vmem:[%s6914_s3 + $0x7e0] sm:$0xff]  ;;  %v3153_v45 = vld [vmem:[%s6914_s3 + $0x5d8] sm:$0xff]  ;;  %v3127_v1 = vld [vmem:[%s6914_s3 + $0x508] sm:$0xff] }
  0x50   :  { %783 = vmatpush1.msra.mxu1 %v3178_v46  ;;  %577 = vmatprep.subr.mxu0 %v3113_v47  ;;  %v3217_v46 = vld [vmem:[%s6914_s3 + $0x7d8] sm:$0xff]  ;;  %v3152_v47 = vld [vmem:[%s6914_s3 + $0x5d0] sm:$0xff] }
  0x51   :  { %784 = vmatprep.subr.mxu1 %v3177_v48  ;;  %578 = vmatpush1.msra.mxu0 %v3112_v49  ;;  %v3216_v48 = vld [vmem:[%s6914_s3 + $0x7d0] sm:$0xff]  ;;  %v3151_v49 = vld [vmem:[%s6914_s3 + $0x5c8] sm:$0xff] }
  0x52   :  { %785 = vmatpush1.msra.mxu1 %v3176_v50  ;;  %579 = vmatprep.subr.mxu0 %v3111_v51  ;;  %v3215_v50 = vld [vmem:[%s6914_s3 + $0x7c8] sm:$0xff]  ;;  %v3150_v51 = vld [vmem:[%s6914_s3 + $0x5c0] sm:$0xff] }
  0x53   :  { %786 = vmatprep.subr.mxu1 %v3175_v52  ;;  %580 = vmatpush1.msra.mxu0 %v3110_v53  ;;  %v3214_v52 = vld [vmem:[%s6914_s3 + $0x7c0] sm:$0xff]  ;;  %v3149_v53 = vld [vmem:[%s6914_s3 + $0x5b8] sm:$0xff] }
  0x54   :  { %787 = vmatpush1.msra.mxu1 %v3174_v54  ;;  %581 = vmatprep.subr.mxu0 %v3109_v55  ;;  %v3213_v54 = vld [vmem:[%s6914_s3 + $0x7b8] sm:$0xff]  ;;  %v3148_v55 = vld [vmem:[%s6914_s3 + $0x5b0] sm:$0xff] }
  0x55   :  { %788 = vmatprep.subr.mxu1 %v3173_v57  ;;  %582 = vmatpush1.msra.mxu0 %v3108_v56  ;;  %v3212_v56 = vld [vmem:[%s6914_s3 + $0x7b0] sm:$0xff]  ;;  %v166_v57 = vld [vmem:[#allocation2 + $0x20] sm:$0x1] }
  0x56   :  { %789 = vmatpush1.msra.mxu1 %v3172_v58  ;;  %583 = vmatprep.subr.mxu0 %v3107_v61  ;;  %v3147_v58 = vld [vmem:[%s6914_s3 + $0x5a8] sm:$0xff]  ;;  %v3210_v61 = vld [vmem:[%s6914_s3 + $0x7a0] sm:$0xff]  ;;  %v192_v0 = vrot.slane %v166_v57, 1 }
  0x57   :  { %790 = vmatprep.subr.mxu1 %v3171_v62  ;;  %584 = vmatpush1.msra.mxu0 %v3106_v2  ;;  %v3145_v62 = vld [vmem:[%s6914_s3 + $0x598] sm:$0xff]  ;;  %v3144_v2 = vld [vmem:[%s6914_s3 + $0x590] sm:$0xff]  ;;  %v663_v57 = vld [vmem:[#allocation2] sm:$0xf8] }
  0x58   :  { %791 = vmatpush1.msra.mxu1 %v3170_v3  ;;  %585 = vmatprep.subr.mxu0 %v3105_v7  ;;  %v3208_v3 = vld [vmem:[%s6914_s3 + $0x790] sm:$0xff]  ;;  %v3142_v7 = vld [vmem:[%s6914_s3 + $0x580] sm:$0xff] }
  0x59   :  { %792 = vmatprep.subr.mxu1 %v3169_v8  ;;  %586 = vmatpush1.msra.mxu0 %v3104_v11  ;;  %v3206_v8 = vld [vmem:[%s6914_s3 + $0x780] sm:$0xff]  ;;  %v3141_v11 = vld [vmem:[%s6914_s3 + $0x578] sm:$0xff] }
  0x5a   :  { %793 = vmatpush1.msra.mxu1 %v3168_v13  ;;  %587 = vmatprep.subr.mxu0 %v3103_v14  ;;  %v193_v13 = vsel %vm183_vm1, %v188_v6, %v192_v0  ;;  %v168_v14 = vld [vmem:[#allocation2 + $0x38] sm:$0xfe]  ;;  %v191_v6 = vsel %vm183_vm1, %v185_v12, %v190_v10  ;;  %v3194_v0 = vld [vmem:[%s6914_s3 + $0x720] sm:$0xff] }
  0x5b   :  { %794 = vmatprep.subr.mxu1 %v3167_v15  ;;  %588 = vmatpush1.msra.mxu0 %v3102_v17  ;;  %v3140_v15 = vld [vmem:[%s6914_s3 + $0x570] sm:$0xff]  ;;  %v3139_v17 = vld [vmem:[%s6914_s3 + $0x568] sm:$0xff]  ;;  %v3137_v12 = vld [vmem:[%s6914_s3 + $0x558] sm:$0xff] }
  0x5c   :  { %795 = vmatpush1.msra.mxu1 %v3166_v18  ;;  %589 = vmatprep.subr.mxu0 %v3101_v19  ;;  %v3205_v18 = vld [vmem:[%s6914_s3 + $0x778] sm:$0xff]  ;;  %v167_v19 = vld [vmem:[#allocation2 + $0x8] sm:$0xfe] }
  0x5d   :  { %796 = vmatprep.subr.mxu1 %v3165_v20  ;;  %590 = vmatpush1.msra.mxu0 %v3100_v21  ;;  %v197_v20 = vrot.slane %v168_v14, 1  ;;  %v198_v21 = vrot.slane %v4399_v9, 1 }
  0x5e   :  { %797 = vmatpush1.msra.mxu1 %v3164_v22  ;;  %591 = vmatprep.subr.mxu0 %v3099_v23  ;;  %v3138_v22 = vld [vmem:[%s6914_s3 + $0x560] sm:$0xff]  ;;  %v3204_v23 = vld [vmem:[%s6914_s3 + $0x770] sm:$0xff] }
  0x5f   :  { %798 = vmatprep.subr.mxu1 %v3163_v24  ;;  %592 = vmatpush1.msra.mxu0 %v3098_v25  ;;  %v3203_v24 = vld [vmem:[%s6914_s3 + $0x768] sm:$0xff]  ;;  %v194_v25 = vrot.slane %v167_v19, 1  ;;  %v3190_v19 = vld [vmem:[%s6914_s3 + $0x700] sm:$0xff] }
  0x60   :  { %799 = vmatpush1.msra.mxu1 %v3162_v26  ;;  %593 = vmatprep.subr.mxu0 %v3097_v27  ;;  %v195_v26 = vrot.slane %v4415_v16, 1  ;;  %v3136_v27 = vld [vmem:[%s6914_s3 + $0x550] sm:$0xff] }
  0x61   :  { %800 = vmatprep.subr.mxu1 %v3161_v28  ;;  %594 = vmatpush1.msra.mxu0 %v3096_v29  ;;  %v3202_v28 = vld [vmem:[%s6914_s3 + $0x760] sm:$0xff] }
  0x62   :  { %801 = vmatpush1.msra.mxu1 %v3160_v30  ;;  %595 = vmatprep.subr.mxu0 %v3095_v31  ;;  %v170_v29 = vld [vmem:[#allocation2 + $0x40] sm:$0x1]  ;;  %v199_v30 = vsel %vm183_vm1, %v197_v20, %v198_v21  ;;  %v96_v31 = vld [vmem:[#allocation2 + $0x38] sm:$0xff] }
  0x63   :  { %802 = vmatprep.subr.mxu1 %v3159_v32  ;;  %596 = vmatpush1.msra.mxu0 %v3094_v33  ;;  %v3135_v32 = vld [vmem:[%s6914_s3 + $0x548] sm:$0xff]  ;;  %v3201_v33 = vld [vmem:[%s6914_s3 + $0x758] sm:$0xff] }
  0x64   :  { %803 = vmatpush1.msra.mxu1 %v3158_v34  ;;  %597 = vmatprep.subr.mxu0 %v3157_v35  ;;  %v169_v34 = vld [vmem:[#allocation2 + $0x10] sm:$0x1]  ;;  %v196_v35 = vsel %vm183_vm1, %v194_v25, %v195_v26 }
  0x65   :  { %804 = vmatprep.subr.mxu1 %v3221_v36  ;;  %598 = vmatpush2.msra.mxu0 %v3156_v37  ;;  %v95_v36 = vld [vmem:[#allocation2 + $0x8] sm:$0xff]  ;;  %v202_v37 = vrot.slane %v170_v29, 1 }
  0x66   :  { %805 = vmatpush2.msra.mxu1 %v3220_v38  ;;  %599 = vmatprep.subr.mxu0 %v3155_v39  ;;  %v3134_v38 = vld [vmem:[%s6914_s3 + $0x540] sm:$0xff]  ;;  %v3200_v39 = vld [vmem:[%s6914_s3 + $0x750] sm:$0xff]  ;;  %v459_v29 = vld [vmem:[#allocation2 + $0x8] sm:$0xfc] }
  0x67   :  { %806 = vmatprep.subr.mxu1 %v3219_v40  ;;  %600 = vmatpush2.msra.mxu0 %v3154_v42  ;;  %v3133_v40 = vld [vmem:[%s6914_s3 + $0x538] sm:$0xff]  ;;  %v3199_v42 = vld [vmem:[%s6914_s3 + $0x748] sm:$0xff] }
  0x68   :  { %807 = vmatpush2.msra.mxu1 %v3218_v43  ;;  %601 = vmatprep.subr.mxu0 %v3153_v45  ;;  %v200_v43 = vrot.slane %v169_v34, 1  ;;  %v3132_v45 = vld [vmem:[%s6914_s3 + $0x530] sm:$0xff]  ;;  %v3315_v34 = vld [vmem:[%s6914_s3 + $0xae8] sm:$0xff] }
  0x69   :  { %808 = vmatprep.subr.mxu1 %v3217_v46  ;;  %602 = vmatpush2.msra.mxu0 %v3152_v47  ;;  %v3198_v46 = vld [vmem:[%s6914_s3 + $0x740] sm:$0xff]  ;;  %v203_v47 = vsel %vm183_vm1, %v198_v21, %v202_v37  ;;  %v3252_v21 = vld [vmem:[%s6914_s3 + $0x8f0] sm:$0xff]  ;;  %v667_v37 = vld [vmem:[#allocation2 + $0x38] sm:$0xf8] }
  0x6a   :  { %809 = vmatpush2.msra.mxu1 %v3216_v48  ;;  %603 = vmatprep.subr.mxu0 %v3151_v49  ;;  %v456_v48 = vld [vmem:[#allocation2] sm:$0xfc]  ;;  %v3131_v49 = vld [vmem:[%s6914_s3 + $0x528] sm:$0xff] }
  0x6b   :  { %810 = vmatprep.subr.mxu1 %v3215_v50  ;;  %604 = vmatpush2.msra.mxu0 %v3150_v51  ;;  %v3197_v50 = vld [vmem:[%s6914_s3 + $0x738] sm:$0xff]  ;;  %v455_v51 = vld [vmem:[#allocation2 + $0x30] sm:$0xfc] }
  0x6c   :  { %811 = vmatpush2.msra.mxu1 %v3214_v52  ;;  %605 = vmatprep.subr.mxu0 %v3149_v53  ;;  %v201_v52 = vsel %vm183_vm1, %v195_v26, %v200_v43  ;;  %v3130_v53 = vld [vmem:[%s6914_s3 + $0x520] sm:$0xff]  ;;  %v460_v26 = vld [vmem:[#allocation2 + $0x38] sm:$0xfc] }
  0x6d   :  { %812 = vmatprep.subr.mxu1 %v3213_v54  ;;  %606 = vmatpush2.msra.mxu0 %v3148_v55  ;;  %v3196_v54 = vld [vmem:[%s6914_s3 + $0x730] sm:$0xff]  ;;  %v475_v55 = vrot.slane %v456_v48, 2  ;;  %v3314_v43 = vld [vmem:[%s6914_s3 + $0xae0] sm:$0xff]  ;;  %v3313_v48 = vld [vmem:[%s6914_s3 + $0xad8] sm:$0xff] }
  0x6e   :  { %813 = vmatpush2.msra.mxu1 %v3212_v56  ;;  %607 = vmatprep.subr.mxu0 %v3147_v58  ;;  %v476_v56 = vrot.slane %v4149_v41, 2  ;;  %v3129_v58 = vld [vmem:[%s6914_s3 + $0x518] sm:$0xff] }
  0x6f   :  { %814 = vmatprep.subr.mxu1 %v3211_v59  ;;  %608 = vmatpush2.msra.mxu0 %v3146_v60  ;;  %v3195_v59 = vld [vmem:[%s6914_s3 + $0x728] sm:$0xff]  ;;  %v472_v60 = vrot.slane %v455_v51, 2  ;;  %v462_v51 = vld [vmem:[#allocation2 + $0x40] sm:$0x3] }
  0x70   :  { %815 = vmatpush2.msra.mxu1 %v3210_v61  ;;  %609 = vmatprep.subr.mxu0 %v3145_v62  ;;  %v473_v61 = vrot.slane %v4159_v44, 2  ;;  %v662_v62 = vld [vmem:[#allocation2 + $0x30] sm:$0xf8] }
  0x71   :  { %816 = vmatprep.subr.mxu1 %v3209_v63  ;;  %610 = vmatpush2.msra.mxu0 %v3144_v2  ;;  %v3128_v63 = vld [vmem:[%s6914_s3 + $0x510] sm:$0xff]  ;;  %v3193_v2 = vld [vmem:[%s6914_s3 + $0x718] sm:$0xff]  ;;  %v679_v10 = vrot.slane %v662_v62, 3 }
  0x72   :  { %817 = vmatpush2.msra.mxu1 %v3208_v3  ;;  %611 = vmatprep.subr.mxu0 %v3143_v4  ;;  %v682_v3 = vrot.slane %v663_v57, 3  ;;  %v683_v4 = vrot.slane %v4149_v41, 3  ;;  %v474_v14 = vsel %vm471_vm2, %v472_v60, %v473_v61  ;;  %v490_v60 = vrot.slane %v462_v51, 2  ;;  %v3223_v51 = vld [vmem:[%s6914_s3 + $0x808] sm:$0xff] }
  0x73   :  { %818 = vmatprep.subr.mxu1 %v3207_v5  ;;  %612 = vmatpush2.msra.mxu0 %v3142_v7  ;;  %v458_v5 = vld [vmem:[#allocation2 + $0x20] sm:$0x3] }
  0x74   :  { %819 = vmatpush2.msra.mxu1 %v3206_v8  ;;  %613 = vmatprep.subr.mxu0 %v3141_v11  ;;  %v3126_v7 = vld [vmem:[%s6914_s3 + $0x500] sm:$0xff]  ;;  %v477_v8 = vsel %vm471_vm2, %v475_v55, %v476_v56  ;;  %v680_v11 = vrot.slane %v4159_v44, 3  ;;  %v3312_v55 = vld [vmem:[%s6914_s3 + $0xad0] sm:$0xff] }
  0x75   :  { %347 = vmatprep.mubr.f32.mxu0 %v193_v13  ;;  %614 = vmatpush2.msra.mxu0 %v3140_v15  ;;  %v457_v13 = vld [vmem:[#allocation2 + $0x50] sm:$0x3]  ;;  %v3191_v15 = vld [vmem:[%s6914_s3 + $0x708] sm:$0xff] }
  0x76   :  { %436 = vmatprep.mubr.f32.mxu1 %v4149_v41  ;;  %615 = vmatprep.subr.mxu0 %v3139_v17  ;;  %v3192_v41 = vld [vmem:[%s6914_s3 + $0x710] sm:$0xff]  ;;  %v3253_v17 = vld [vmem:[%s6914_s3 + $0x8f8] sm:$0xff]  ;;  %v478_v20 = vrot.slane %v457_v13, 2 }
  0x77   :  { %820 = vmatprep.subr.mxu1 %v3205_v18  ;;  %348 = vmatmul.mubr.f32.gmra.mxu0 %v191_v6  ;;  %v665_v18 = vld [vmem:[#allocation2 + $0x20] sm:$0x7]  ;;  %v684_v6 = vsel %vm678_vm3, %v682_v3, %v683_v4 }
  0x78   :  { %437 = vmatmul.mubr.f32.gmra.mxu1 %v4159_v44  ;;  %616 = vmatpush2.msra.mxu0 %v3138_v22  ;;  %v480_v44 = vrot.slane %v458_v5, 2  ;;  %v681_v22 = vsel %vm678_vm3, %v679_v10, %v680_v11  ;;  %v687_v25 = vrot.slane %v665_v18, 3  ;;  %v3308_v10 = vld [vmem:[%s6914_s3 + $0xab0] sm:$0xff]  ;;  %v3239_v18 = vld [vmem:[%s6914_s3 + $0x888] sm:$0xff] }
  0x79   :  { %821 = vmatpush2.msra.mxu1 %v3204_v23  ;;  %617 = vmatprep.subr.mxu0 %v3137_v12  ;;  %v664_v23 = vld [vmem:[#allocation2 + $0x50] sm:$0x7]  ;;  %v3251_v12 = vld [vmem:[%s6914_s3 + $0x8e8] sm:$0xff] }
  0x7a   :  { %822 = vmatprep.subr.mxu1 %v3203_v24  ;;  %618 = vmatpush2.msra.mxu0 %v3136_v27  ;;  %v3317_v24 = vld [vmem:[%s6914_s3 + $0xaf8] sm:$0xff]  ;;  %v481_v27 = vsel %vm471_vm2, %v476_v56, %v480_v44  ;;  %v3306_v44 = vld [vmem:[%s6914_s3 + $0xaa0] sm:$0xff] }
  0x7b   :  { %823 = vmatpush2.msra.mxu1 %v3202_v28  ;;  %353 = vmatprep.mubr.f32.mxu0 %v199_v30  ;;  %v3250_v28 = vld [vmem:[%s6914_s3 + $0x8e0] sm:$0xff]  ;;  %v3316_v30 = vld [vmem:[%s6914_s3 + $0xaf0] sm:$0xff] }
  0x7c   :  { %442 = vmatprep.mubr.f32.mxu1 %v96_v31  ;;  %619 = vmatprep.subr.mxu0 %v3135_v32  ;;  %v479_v31 = vsel %vm471_vm2, %v473_v61, %v478_v20  ;;  %v685_v32 = vrot.slane %v664_v23, 3  ;;  %v669_v61 = vld [vmem:[#allocation2 + $0x40] sm:$0x7]  ;;  %v3303_v23 = vld [vmem:[%s6914_s3 + $0xa88] sm:$0xff] }
  0x7d   :  { %824 = vmatprep.subr.mxu1 %v3201_v33  ;;  %354 = vmatmul.mubr.f32.gmra.mxu0 %v196_v35  ;;  %v3249_v33 = vld [vmem:[%s6914_s3 + $0x8d8] sm:$0xff]  ;;  %v485_v35 = vrot.slane %v460_v26, 2  ;;  %v697_v5 = vrot.slane %v669_v61, 3  ;;  %v3238_v20 = vld [vmem:[%s6914_s3 + $0x880] sm:$0xff]  ;;  %v3348_v61 = vld [vmem:[%s6914_s3 + $0xbf0] sm:$0xff] }
  0x7e   :  { %443 = vmatmul.mubr.f32.gmra.mxu1 %v95_v36  ;;  %620 = vmatpush2.msra.mxu0 %v3134_v38  ;;  %v486_v36 = vrot.slane %v4399_v9, 2  ;;  %v688_v38 = vsel %vm678_vm3, %v683_v4, %v687_v25  ;;  %v3309_v4 = vld [vmem:[%s6914_s3 + $0xab8] sm:$0xff]  ;;  %v3235_v25 = vld [vmem:[%s6914_s3 + $0x868] sm:$0xff] }
  0x7f   :  { %825 = vmatpush2.msra.mxu1 %v3200_v39  ;;  %621 = vmatprep.subr.mxu0 %v3133_v40  ;;  %v3248_v39 = vld [vmem:[%s6914_s3 + $0x8d0] sm:$0xff]  ;;  %v482_v40 = vrot.slane %v459_v29, 2  ;;  %v3301_v26 = vld [vmem:[%s6914_s3 + $0xa78] sm:$0xff] }
  0x80   :  { %826 = vmatprep.subr.mxu1 %v3199_v42  ;;  %622 = vmatpush2.msra.mxu0 %v3132_v45  ;;  %v483_v42 = vrot.slane %v4415_v16, 2  ;;  %v3247_v45 = vld [vmem:[%s6914_s3 + $0x8c8] sm:$0xff]  ;;  %v3233_v29 = vld [vmem:[%s6914_s3 + $0x858] sm:$0xff] }
  0x81   :  { %827 = vmatpush2.msra.mxu1 %v3198_v46  ;;  %359 = vmatprep.mubr.f32.mxu0 %v203_v47  ;;  %v666_v46 = vld [vmem:[#allocation2 + $0x8] sm:$0xf8]  ;;  %v686_v47 = vsel %vm678_vm3, %v680_v11, %v685_v32  ;;  %v3298_v32 = vld [vmem:[%s6914_s3 + $0xa60] sm:$0xff] }
  0x82   :  { %448 = vmatprep.mubr.f32.mxu1 %v4399_v9  ;;  %623 = vmatprep.subr.mxu0 %v3131_v49  ;;  %v692_v49 = vrot.slane %v667_v37, 3  ;;  %v484_v56 = vsel %vm471_vm2, %v482_v40, %v483_v42  ;;  %v689_v57 = vrot.slane %v666_v46, 3  ;;  %v3229_v37 = vld [vmem:[%s6914_s3 + $0x838] sm:$0xff]  ;;  %v3294_v40 = vld [vmem:[%s6914_s3 + $0xa40] sm:$0xff]  ;;  %v3292_v46 = vld [vmem:[%s6914_s3 + $0xa30] sm:$0xff] }
  0x83   :  { %828 = vmatprep.subr.mxu1 %v3197_v50  ;;  %360 = vmatmul.mubr.f32.gmra.mxu0 %v201_v52  ;;  %v693_v50 = vrot.slane %v4399_v9, 3  ;;  %v487_v52 = vsel %vm471_vm2, %v485_v35, %v486_v36  ;;  %v690_v9 = vrot.slane %v4415_v16, 3  ;;  %v3230_v35 = vld [vmem:[%s6914_s3 + $0x840] sm:$0xff] }
  0x84   :  { %449 = vmatmul.mubr.f32.gmra.mxu1 %v4415_v16  ;;  %624 = vmatpush2.msra.mxu0 %v3130_v53  ;;  %v3246_v53 = vld [vmem:[%s6914_s3 + $0x8c0] sm:$0xff]  ;;  %v3244_v16 = vld [vmem:[%s6914_s3 + $0x8b0] sm:$0xff] }
  0x85   :  { %829 = vmatpush2.msra.mxu1 %v3196_v54  ;;  %625 = vmatprep.subr.mxu0 %v3129_v58  ;;  %v461_v54 = vld [vmem:[#allocation2 + $0x10] sm:$0x3]  ;;  %v3245_v58 = vld [vmem:[%s6914_s3 + $0x8b8] sm:$0xff]  ;;  %v694_v62 = vsel %vm678_vm3, %v692_v49, %v693_v50  ;;  %v691_v3 = vsel %vm678_vm3, %v689_v57, %v690_v9 }
  0x86   :  { %830 = vmatprep.subr.mxu1 %v3195_v59  ;;  %626 = vmatpush2.msra.mxu0 %v3128_v63  ;;  %v3311_v59 = vld [vmem:[%s6914_s3 + $0xac8] sm:$0xff]  ;;  %v488_v63 = vrot.slane %v461_v54, 2  ;;  %v3224_v49 = vld [vmem:[%s6914_s3 + $0x810] sm:$0xff] }
  0x87   :  { %831 = vmatpush2.msra.mxu1 %v3194_v0  ;;  %627 = vmatprep.subr.mxu0 %v3127_v1  ;;  %v3310_v0 = vld [vmem:[%s6914_s3 + $0xac0] sm:$0xff]  ;;  %v3243_v1 = vld [vmem:[%s6914_s3 + $0x8a8] sm:$0xff]  ;;  %v3288_v54 = vld [vmem:[%s6914_s3 + $0xa10] sm:$0xff] }
  0x88   :  { %832 = vmatprep.subr.mxu1 %v3193_v2  ;;  %628 = vmatpush2.msra.mxu0 %v3126_v7  ;;  %v668_v2 = vld [vmem:[#allocation2 + $0x10] sm:$0x7]  ;;  %v491_v7 = vsel %vm471_vm2, %v486_v36, %v490_v60  ;;  %v489_v11 = vsel %vm471_vm2, %v483_v42, %v488_v63  ;;  %v3227_v42 = vld [vmem:[%s6914_s3 + $0x828] sm:$0xff]  ;;  %v3282_v60 = vld [vmem:[%s6914_s3 + $0x9e0] sm:$0xff] }
  0x89   :  { %629 = vmatprep.mubr.f32.mxu0 %v477_v8  ;;  %833 = vmatpush2.msra.mxu1 %v3192_v41  ;;  %v3242_v8 = vld [vmem:[%s6914_s3 + $0x8a0] sm:$0xff]  ;;  %v695_v13 = vrot.slane %v668_v2, 3  ;;  %v3241_v41 = vld [vmem:[%s6914_s3 + $0x898] sm:$0xff]  ;;  %v3296_v36 = vld [vmem:[%s6914_s3 + $0xa50] sm:$0xff] }
  0x8a   :  { %630 = vmatmul.mubr.f32.vlgmr.msra.gmra.mxu0 %v474_v14  ;;  %834 = vmatprep.subr.mxu1 %v3191_v15  ;;  %v3307_v14 = vld [vmem:[%s6914_s3 + $0xaa8] sm:$0xff]  ;;  %v698_v15 = vsel %vm678_vm3, %v693_v50, %v697_v5  ;;  %v3290_v50 = vld [vmem:[%s6914_s3 + $0xa20] sm:$0xff]  ;;  %v3284_v57 = vld [vmem:[%s6914_s3 + $0x9f0] sm:$0xff] }
  0x8b   :  { %979 = vmatprep.subr.mxu0 %v3253_v17  ;;  %835 = vmatpush2.msra.mxu1 %v3190_v19  ;;  %v3240_v17 = vld [vmem:[%s6914_s3 + $0x890] sm:$0xff]  ;;  %v696_v19 = vsel %vm678_vm3, %v690_v9, %v695_v13  ;;  %v3286_v9 = vld [vmem:[%s6914_s3 + $0xa00] sm:$0xff]  ;;  %v3345_v2 = vld [vmem:[%s6914_s3 + $0xbd8] sm:$0xff] }
  0x8c   :  { %836 = vmatprep.mubr.f32.mxu1 %v684_v6  ;;  %980 = vmatpush1.msra.mxu0 %v3252_v21  ;;  %v3305_v6 = vld [vmem:[%s6914_s3 + $0xa98] sm:$0xff]  ;;  %v3304_v21 = vld [vmem:[%s6914_s3 + $0xa90] sm:$0xff] }
  0x8d   :  { %837 = vmatmul.mubr.f32.vlgmr.msra.gmra.mxu1 %v681_v22  ;;  %981 = vmatprep.subr.mxu0 %v3251_v12  ;;  %v3237_v22 = vld [vmem:[%s6914_s3 + $0x878] sm:$0xff]  ;;  %v3236_v12 = vld [vmem:[%s6914_s3 + $0x870] sm:$0xff] }
  0x8e   :  { %1185 = vmatprep.subr.mxu1 %v3317_v24  ;;  %635 = vmatprep.mubr.f32.mxu0 %v481_v27  ;;  %v3302_v24 = vld [vmem:[%s6914_s3 + $0xa80] sm:$0xff]  ;;  %v3280_v63 = vld [vmem:[%s6914_s3 + $0x9d0] sm:$0xff]  ;;  %v3277_v5 = vld [vmem:[%s6914_s3 + $0x9b8] sm:$0xff] }
  0x8f   :  { %982 = vmatpush1.msra.mxu0 %v3250_v28  ;;  %1186 = vmatpush1.msra.mxu1 %v3316_v30  ;;  %v3234_v27 = vld [vmem:[%s6914_s3 + $0x860] sm:$0xff]  ;;  %v3300_v28 = vld [vmem:[%s6914_s3 + $0xa70] sm:$0xff]  ;;  %v3299_v30 = vld [vmem:[%s6914_s3 + $0xa68] sm:$0xff] }
  0x90   :  { %636 = vmatmul.mubr.f32.gmra.mxu0 %v479_v31  ;;  %983 = vmatprep.subr.mxu0 %v3249_v33  ;;  %v3232_v31 = vld [vmem:[%s6914_s3 + $0x850] sm:$0xff]  ;;  %v3231_v33 = vld [vmem:[%s6914_s3 + $0x848] sm:$0xff]  ;;  %v3341_v13 = vld [vmem:[%s6914_s3 + $0xbb8] sm:$0xff] }
  0x91   :  { %1187 = vmatprep.subr.mxu1 %v3315_v34  ;;  %842 = vmatprep.mubr.f32.mxu1 %v688_v38  ;;  %v3297_v34 = vld [vmem:[%s6914_s3 + $0xa58] sm:$0xff]  ;;  %v3295_v38 = vld [vmem:[%s6914_s3 + $0xa48] sm:$0xff] }
  0x92   :  { %984 = vmatpush1.msra.mxu0 %v3248_v39  ;;  %1188 = vmatpush1.msra.mxu1 %v3314_v43  ;;  %v3228_v39 = vld [vmem:[%s6914_s3 + $0x830] sm:$0xff]  ;;  %v3293_v43 = vld [vmem:[%s6914_s3 + $0xa38] sm:$0xff] }
  0x93   :  { %985 = vmatprep.subr.mxu0 %v3247_v45  ;;  %843 = vmatmul.mubr.f32.gmra.mxu1 %v686_v47  ;;  %v3226_v45 = vld [vmem:[%s6914_s3 + $0x820] sm:$0xff]  ;;  %v3225_v47 = vld [vmem:[%s6914_s3 + $0x818] sm:$0xff] }
  0x94   :  { %1189 = vmatprep.subr.mxu1 %v3313_v48  ;;  %641 = vmatprep.mubr.f32.mxu0 %v487_v52  ;;  %v3291_v48 = vld [vmem:[%s6914_s3 + $0xa28] sm:$0xff]  ;;  %v3289_v52 = vld [vmem:[%s6914_s3 + $0xa18] sm:$0xff] }
  0x95   :  { %986 = vmatpush1.msra.mxu0 %v3246_v53  ;;  %1190 = vmatpush1.msra.mxu1 %v3312_v55  ;;  %v3222_v53 = vld [vmem:[%s6914_s3 + $0x800] sm:$0xff]  ;;  %v3285_v55 = vld [vmem:[%s6914_s3 + $0x9f8] sm:$0xff] }
  0x96   :  { %642 = vmatmul.mubr.f32.gmra.mxu0 %v484_v56  ;;  %987 = vmatprep.subr.mxu0 %v3245_v58  ;;  %v3287_v56 = vld [vmem:[%s6914_s3 + $0xa08] sm:$0xff] }
  0x97   :  { %1191 = vmatprep.subr.mxu1 %v3311_v59  ;;  %848 = vmatprep.mubr.f32.mxu1 %v694_v62  ;;  %v3283_v58 = vld [vmem:[%s6914_s3 + $0x9e8] sm:$0xff]  ;;  %v3349_v59 = vld [vmem:[%s6914_s3 + $0xbf8] sm:$0xff] }
  0x98   :  { %988 = vmatpush1.msra.mxu0 %v3244_v16  ;;  %1192 = vmatpush1.msra.mxu1 %v3310_v0  ;;  %v3281_v62 = vld [vmem:[%s6914_s3 + $0x9d8] sm:$0xff]  ;;  %v3347_v16 = vld [vmem:[%s6914_s3 + $0xbe8] sm:$0xff]  ;;  %v3346_v0 = vld [vmem:[%s6914_s3 + $0xbe0] sm:$0xff] }
  0x99   :  { %989 = vmatprep.subr.mxu0 %v3243_v1  ;;  %849 = vmatmul.mubr.f32.gmra.mxu1 %v691_v3  ;;  %v3279_v1 = vld [vmem:[%s6914_s3 + $0x9c8] sm:$0xff]  ;;  %v3278_v3 = vld [vmem:[%s6914_s3 + $0x9c0] sm:$0xff] }
  0x9a   :  { %1193 = vmatprep.subr.mxu1 %v3309_v4  ;;  %647 = vmatprep.mubr.f32.mxu0 %v491_v7  ;;  %v3344_v4 = vld [vmem:[%s6914_s3 + $0xbd0] sm:$0xff]  ;;  %v3343_v7 = vld [vmem:[%s6914_s3 + $0xbc8] sm:$0xff] }
  0x9b   :  { %990 = vmatpush1.msra.mxu0 %v3242_v8  ;;  %1194 = vmatpush1.msra.mxu1 %v3308_v10  ;;  %v3276_v8 = vld [vmem:[%s6914_s3 + $0x9b0] sm:$0xff]  ;;  %v3342_v10 = vld [vmem:[%s6914_s3 + $0xbc0] sm:$0xff] }
  0x9c   :  { %648 = vmatmul.mubr.f32.gmra.mxu0 %v489_v11  ;;  %991 = vmatprep.subr.mxu0 %v3241_v41  ;;  %v3275_v11 = vld [vmem:[%s6914_s3 + $0x9a8] sm:$0xff]  ;;  %v3274_v41 = vld [vmem:[%s6914_s3 + $0x9a0] sm:$0xff] }
  0x9d   :  { %1195 = vmatprep.subr.mxu1 %v3307_v14  ;;  %854 = vmatprep.mubr.f32.mxu1 %v698_v15  ;;  %v3340_v14 = vld [vmem:[%s6914_s3 + $0xbb0] sm:$0xff]  ;;  %v3273_v15 = vld [vmem:[%s6914_s3 + $0x998] sm:$0xff] }
  0x9e   :  { %992 = vmatpush1.msra.mxu0 %v3240_v17  ;;  %1196 = vmatpush1.msra.mxu1 %v3306_v44  ;;  %v3339_v17 = vld [vmem:[%s6914_s3 + $0xba8] sm:$0xff]  ;;  %v3272_v44 = vld [vmem:[%s6914_s3 + $0x990] sm:$0xff] }
  0x9f   :  { %993 = vmatprep.subr.mxu0 %v3239_v18  ;;  %855 = vmatmul.mubr.f32.gmra.mxu1 %v696_v19  ;;  %v3338_v18 = vld [vmem:[%s6914_s3 + $0xba0] sm:$0xff]  ;;  %v3271_v19 = vld [vmem:[%s6914_s3 + $0x988] sm:$0xff] }
  0xa0   :  { %1197 = vmatprep.subr.mxu1 %v3305_v6  ;;  %994 = vmatpush1.msra.mxu0 %v3238_v20  ;;  %v3337_v6 = vld [vmem:[%s6914_s3 + $0xb98] sm:$0xff]  ;;  %v3270_v20 = vld [vmem:[%s6914_s3 + $0x980] sm:$0xff] }
  0xa1   :  { %1198 = vmatpush1.msra.mxu1 %v3304_v21  ;;  %995 = vmatprep.subr.mxu0 %v3237_v22  ;;  %v3336_v21 = vld [vmem:[%s6914_s3 + $0xb90] sm:$0xff]  ;;  %v3269_v22 = vld [vmem:[%s6914_s3 + $0x978] sm:$0xff] }
  0xa2   :  { %1199 = vmatprep.subr.mxu1 %v3303_v23  ;;  %996 = vmatpush1.msra.mxu0 %v3236_v12  ;;  %v3335_v23 = vld [vmem:[%s6914_s3 + $0xb88] sm:$0xff]  ;;  %v3268_v12 = vld [vmem:[%s6914_s3 + $0x970] sm:$0xff] }
  0xa3   :  { %1200 = vmatpush1.msra.mxu1 %v3302_v24  ;;  %997 = vmatprep.subr.mxu0 %v3235_v25  ;;  %v3334_v24 = vld [vmem:[%s6914_s3 + $0xb80] sm:$0xff]  ;;  %v3267_v25 = vld [vmem:[%s6914_s3 + $0x968] sm:$0xff] }
  0xa4   :  { %1201 = vmatprep.subr.mxu1 %v3301_v26  ;;  %998 = vmatpush1.msra.mxu0 %v3234_v27  ;;  %v3333_v26 = vld [vmem:[%s6914_s3 + $0xb78] sm:$0xff]  ;;  %v3266_v27 = vld [vmem:[%s6914_s3 + $0x960] sm:$0xff] }
  0xa5   :  { %1202 = vmatpush1.msra.mxu1 %v3300_v28  ;;  %999 = vmatprep.subr.mxu0 %v3233_v29  ;;  %v3332_v28 = vld [vmem:[%s6914_s3 + $0xb70] sm:$0xff]  ;;  %v3265_v29 = vld [vmem:[%s6914_s3 + $0x958] sm:$0xff] }
  0xa6   :  { %1203 = vmatprep.subr.mxu1 %v3299_v30  ;;  %1000 = vmatpush1.msra.mxu0 %v3232_v31  ;;  %v3331_v30 = vld [vmem:[%s6914_s3 + $0xb68] sm:$0xff]  ;;  %v3264_v31 = vld [vmem:[%s6914_s3 + $0x950] sm:$0xff] }
  0xa7   :  { %1204 = vmatpush1.msra.mxu1 %v3298_v32  ;;  %1001 = vmatprep.subr.mxu0 %v3231_v33  ;;  %v3330_v32 = vld [vmem:[%s6914_s3 + $0xb60] sm:$0xff]  ;;  %v3263_v33 = vld [vmem:[%s6914_s3 + $0x948] sm:$0xff] }
  0xa8   :  { %1205 = vmatprep.subr.mxu1 %v3297_v34  ;;  %1002 = vmatpush1.msra.mxu0 %v3230_v35  ;;  %v3329_v34 = vld [vmem:[%s6914_s3 + $0xb58] sm:$0xff]  ;;  %v3262_v35 = vld [vmem:[%s6914_s3 + $0x940] sm:$0xff] }
  0xa9   :  { %1206 = vmatpush1.msra.mxu1 %v3296_v36  ;;  %1003 = vmatprep.subr.mxu0 %v3229_v37  ;;  %v3328_v36 = vld [vmem:[%s6914_s3 + $0xb50] sm:$0xff]  ;;  %v3261_v37 = vld [vmem:[%s6914_s3 + $0x938] sm:$0xff] }
  0xaa   :  { %1207 = vmatprep.subr.mxu1 %v3295_v38  ;;  %1004 = vmatpush1.msra.mxu0 %v3228_v39  ;;  %v3327_v38 = vld [vmem:[%s6914_s3 + $0xb48] sm:$0xff]  ;;  %v870_v39 = vld [vmem:[#allocation2] sm:$0xf0] }
  0xab   :  { %1208 = vmatpush1.msra.mxu1 %v3294_v40  ;;  %1005 = vmatprep.subr.mxu0 %v3227_v42  ;;  %v3260_v40 = vld [vmem:[%s6914_s3 + $0x930] sm:$0xff]  ;;  %v3326_v42 = vld [vmem:[%s6914_s3 + $0xb40] sm:$0xff] }
  0xac   :  { %1209 = vmatprep.subr.mxu1 %v3293_v43  ;;  %1006 = vmatpush1.msra.mxu0 %v3226_v45  ;;  %v869_v43 = vld [vmem:[#allocation2 + $0x30] sm:$0xf0]  ;;  %v3259_v45 = vld [vmem:[%s6914_s3 + $0x928] sm:$0xff] }
  0xad   :  { %1210 = vmatpush1.msra.mxu1 %v3292_v46  ;;  %1007 = vmatprep.subr.mxu0 %v3225_v47  ;;  %v3325_v46 = vld [vmem:[%s6914_s3 + $0xb38] sm:$0xff] }
  0xae   :  { %1211 = vmatprep.subr.mxu1 %v3291_v48  ;;  %1008 = vmatpush1.msra.mxu0 %v3224_v49  ;;  %v5052_v47 = vld [vmem:[#allocation2 + $0x18] sm:$0xff]  ;;  %v3258_v49 = vld [vmem:[%s6914_s3 + $0x920] sm:$0xff] }
  0xaf   :  { %1212 = vmatpush1.msra.mxu1 %v3290_v50  ;;  %1009 = vmatprep.subr.mxu0 %v3223_v51  ;;  %v890_v48 = vrot.slane %v5052_v47, 4  ;;  %v3324_v50 = vld [vmem:[%s6914_s3 + $0xb30] sm:$0xff]  ;;  %v889_v51 = vrot.slane %v870_v39, 4 }
  0xb0   :  { %1213 = vmatprep.subr.mxu1 %v3289_v52  ;;  %1010 = vmatpush1.msra.mxu0 %v3222_v53  ;;  %v1077_v52 = vld [vmem:[#allocation2] sm:$0xe0]  ;;  %v3257_v53 = vld [vmem:[%s6914_s3 + $0x918] sm:$0xff]  ;;  %v3376_v39 = vld [vmem:[%s6914_s3 + $0xcd0] sm:$0xff] }
  0xb1   :  { %1214 = vmatpush1.msra.mxu1 %v3288_v54  ;;  %1011 = vmatprep.subr.mxu0 %v3285_v55  ;;  %v3323_v54 = vld [vmem:[%s6914_s3 + $0xb28] sm:$0xff]  ;;  %v886_v55 = vrot.slane %v869_v43, 4 }
  0xb2   :  { %1215 = vmatprep.subr.mxu1 %v3287_v56  ;;  %1012 = vmatpush2.msra.mxu0 %v3284_v57  ;;  %v5067_v56 = vld [vmem:[#allocation2 + $0x58] sm:$0xff] }
  0xb3   :  { %1216 = vmatpush1.msra.mxu1 %v3286_v9  ;;  %1013 = vmatprep.subr.mxu0 %v3283_v58  ;;  %v887_v57 = vrot.slane %v5067_v56, 4  ;;  %v1076_v9 = vld [vmem:[#allocation2 + $0x30] sm:$0xe0] }
  0xb4   :  { %1217 = vmatprep.subr.mxu1 %v3349_v59  ;;  %1014 = vmatpush2.msra.mxu0 %v3282_v60  ;;  %v3256_v58 = vld [vmem:[%s6914_s3 + $0x910] sm:$0xff]  ;;  %v3322_v59 = vld [vmem:[%s6914_s3 + $0xb20] sm:$0xff] }
  0xb5   :  { %1218 = vmatpush2.msra.mxu1 %v3348_v61  ;;  %1015 = vmatprep.subr.mxu0 %v3281_v62  ;;  %v872_v60 = vld [vmem:[#allocation2 + $0x20] sm:$0xf]  ;;  %v3255_v61 = vld [vmem:[%s6914_s3 + $0x908] sm:$0xff]  ;;  %v3321_v62 = vld [vmem:[%s6914_s3 + $0xb18] sm:$0xff] }
  0xb6   :  { %1219 = vmatprep.subr.mxu1 %v3347_v16  ;;  %1016 = vmatpush2.msra.mxu0 %v3280_v63  ;;  %v1095_v16 = vrot.slane %v1077_v52, 5  ;;  %v1096_v63 = vrot.slane %v5052_v47, 5 }
  0xb7   :  { %1220 = vmatpush2.msra.mxu1 %v3346_v0  ;;  %1017 = vmatprep.subr.mxu0 %v3279_v1  ;;  %v1079_v0 = vld [vmem:[#allocation2 + $0x20] sm:$0x1f] }
  0xb8   :  { %1221 = vmatprep.subr.mxu1 %v3345_v2  ;;  %1018 = vmatpush2.msra.mxu0 %v3278_v3  ;;  %v3254_v1 = vld [vmem:[%s6914_s3 + $0x900] sm:$0xff]  ;;  %v891_v2 = vsel %vm885_vm4, %v889_v51, %v890_v48  ;;  %v1092_v3 = vrot.slane %v1076_v9, 5 }
  0xb9   :  { %1222 = vmatpush2.msra.mxu1 %v3344_v4  ;;  %1019 = vmatprep.subr.mxu0 %v3277_v5  ;;  %v1093_v4 = vrot.slane %v5067_v56, 5  ;;  %v871_v5 = vld [vmem:[#allocation2 + $0x50] sm:$0xf]  ;;  %v3374_v51 = vld [vmem:[%s6914_s3 + $0xcc0] sm:$0xff] }
  0xba   :  { %1223 = vmatprep.subr.mxu1 %v3343_v7  ;;  %1020 = vmatpush2.msra.mxu0 %v3276_v8  ;;  %v3320_v7 = vld [vmem:[%s6914_s3 + $0xb10] sm:$0xff]  ;;  %v888_v8 = vsel %vm885_vm4, %v886_v55, %v887_v57 }
  0xbb   :  { %1224 = vmatpush2.msra.mxu1 %v3342_v10  ;;  %1021 = vmatprep.subr.mxu0 %v3275_v11  ;;  %v894_v10 = vrot.slane %v872_v60, 4  ;;  %v1078_v11 = vld [vmem:[#allocation2 + $0x50] sm:$0x1f] }
  0xbc   :  { %1225 = vmatprep.subr.mxu1 %v3341_v13  ;;  %1022 = vmatpush2.msra.mxu0 %v3274_v41  ;;  %v3319_v13 = vld [vmem:[%s6914_s3 + $0xb08] sm:$0xff]  ;;  %v3381_v41 = vld [vmem:[%s6914_s3 + $0xcf8] sm:$0xff] }
  0xbd   :  { %1226 = vmatpush2.msra.mxu1 %v3340_v14  ;;  %1023 = vmatprep.subr.mxu0 %v3273_v15  ;;  %v1100_v14 = vrot.slane %v1079_v0, 5  ;;  %v874_v15 = vld [vmem:[#allocation2 + $0x38] sm:$0xf0]  ;;  %v3370_v0 = vld [vmem:[%s6914_s3 + $0xca0] sm:$0xff] }
  0xbe   :  { %1227 = vmatprep.subr.mxu1 %v3339_v17  ;;  %1024 = vmatpush2.msra.mxu0 %v3272_v44  ;;  %v3318_v17 = vld [vmem:[%s6914_s3 + $0xb00] sm:$0xff]  ;;  %v1097_v44 = vsel %vm54_vm0, %v1095_v16, %v1096_v63 }
  0xbf   :  { %1228 = vmatpush2.msra.mxu1 %v3338_v18  ;;  %1025 = vmatprep.subr.mxu0 %v3271_v19  ;;  %v892_v18 = vrot.slane %v871_v5, 4  ;;  %v1081_v19 = vld [vmem:[#allocation2 + $0x38] sm:$0xe0] }
  0xc0   :  { %1229 = vmatprep.subr.mxu1 %v3337_v6  ;;  %1026 = vmatpush2.msra.mxu0 %v3270_v20  ;;  %v3380_v6 = vld [vmem:[%s6914_s3 + $0xcf0] sm:$0xff]  ;;  %v1094_v20 = vsel %vm54_vm0, %v1092_v3, %v1093_v4  ;;  %v3369_v3 = vld [vmem:[%s6914_s3 + $0xc98] sm:$0xff] }
  0xc1   :  { %1230 = vmatpush2.msra.mxu1 %v3336_v21  ;;  %1027 = vmatprep.subr.mxu0 %v3269_v22  ;;  %v1098_v21 = vrot.slane %v1078_v11, 5  ;;  %v873_v22 = vld [vmem:[#allocation2 + $0x8] sm:$0xf0]  ;;  %v3365_v11 = vld [vmem:[%s6914_s3 + $0xc78] sm:$0xff] }
  0xc2   :  { %1231 = vmatprep.subr.mxu1 %v3335_v23  ;;  %1028 = vmatpush2.msra.mxu0 %v3268_v12  ;;  %v3379_v23 = vld [vmem:[%s6914_s3 + $0xce8] sm:$0xff]  ;;  %v895_v12 = vsel %vm885_vm4, %v890_v48, %v894_v10  ;;  %v3366_v10 = vld [vmem:[%s6914_s3 + $0xc80] sm:$0xff] }
  0xc3   :  { %1232 = vmatpush2.msra.mxu1 %v3334_v24  ;;  %1029 = vmatprep.subr.mxu0 %v3267_v25  ;;  %v899_v24 = vrot.slane %v874_v15, 4  ;;  %v5116_v25 = vld [vmem:[#allocation2 + $0x48] sm:$0xff]  ;;  %v3361_v15 = vld [vmem:[%s6914_s3 + $0xc58] sm:$0xff] }
  0xc4   :  { %1233 = vmatprep.subr.mxu1 %v3333_v26  ;;  %1030 = vmatpush2.msra.mxu0 %v3266_v27  ;;  %v900_v26 = vrot.slane %v5116_v25, 4  ;;  %v1080_v27 = vld [vmem:[#allocation2 + $0x8] sm:$0xe0] }
  0xc5   :  { %1234 = vmatpush2.msra.mxu1 %v3332_v28  ;;  %1031 = vmatprep.subr.mxu0 %v3265_v29  ;;  %v3378_v28 = vld [vmem:[%s6914_s3 + $0xce0] sm:$0xff]  ;;  %v1101_v29 = vsel %vm54_vm0, %v1096_v63, %v1100_v14  ;;  %v1303_v63 = vrot.slane %v5052_v47, 6 }
  0xc6   :  { %1235 = vmatprep.subr.mxu1 %v3331_v30  ;;  %1032 = vmatpush2.msra.mxu0 %v3264_v31  ;;  %v1105_v30 = vrot.slane %v1081_v19, 5  ;;  %v1106_v31 = vrot.slane %v5116_v25, 5  ;;  %v901_v48 = vsel %vm885_vm4, %v899_v24, %v900_v26  ;;  %v3362_v14 = vld [vmem:[%s6914_s3 + $0xc60] sm:$0xff]  ;;  %v3357_v19 = vld [vmem:[%s6914_s3 + $0xc38] sm:$0xff] }
  0xc7   :  { %1236 = vmatpush2.msra.mxu1 %v3330_v32  ;;  %1033 = vmatprep.subr.mxu0 %v3263_v33  ;;  %v876_v32 = vld [vmem:[#allocation2 + $0x40] sm:$0xf]  ;;  %v893_v33 = vsel %vm885_vm4, %v887_v57, %v892_v18  ;;  %v3373_v57 = vld [vmem:[%s6914_s3 + $0xcb8] sm:$0xff] }
  0xc8   :  { %1237 = vmatprep.subr.mxu1 %v3329_v34  ;;  %1034 = vmatpush2.msra.mxu0 %v3262_v35  ;;  %v3377_v34 = vld [vmem:[%s6914_s3 + $0xcd8] sm:$0xff]  ;;  %v896_v35 = vrot.slane %v873_v22, 4  ;;  %v1107_v52 = vsel %vm54_vm0, %v1105_v30, %v1106_v31  ;;  %v3358_v18 = vld [vmem:[%s6914_s3 + $0xc40] sm:$0xff] }
  0xc9   :  { %1238 = vmatpush2.msra.mxu1 %v3328_v36  ;;  %1035 = vmatprep.subr.mxu0 %v3261_v37  ;;  %v5130_v36 = vld [vmem:[#allocation2 + $0x28] sm:$0xff]  ;;  %v3353_v22 = vld [vmem:[%s6914_s3 + $0xc18] sm:$0xff]  ;;  %v3350_v24 = vld [vmem:[%s6914_s3 + $0xc00] sm:$0xff] }
  0xca   :  { %1239 = vmatprep.subr.mxu1 %v3327_v38  ;;  %1036 = vmatpush2.msra.mxu0 %v3260_v40  ;;  %v897_v37 = vrot.slane %v5130_v36, 4  ;;  %v1083_v38 = vld [vmem:[#allocation2 + $0x40] sm:$0x1f]  ;;  %v1099_v40 = vsel %vm54_vm0, %v1093_v4, %v1098_v21  ;;  %v1103_v43 = vrot.slane %v5130_v36, 5  ;;  %v3368_v4 = vld [vmem:[%s6914_s3 + $0xc90] sm:$0xff]  ;;  %v3409_v30 = vld [vmem:[%s6914_s3 + $0xdd8] sm:$0xff] }
  0xcb   :  { %1240 = vmatpush2.msra.mxu1 %v3326_v42  ;;  %1037 = vmatprep.subr.mxu0 %v3259_v45  ;;  %v1102_v42 = vrot.slane %v1080_v27, 5  ;;  %v875_v45 = vld [vmem:[#allocation2 + $0x10] sm:$0xf]  ;;  %v3354_v21 = vld [vmem:[%s6914_s3 + $0xc20] sm:$0xff] }
  0xcc   :  { %1241 = vmatprep.subr.mxu1 %v3325_v46  ;;  %1038 = vmatpush2.msra.mxu0 %v3258_v49  ;;  %v3375_v46 = vld [vmem:[%s6914_s3 + $0xcc8] sm:$0xff]  ;;  %v904_v49 = vrot.slane %v876_v32, 4  ;;  %v898_v55 = vsel %vm885_vm4, %v896_v35, %v897_v37  ;;  %v902_v9 = vrot.slane %v875_v45, 4  ;;  %v3412_v27 = vld [vmem:[%s6914_s3 + $0xdf0] sm:$0xff]  ;;  %v3397_v45 = vld [vmem:[%s6914_s3 + $0xd78] sm:$0xff] }
  0xcd   :  { %1242 = vmatpush2.msra.mxu1 %v3324_v50  ;;  %1039 = vmatprep.subr.mxu0 %v3257_v53  ;;  %v1082_v50 = vld [vmem:[#allocation2 + $0x10] sm:$0x1f]  ;;  %v1110_v53 = vrot.slane %v1083_v38, 5  ;;  %v3407_v32 = vld [vmem:[%s6914_s3 + $0xdc8] sm:$0xff]  ;;  %v3402_v38 = vld [vmem:[%s6914_s3 + $0xda0] sm:$0xff] }
  0xce   :  { %1243 = vmatprep.subr.mxu1 %v3323_v54  ;;  %1040 = vmatpush2.msra.mxu0 %v3256_v58  ;;  %v1283_v54 = vld [vmem:[#allocation2] sm:$0xc0]  ;;  %v3372_v58 = vld [vmem:[%s6914_s3 + $0xcb0] sm:$0xff]  ;;  %v1108_v60 = vrot.slane %v1082_v50, 5  ;;  %v3393_v50 = vld [vmem:[%s6914_s3 + $0xd58] sm:$0xff] }
  0xcf   :  { %1244 = vmatpush2.msra.mxu1 %v3322_v59  ;;  %1041 = vmatprep.subr.mxu0 %v3255_v61  ;;  %v1104_v59 = vsel %vm54_vm0, %v1102_v42, %v1103_v43  ;;  %v3371_v61 = vld [vmem:[%s6914_s3 + $0xca8] sm:$0xff]  ;;  %v1302_v16 = vrot.slane %v1283_v54, 6  ;;  %v3404_v35 = vld [vmem:[%s6914_s3 + $0xdb0] sm:$0xff]  ;;  %v3389_v54 = vld [vmem:[%s6914_s3 + $0xd38] sm:$0xff] }
  0xd0   :  { %1245 = vmatprep.subr.mxu1 %v3321_v62  ;;  %1042 = vmatpush2.msra.mxu0 %v3254_v1  ;;  %v905_v62 = vsel %vm885_vm4, %v900_v26, %v904_v49  ;;  %v1111_v1 = vsel %vm54_vm0, %v1106_v31, %v1110_v53  ;;  %v1109_v5 = vsel %vm54_vm0, %v1103_v43, %v1108_v60  ;;  %v3413_v26 = vld [vmem:[%s6914_s3 + $0xdf8] sm:$0xff]  ;;  %v3408_v31 = vld [vmem:[%s6914_s3 + $0xdd0] sm:$0xff]  ;;  %v3399_v42 = vld [vmem:[%s6914_s3 + $0xd88] sm:$0xff] }
  0xd1   :  { %1043 = vmatprep.mubr.f32.mxu0 %v891_v2  ;;  %1246 = vmatpush2.msra.mxu1 %v3320_v7  ;;  %v903_v2 = vsel %vm885_vm4, %v897_v37, %v902_v9  ;;  %v3367_v7 = vld [vmem:[%s6914_s3 + $0xc88] sm:$0xff]  ;;  %v3398_v43 = vld [vmem:[%s6914_s3 + $0xd80] sm:$0xff]  ;;  %v3385_v60 = vld [vmem:[%s6914_s3 + $0xd18] sm:$0xff] }
  0xd2   :  { %1044 = vmatmul.mubr.f32.vlgmr.msra.gmra.mxu0 %v888_v8  ;;  %1247 = vmatprep.subr.mxu1 %v3319_v13  ;;  %v1304_v8 = vsel %vm1298_vm5, %v1302_v16, %v1303_v63  ;;  %v3364_v13 = vld [vmem:[%s6914_s3 + $0xc70] sm:$0xff]  ;;  %v3403_v37 = vld [vmem:[%s6914_s3 + $0xda8] sm:$0xff]  ;;  %v3394_v49 = vld [vmem:[%s6914_s3 + $0xd60] sm:$0xff] }
  0xd3   :  { %1392 = vmatprep.subr.mxu0 %v3381_v41  ;;  %1248 = vmatpush2.msra.mxu1 %v3318_v17  ;;  %v3363_v41 = vld [vmem:[%s6914_s3 + $0xc68] sm:$0xff]  ;;  %v3360_v17 = vld [vmem:[%s6914_s3 + $0xc50] sm:$0xff]  ;;  %v3390_v53 = vld [vmem:[%s6914_s3 + $0xd40] sm:$0xff] }
  0xd4   :  { %1249 = vmatprep.mubr.f32.mxu1 %v1097_v44  ;;  %1393 = vmatpush1.msra.mxu0 %v3380_v6  ;;  %v3359_v44 = vld [vmem:[%s6914_s3 + $0xc48] sm:$0xff]  ;;  %v3356_v6 = vld [vmem:[%s6914_s3 + $0xc30] sm:$0xff] }
  0xd5   :  { %1250 = vmatmul.mubr.f32.vlgmr.msra.gmra.mxu1 %v1094_v20  ;;  %1394 = vmatprep.subr.mxu0 %v3379_v23  ;;  %v3355_v20 = vld [vmem:[%s6914_s3 + $0xc28] sm:$0xff]  ;;  %v3352_v23 = vld [vmem:[%s6914_s3 + $0xc10] sm:$0xff] }
  0xd6   :  { %1049 = vmatprep.mubr.f32.mxu0 %v895_v12  ;;  %1395 = vmatpush1.msra.mxu0 %v3378_v28  ;;  %v3351_v12 = vld [vmem:[%s6914_s3 + $0xc08] sm:$0xff]  ;;  %v3384_v16 = vld [vmem:[%s6914_s3 + $0xd10] sm:$0xff] }
  0xd7   :  { %1255 = vmatprep.mubr.f32.mxu1 %v1101_v29  ;;  %1050 = vmatmul.mubr.f32.gmra.mxu0 %v893_v33  ;;  %v3411_v28 = vld [vmem:[%s6914_s3 + $0xde8] sm:$0xff]  ;;  %v3410_v29 = vld [vmem:[%s6914_s3 + $0xde0] sm:$0xff] }
  0xd8   :  { %1396 = vmatprep.subr.mxu0 %v3377_v34  ;;  %1055 = vmatprep.mubr.f32.mxu0 %v901_v48  ;;  %v3406_v33 = vld [vmem:[%s6914_s3 + $0xdc0] sm:$0xff]  ;;  %v3405_v34 = vld [vmem:[%s6914_s3 + $0xdb8] sm:$0xff]  ;;  %v3395_v48 = vld [vmem:[%s6914_s3 + $0xd68] sm:$0xff] }
  0xd9   :  { %1397 = vmatpush1.msra.mxu0 %v3376_v39  ;;  %1256 = vmatmul.mubr.f32.gmra.mxu1 %v1099_v40  ;;  %v3401_v39 = vld [vmem:[%s6914_s3 + $0xd98] sm:$0xff]  ;;  %v3400_v40 = vld [vmem:[%s6914_s3 + $0xd90] sm:$0xff]  ;;  %v3387_v9 = vld [vmem:[%s6914_s3 + $0xd28] sm:$0xff] }
  0xda   :  { %1398 = vmatprep.subr.mxu0 %v3375_v46  ;;  %1261 = vmatprep.mubr.f32.mxu1 %v1107_v52  ;;  %v3396_v46 = vld [vmem:[%s6914_s3 + $0xd70] sm:$0xff]  ;;  %v3391_v52 = vld [vmem:[%s6914_s3 + $0xd48] sm:$0xff] }
  0xdb   :  { %1399 = vmatpush1.msra.mxu0 %v3374_v51  ;;  %v3392_v51 = vld [vmem:[%s6914_s3 + $0xd50] sm:$0xff] }
  0xdc   :  { %1056 = vmatmul.mubr.f32.gmra.mxu0 %v898_v55  ;;  %1400 = vmatprep.subr.mxu0 %v3373_v57  ;;  %v3388_v55 = vld [vmem:[%s6914_s3 + $0xd30] sm:$0xff] }
  0xdd   :  { %1401 = vmatpush1.msra.mxu0 %v3372_v58  ;;  %1262 = vmatmul.mubr.f32.gmra.mxu1 %v1104_v59  ;;  %v1282_v57 = vld [vmem:[#allocation2 + $0x30] sm:$0xc0]  ;;  %v1285_v58 = vld [vmem:[#allocation2 + $0x20] sm:$0x3f] }
  0xde   :  { %1402 = vmatprep.subr.mxu0 %v3371_v61  ;;  %1061 = vmatprep.mubr.f32.mxu0 %v905_v62  ;;  %v3386_v59 = vld [vmem:[%s6914_s3 + $0xd20] sm:$0xff]  ;;  %v1299_v61 = vrot.slane %v1282_v57, 6  ;;  %v1300_v62 = vrot.slane %v5067_v56, 6  ;;  %v1610_v57 = vld [vmem:[%s6916_s5 + $0x68] sm:$0xff] }
  0xdf   :  { %1403 = vmatpush1.msra.mxu0 %v3370_v0  ;;  %1267 = vmatprep.mubr.f32.mxu1 %v1111_v1  ;;  %v1307_v0 = vrot.slane %v1285_v58, 6  ;;  %v1284_v1 = vld [vmem:[#allocation2 + $0x50] sm:$0x3f]  ;;  %v1609_v58 = vld [vmem:[%s6916_s5 + $0x60] sm:$0xff] }
  0xe0   :  { %1062 = vmatmul.mubr.f32.gmra.mxu0 %v903_v2  ;;  %1404 = vmatprep.subr.mxu0 %v3369_v3  ;;  %v3383_v2 = vld [vmem:[%s6914_s3 + $0xd08] sm:$0xff]  ;;  %v1287_v3 = vld [vmem:[#allocation2 + $0x38] sm:$0xc0]  ;;  %v1301_v56 = vsel %vm1298_vm5, %v1299_v61, %v1300_v62 }
  0xe1   :  { %1405 = vmatpush1.msra.mxu0 %v3368_v4  ;;  %1268 = vmatmul.mubr.f32.gmra.mxu1 %v1109_v5  ;;  %v3382_v4 = vld [vmem:[%s6914_s3 + $0xd00] sm:$0xff]  ;;  %v1305_v5 = vrot.slane %v1284_v1, 6  ;;  %v3427_v61 = vld [vmem:[%s6916_s5 + $0x268] sm:$0xff]  ;;  %v3425_v1 = vld [vmem:[%s6916_s5 + $0x258] sm:$0xff] }
  0xe2   :  { %1406 = vmatprep.subr.mxu0 %v3367_v7  ;;  %1456 = vmatprep.mubr.f32.mxu0 %v1304_v8  ;;  %v1308_v7 = vsel %vm1298_vm5, %v1303_v63, %v1307_v0  ;;  %v1312_v8 = vrot.slane %v1287_v3, 6  ;;  %v1606_v0 = vld [vmem:[%s6916_s5 + $0x48] sm:$0xff]  ;;  %v3424_v3 = vld [vmem:[%s6916_s5 + $0x250] sm:$0xff] }
  0xe3   :  { %1407 = vmatpush1.msra.mxu0 %v3366_v10  ;;  %v1313_v10 = vrot.slane %v5116_v25, 6 }
  0xe4   :  { %1408 = vmatprep.subr.mxu0 %v3365_v11  ;;  %v1286_v11 = vld [vmem:[#allocation2 + $0x8] sm:$0xc0] }
  0xe5   :  { %1409 = vmatpush1.msra.mxu0 %v3364_v13  ;;  %v1289_v13 = vld [vmem:[#allocation2 + $0x40] sm:$0x3f] }
  0xe6   :  { %1410 = vmatprep.subr.mxu0 %v3363_v41  ;;  %v1306_v41 = vsel %vm1298_vm5, %v1300_v62, %v1305_v5  ;;  %v1607_v62 = vld [vmem:[%s6916_s5 + $0x50] sm:$0xff] }
  0xe7   :  { %1411 = vmatpush1.msra.mxu0 %v3362_v14  ;;  %v1309_v14 = vrot.slane %v1286_v11, 6  ;;  %v1603_v5 = vld [vmem:[%s6916_s5 + $0x30] sm:$0xff]  ;;  %v1601_v11 = vld [vmem:[%s6916_s5 + $0x20] sm:$0xff] }
  0xe8   :  { %1412 = vmatprep.subr.mxu0 %v3361_v15  ;;  %v1310_v15 = vrot.slane %v5130_v36, 6  ;;  %v1628_v36 = vld [vmem:[%s6916_s5 + $0xf8] sm:$0xff] }
  0xe9   :  { %1413 = vmatpush1.msra.mxu0 %v3360_v17  ;;  %v1314_v17 = vsel %vm1298_vm5, %v1312_v8, %v1313_v10  ;;  %v1602_v8 = vld [vmem:[%s6916_s5 + $0x28] sm:$0xff] }
  0xea   :  { %1414 = vmatprep.subr.mxu0 %v3359_v44  ;;  %v1317_v44 = vrot.slane %v1289_v13, 6  ;;  %v1311_v47 = vsel %vm1298_vm5, %v1309_v14, %v1310_v15  ;;  %v3420_v13 = vld [vmem:[%s6916_s5 + $0x230] sm:$0xff]  ;;  %v3419_v14 = vld [vmem:[%s6916_s5 + $0x228] sm:$0xff] }
  0xeb   :  { %1415 = vmatpush1.msra.mxu0 %v3358_v18  ;;  %v1288_v18 = vld [vmem:[#allocation2 + $0x10] sm:$0x3f] }
  0xec   :  { %1416 = vmatprep.subr.mxu0 %v3357_v19  ;;  %v1315_v63 = vrot.slane %v1288_v18, 6  ;;  %v1318_v25 = vsel %vm1298_vm5, %v1313_v10, %v1317_v44  ;;  %v3421_v10 = vld [vmem:[%s6916_s5 + $0x238] sm:$0xff]  ;;  %v1598_v44 = vld [vmem:[%s6916_s5 + $0x8] sm:$0xff] }
  0xed   :  { %1417 = vmatpush1.msra.mxu0 %v3356_v6  ;;  %v1627_v6 = vld [vmem:[%s6916_s5 + $0xf0] sm:$0xff]  ;;  %v3417_v18 = vld [vmem:[%s6916_s5 + $0x218] sm:$0xff] }
  0xee   :  { %1418 = vmatprep.subr.mxu0 %v3355_v20  ;;  %v1316_v19 = vsel %vm1298_vm5, %v1310_v15, %v1315_v63  ;;  %v1626_v20 = vld [vmem:[%s6916_s5 + $0xe8] sm:$0xff]  ;;  %v1599_v15 = vld [vmem:[%s6916_s5 + $0x10] sm:$0xff] }
  0xef   :  { %1419 = vmatpush1.msra.mxu0 %v3354_v21  ;;  %v1625_v21 = vld [vmem:[%s6916_s5 + $0xe0] sm:$0xff]  ;;  %v3416_v63 = vld [vmem:[%s6916_s5 + $0x210] sm:$0xff] }
  0xf0   :  { %1420 = vmatprep.subr.mxu0 %v3353_v22  ;;  %v1624_v22 = vld [vmem:[%s6916_s5 + $0xd8] sm:$0xff] }
  0xf1   :  { %1421 = vmatpush1.msra.mxu0 %v3352_v23  ;;  %v3445_v23 = vld [vmem:[%s6916_s5 + $0x2f8] sm:$0xff] }
  0xf2   :  { %1422 = vmatprep.subr.mxu0 %v3351_v12  ;;  %v1623_v12 = vld [vmem:[%s6916_s5 + $0xd0] sm:$0xff]  ;;  %1774 = vmatprep.subr.mxu1 %v3445_v23 }
  0xf3   :  { %1423 = vmatpush1.msra.mxu0 %v3350_v24  ;;  %v3444_v24 = vld [vmem:[%s6916_s5 + $0x2f0] sm:$0xff] }
  0xf4   :  { %1424 = vmatprep.subr.mxu0 %v3413_v26  ;;  %v1622_v26 = vld [vmem:[%s6916_s5 + $0xc8] sm:$0xff]  ;;  %1775 = vmatpush1.msra.mxu1 %v3444_v24  ;;  %v3476_v23 = vld [vmem:[%s6916_s5 + $0x3f0] sm:$0xff] }
  0xf5   :  { %1425 = vmatpush2.msra.mxu0 %v3412_v27  ;;  %v3443_v27 = vld [vmem:[%s6916_s5 + $0x2e8] sm:$0xff] }
  0xf6   :  { %1426 = vmatprep.subr.mxu0 %v3411_v28  ;;  %v3442_v28 = vld [vmem:[%s6916_s5 + $0x2e0] sm:$0xff]  ;;  %1776 = vmatprep.subr.mxu1 %v3443_v27  ;;  %v3475_v24 = vld [vmem:[%s6916_s5 + $0x3e8] sm:$0xff] }
  0xf7   :  { %1427 = vmatpush2.msra.mxu0 %v3410_v29  ;;  %v1621_v29 = vld [vmem:[%s6916_s5 + $0xc0] sm:$0xff]  ;;  %1777 = vmatpush1.msra.mxu1 %v3442_v28  ;;  %v1654_v27 = vld [vmem:[%s6916_s5 + $0x1c8] sm:$0xff] }
  0xf8   :  { %1428 = vmatprep.subr.mxu0 %v3409_v30  ;;  %v3441_v30 = vld [vmem:[%s6916_s5 + $0x2d8] sm:$0xff]  ;;  %v1653_v28 = vld [vmem:[%s6916_s5 + $0x1c0] sm:$0xff] }
  0xf9   :  { %1429 = vmatpush2.msra.mxu0 %v3408_v31  ;;  %v1620_v31 = vld [vmem:[%s6916_s5 + $0xb8] sm:$0xff]  ;;  %1778 = vmatprep.subr.mxu1 %v3441_v30  ;;  %v1651_v30 = vld [vmem:[%s6916_s5 + $0x1b0] sm:$0xff] }
  0xfa   :  { %1430 = vmatprep.subr.mxu0 %v3407_v32  ;;  %v3440_v32 = vld [vmem:[%s6916_s5 + $0x2d0] sm:$0xff] }
  0xfb   :  { %1431 = vmatpush2.msra.mxu0 %v3406_v33  ;;  %v3439_v33 = vld [vmem:[%s6916_s5 + $0x2c8] sm:$0xff]  ;;  %1779 = vmatpush1.msra.mxu1 %v3440_v32  ;;  %v3474_v32 = vld [vmem:[%s6916_s5 + $0x3e0] sm:$0xff] }
  0xfc   :  { %1432 = vmatprep.subr.mxu0 %v3405_v34  ;;  %v1619_v34 = vld [vmem:[%s6916_s5 + $0xb0] sm:$0xff]  ;;  %1780 = vmatprep.subr.mxu1 %v3439_v33  ;;  %v3473_v33 = vld [vmem:[%s6916_s5 + $0x3d8] sm:$0xff] }
  0xfd   :  { %1433 = vmatpush2.msra.mxu0 %v3404_v35  ;;  %v3438_v35 = vld [vmem:[%s6916_s5 + $0x2c0] sm:$0xff] }
  0xfe   :  { %1434 = vmatprep.subr.mxu0 %v3403_v37  ;;  %v1618_v37 = vld [vmem:[%s6916_s5 + $0xa8] sm:$0xff]  ;;  %1781 = vmatpush1.msra.mxu1 %v3438_v35 }
  0xff   :  { %1435 = vmatpush2.msra.mxu0 %v3402_v38  ;;  %v3437_v38 = vld [vmem:[%s6916_s5 + $0x2b8] sm:$0xff]  ;;  %v3471_v35 = vld [vmem:[%s6916_s5 + $0x3c8] sm:$0xff] }
 0x100   :  { %1436 = vmatprep.subr.mxu0 %v3401_v39  ;;  %v1617_v39 = vld [vmem:[%s6916_s5 + $0xa0] sm:$0xff]  ;;  %1782 = vmatprep.subr.mxu1 %v3437_v38 }
 0x101   :  { %1437 = vmatpush2.msra.mxu0 %v3400_v40  ;;  %v3436_v40 = vld [vmem:[%s6916_s5 + $0x2b0] sm:$0xff]  ;;  %v1649_v38 = vld [vmem:[%s6916_s5 + $0x1a0] sm:$0xff] }
 0x102   :  { %1438 = vmatprep.subr.mxu0 %v3399_v42  ;;  %v1616_v42 = vld [vmem:[%s6916_s5 + $0x98] sm:$0xff]  ;;  %1783 = vmatpush1.msra.mxu1 %v3436_v40 }
 0x103   :  { %1439 = vmatpush2.msra.mxu0 %v3398_v43  ;;  %v3435_v43 = vld [vmem:[%s6916_s5 + $0x2a8] sm:$0xff]  ;;  %v1648_v40 = vld [vmem:[%s6916_s5 + $0x198] sm:$0xff] }
 0x104   :  { %1440 = vmatprep.subr.mxu0 %v3397_v45  ;;  %v1615_v45 = vld [vmem:[%s6916_s5 + $0x90] sm:$0xff]  ;;  %1784 = vmatprep.subr.mxu1 %v3435_v43 }
 0x105   :  { %1441 = vmatpush2.msra.mxu0 %v3396_v46  ;;  %v3434_v46 = vld [vmem:[%s6916_s5 + $0x2a0] sm:$0xff]  ;;  %v1647_v43 = vld [vmem:[%s6916_s5 + $0x190] sm:$0xff] }
 0x106   :  { %1442 = vmatprep.subr.mxu0 %v3395_v48  ;;  %v1614_v48 = vld [vmem:[%s6916_s5 + $0x88] sm:$0xff]  ;;  %1785 = vmatpush1.msra.mxu1 %v3434_v46 }
 0x107   :  { %1443 = vmatpush2.msra.mxu0 %v3394_v49  ;;  %v3433_v49 = vld [vmem:[%s6916_s5 + $0x298] sm:$0xff]  ;;  %v1646_v46 = vld [vmem:[%s6916_s5 + $0x188] sm:$0xff] }
 0x108   :  { %1444 = vmatprep.subr.mxu0 %v3393_v50  ;;  %v1613_v50 = vld [vmem:[%s6916_s5 + $0x80] sm:$0xff]  ;;  %1786 = vmatprep.subr.mxu1 %v3433_v49 }
 0x109   :  { %1445 = vmatpush2.msra.mxu0 %v3392_v51  ;;  %v3432_v51 = vld [vmem:[%s6916_s5 + $0x290] sm:$0xff]  ;;  %v3466_v49 = vld [vmem:[%s6916_s5 + $0x3a0] sm:$0xff] }
 0x10a   :  { %1446 = vmatprep.subr.mxu0 %v3391_v52  ;;  %v1612_v52 = vld [vmem:[%s6916_s5 + $0x78] sm:$0xff]  ;;  %1787 = vmatpush1.msra.mxu1 %v3432_v51 }
 0x10b   :  { %1447 = vmatpush2.msra.mxu0 %v3390_v53  ;;  %v3431_v53 = vld [vmem:[%s6916_s5 + $0x288] sm:$0xff]  ;;  %v3465_v51 = vld [vmem:[%s6916_s5 + $0x398] sm:$0xff] }
 0x10c   :  { %1448 = vmatprep.subr.mxu0 %v3389_v54  ;;  %v1611_v54 = vld [vmem:[%s6916_s5 + $0x70] sm:$0xff]  ;;  %1788 = vmatprep.subr.mxu1 %v3431_v53 }
 0x10d   :  { %1449 = vmatpush2.msra.mxu0 %v3388_v55  ;;  %v3430_v55 = vld [vmem:[%s6916_s5 + $0x280] sm:$0xff]  ;;  %v3464_v53 = vld [vmem:[%s6916_s5 + $0x390] sm:$0xff] }
 0x10e   :  { %1450 = vmatprep.subr.mxu0 %v3387_v9  ;;  %v3429_v9 = vld [vmem:[%s6916_s5 + $0x278] sm:$0xff]  ;;  %1789 = vmatpush1.msra.mxu1 %v3430_v55  ;;  %v3463_v55 = vld [vmem:[%s6916_s5 + $0x388] sm:$0xff] }
 0x10f   :  { %1451 = vmatpush2.msra.mxu0 %v3386_v59  ;;  %v3428_v59 = vld [vmem:[%s6916_s5 + $0x270] sm:$0xff]  ;;  %1790 = vmatprep.subr.mxu1 %v3429_v9  ;;  %v1641_v9 = vld [vmem:[%s6916_s5 + $0x160] sm:$0xff] }
 0x110   :  { %1452 = vmatprep.subr.mxu0 %v3385_v60  ;;  %v1608_v60 = vld [vmem:[%s6916_s5 + $0x58] sm:$0xff]  ;;  %1791 = vmatpush1.msra.mxu1 %v3428_v59 }
 0x111   :  { %1453 = vmatpush2.msra.mxu0 %v3384_v16  ;;  %v3426_v16 = vld [vmem:[%s6916_s5 + $0x260] sm:$0xff]  ;;  %1792 = vmatprep.subr.mxu1 %v3427_v61  ;;  %v1640_v59 = vld [vmem:[%s6916_s5 + $0x158] sm:$0xff]  ;;  %v1639_v61 = vld [vmem:[%s6916_s5 + $0x150] sm:$0xff] }
 0x112   :  { %1454 = vmatprep.subr.mxu0 %v3383_v2  ;;  %v1605_v2 = vld [vmem:[%s6916_s5 + $0x40] sm:$0xff]  ;;  %1793 = vmatpush1.msra.mxu1 %v3426_v16  ;;  %v1638_v16 = vld [vmem:[%s6916_s5 + $0x148] sm:$0xff] }
 0x113   :  { %1455 = vmatpush2.msra.mxu0 %v3382_v4  ;;  %v1604_v4 = vld [vmem:[%s6916_s5 + $0x38] sm:$0xff]  ;;  %1794 = vmatprep.subr.mxu1 %v3425_v1  ;;  %v1637_v1 = vld [vmem:[%s6916_s5 + $0x140] sm:$0xff] }
 0x114   :  { %1457 = vmatmul.mubr.f32.vlgmr.msra.gmra.mxu0 %v1301_v56  ;;  %1863 = vmatprep.subr.mxu0 %v1628_v36  ;;  %v3423_v56 = vld [vmem:[%s6916_s5 + $0x248] sm:$0xff]  ;;  %v1659_v36 = vld [vmem:[%s6916_s5 + $0x1f0] sm:$0xff] }
 0x115   :  { %1462 = vmatprep.mubr.f32.mxu0 %v1308_v7  ;;  %1864 = vmatpush1.msra.mxu0 %v1627_v6  ;;  %v3422_v7 = vld [vmem:[%s6916_s5 + $0x240] sm:$0xff] }
 0x116   :  { %1865 = vmatprep.subr.mxu0 %v1626_v20  ;;  %1795 = vmatpush1.msra.mxu1 %v3424_v3  ;;  %v3414_v6 = vld [vmem:[%s6916_s5 + $0x200] sm:$0xff]  ;;  %v1658_v20 = vld [vmem:[%s6916_s5 + $0x1e8] sm:$0xff]  ;;  %v1636_v3 = vld [vmem:[%s6916_s5 + $0x138] sm:$0xff] }
 0x117   :  { %1866 = vmatpush1.msra.mxu0 %v1625_v21  ;;  %1796 = vmatprep.subr.mxu1 %v3423_v56  ;;  %v3477_v21 = vld [vmem:[%s6916_s5 + $0x3f8] sm:$0xff]  ;;  %v1635_v56 = vld [vmem:[%s6916_s5 + $0x130] sm:$0xff] }
 0x118   :  { %1463 = vmatmul.mubr.f32.gmra.mxu0 %v1306_v41  ;;  %1867 = vmatprep.subr.mxu0 %v1624_v22  ;;  %v1600_v41 = vld [vmem:[%s6916_s5 + $0x18] sm:$0xff]  ;;  %v1657_v22 = vld [vmem:[%s6916_s5 + $0x1e0] sm:$0xff] }
 0x119   :  { %1468 = vmatprep.mubr.f32.mxu0 %v1314_v17  ;;  %1868 = vmatpush1.msra.mxu0 %v1623_v12  ;;  %v3418_v17 = vld [vmem:[%s6916_s5 + $0x220] sm:$0xff]  ;;  %v1656_v12 = vld [vmem:[%s6916_s5 + $0x1d8] sm:$0xff] }
 0x11a   :  { %1869 = vmatprep.subr.mxu0 %v1622_v26  ;;  %1797 = vmatpush1.msra.mxu1 %v3422_v7  ;;  %v1655_v26 = vld [vmem:[%s6916_s5 + $0x1d0] sm:$0xff]  ;;  %v1634_v7 = vld [vmem:[%s6916_s5 + $0x128] sm:$0xff] }
 0x11b   :  { %1870 = vmatpush1.msra.mxu0 %v1621_v29  ;;  %1798 = vmatprep.subr.mxu1 %v3421_v10  ;;  %v1652_v29 = vld [vmem:[%s6916_s5 + $0x1b8] sm:$0xff]  ;;  %v1633_v10 = vld [vmem:[%s6916_s5 + $0x120] sm:$0xff] }
 0x11c   :  { %1469 = vmatmul.mubr.f32.gmra.mxu0 %v1311_v47  ;;  %1871 = vmatprep.subr.mxu0 %v1620_v31  ;;  %v1597_v47 = vld [vmem:[%s6916_s5] sm:$0xff]  ;;  %v1650_v31 = vld [vmem:[%s6916_s5 + $0x1a8] sm:$0xff] }
 0x11d   :  { %1474 = vmatprep.mubr.f32.mxu0 %v1318_v25  ;;  %1872 = vmatpush1.msra.mxu0 %v1619_v34  ;;  %v1660_v25 = vld [vmem:[%s6916_s5 + $0x1f8] sm:$0xff]  ;;  %v3472_v34 = vld [vmem:[%s6916_s5 + $0x3d0] sm:$0xff] }
 0x11e   :  { %1873 = vmatprep.subr.mxu0 %v1618_v37  ;;  %1799 = vmatpush1.msra.mxu1 %v3420_v13  ;;  %v3470_v37 = vld [vmem:[%s6916_s5 + $0x3c0] sm:$0xff]  ;;  %v1632_v13 = vld [vmem:[%s6916_s5 + $0x118] sm:$0xff] }
 0x11f   :  { %1874 = vmatpush1.msra.mxu0 %v1617_v39  ;;  %1800 = vmatprep.subr.mxu1 %v3419_v14  ;;  %v3469_v39 = vld [vmem:[%s6916_s5 + $0x3b8] sm:$0xff]  ;;  %v1631_v14 = vld [vmem:[%s6916_s5 + $0x110] sm:$0xff] }
 0x120   :  { %1475 = vmatmul.mubr.f32.gmra.mxu0 %v1316_v19  ;;  %1875 = vmatprep.subr.mxu0 %v1616_v42  ;;  %v3415_v19 = vld [vmem:[%s6916_s5 + $0x208] sm:$0xff]  ;;  %v3468_v42 = vld [vmem:[%s6916_s5 + $0x3b0] sm:$0xff] }
 0x121   :  { %1876 = vmatpush1.msra.mxu0 %v1615_v45  ;;  %1801 = vmatpush1.msra.mxu1 %v3418_v17  ;;  %v3467_v45 = vld [vmem:[%s6916_s5 + $0x3a8] sm:$0xff] }
 0x122   :  { %1877 = vmatprep.subr.mxu0 %v1614_v48  ;;  %1802 = vmatprep.subr.mxu1 %v3417_v18  ;;  %v1645_v48 = vld [vmem:[%s6916_s5 + $0x180] sm:$0xff]  ;;  %v1630_v17 = vld [vmem:[%s6916_s5 + $0x108] sm:$0xff] }
 0x123   :  { %1878 = vmatpush1.msra.mxu0 %v1613_v50  ;;  %1803 = vmatpush1.msra.mxu1 %v3416_v63  ;;  %v1644_v50 = vld [vmem:[%s6916_s5 + $0x178] sm:$0xff]  ;;  %v1629_v18 = vld [vmem:[%s6916_s5 + $0x100] sm:$0xff] }
 0x124   :  { %1879 = vmatprep.subr.mxu0 %v1612_v52  ;;  %1804 = vmatprep.subr.mxu1 %v3415_v19  ;;  %v1643_v52 = vld [vmem:[%s6916_s5 + $0x170] sm:$0xff]  ;;  %v3573_v63 = vld [vmem:[%s6916_s5 + $0x6f8] sm:$0xff]  ;;  %v3447_v19 = vld [vmem:[%s6916_s5 + $0x308] sm:$0xff] }
 0x125   :  { %1880 = vmatpush1.msra.mxu0 %v1611_v54  ;;  %1805 = vmatpush1.msra.mxu1 %v3414_v6  ;;  %v1642_v54 = vld [vmem:[%s6916_s5 + $0x168] sm:$0xff]  ;;  %v3509_v6 = vld [vmem:[%s6916_s5 + $0x4f8] sm:$0xff] }
 0x126   :  { %1881 = vmatprep.subr.mxu0 %v1610_v57  ;;  %1806 = vmatprep.subr.mxu1 %v3477_v21  ;;  %v3462_v57 = vld [vmem:[%s6916_s5 + $0x380] sm:$0xff] }
 0x127   :  { %1882 = vmatpush1.msra.mxu0 %v1609_v58  ;;  %1807 = vmatpush2.msra.mxu1 %v3476_v23  ;;  %v3461_v58 = vld [vmem:[%s6916_s5 + $0x378] sm:$0xff] }
 0x128   :  { %1883 = vmatprep.subr.mxu0 %v1608_v60  ;;  %1808 = vmatprep.subr.mxu1 %v3475_v24  ;;  %v3460_v60 = vld [vmem:[%s6916_s5 + $0x370] sm:$0xff]  ;;  %v432_v24 = vpop.f32.mrf.mxu1 }
 0x129   :  { %1884 = vmatpush1.msra.mxu0 %v1607_v62  ;;  %1809 = vmatpush2.msra.mxu1 %v3474_v32  ;;  %v3459_v62 = vld [vmem:[%s6916_s5 + $0x368] sm:$0xff] }
 0x12a   :  { %1885 = vmatprep.subr.mxu0 %v1606_v0  ;;  %1810 = vmatprep.subr.mxu1 %v3473_v33  ;;  %v3458_v0 = vld [vmem:[%s6916_s5 + $0x360] sm:$0xff] }
 0x12b   :  { %1886 = vmatpush1.msra.mxu0 %v1605_v2  ;;  %1811 = vmatpush2.msra.mxu1 %v3472_v34  ;;  %v3457_v2 = vld [vmem:[%s6916_s5 + $0x358] sm:$0xff] }
 0x12c   :  { %1887 = vmatprep.subr.mxu0 %v1604_v4  ;;  %1812 = vmatprep.subr.mxu1 %v3471_v35  ;;  %v3456_v4 = vld [vmem:[%s6916_s5 + $0x350] sm:$0xff] }
 0x12d   :  { %1888 = vmatpush1.msra.mxu0 %v1603_v5  ;;  %1813 = vmatpush2.msra.mxu1 %v3470_v37  ;;  %v3455_v5 = vld [vmem:[%s6916_s5 + $0x348] sm:$0xff] }
 0x12e   :  { %1889 = vmatprep.subr.mxu0 %v1602_v8  ;;  %1814 = vmatprep.subr.mxu1 %v3469_v39  ;;  %v3454_v8 = vld [vmem:[%s6916_s5 + $0x340] sm:$0xff] }
 0x12f   :  { %1890 = vmatpush1.msra.mxu0 %v1601_v11  ;;  %1815 = vmatpush2.msra.mxu1 %v3468_v42  ;;  %v3453_v11 = vld [vmem:[%s6916_s5 + $0x338] sm:$0xff] }
 0x130   :  { %1891 = vmatprep.subr.mxu0 %v1600_v41  ;;  %1816 = vmatprep.subr.mxu1 %v3467_v45  ;;  %v3452_v41 = vld [vmem:[%s6916_s5 + $0x330] sm:$0xff] }
 0x131   :  { %1892 = vmatpush1.msra.mxu0 %v1599_v15  ;;  %1817 = vmatpush2.msra.mxu1 %v3466_v49  ;;  %v3451_v15 = vld [vmem:[%s6916_s5 + $0x328] sm:$0xff] }
 0x132   :  { %1893 = vmatprep.subr.mxu0 %v1598_v44  ;;  %1818 = vmatprep.subr.mxu1 %v3465_v51  ;;  %v3450_v44 = vld [vmem:[%s6916_s5 + $0x320] sm:$0xff] }
 0x133   :  { %1894 = vmatpush1.msra.mxu0 %v1597_v47  ;;  %1819 = vmatpush2.msra.mxu1 %v3464_v53  ;;  %v3449_v47 = vld [vmem:[%s6916_s5 + $0x318] sm:$0xff] }
 0x134   :  { %1895 = vmatprep.subr.mxu0 %v1660_v25  ;;  %1820 = vmatprep.subr.mxu1 %v3463_v55  ;;  %v3448_v25 = vld [vmem:[%s6916_s5 + $0x310] sm:$0xff] }
 0x135   :  { %1896 = vmatpush2.msra.mxu0 %v1659_v36  ;;  %1821 = vmatpush2.msra.mxu1 %v3462_v57  ;;  %v3446_v36 = vld [vmem:[%s6916_s5 + $0x300] sm:$0xff] }
 0x136   :  { %1897 = vmatprep.subr.mxu0 %v1658_v20  ;;  %1822 = vmatprep.subr.mxu1 %v3461_v58  ;;  %v343_v20 = vpop.f32.mrf.mxu0 }
 0x137   :  { %1898 = vmatpush2.msra.mxu0 %v1657_v22  ;;  %1823 = vmatpush2.msra.mxu1 %v3460_v60 }
 0x138   :  { %1899 = vmatprep.subr.mxu0 %v1656_v12  ;;  %1824 = vmatprep.subr.mxu1 %v3459_v62  ;;  %v345_v21 = vpop.f32.mrf.mxu0  ;;  %v433_v62 = vadd.f32 %v432_v24, %v343_v20 }
 0x139   :  { %1900 = vmatpush2.msra.mxu0 %v1655_v26  ;;  %1825 = vmatpush2.msra.mxu1 %v3458_v0  ;;  %v1491_v0 = vlaneseq }
 0x13a   :  { %1901 = vmatprep.subr.mxu0 %v1654_v27  ;;  %1826 = vmatprep.subr.mxu1 %v3457_v2  ;;  %v349_v22 = vpop.f32.mrf.mxu0  ;;  %v434_v27 = vpop.f32.mrf.mxu1 }
 0x13b   :  { %1902 = vmatpush2.msra.mxu0 %v1653_v28  ;;  %1827 = vmatpush2.msra.mxu1 %v3456_v4 }
 0x13c   :  { %1903 = vmatprep.subr.mxu0 %v1652_v29  ;;  %1828 = vmatprep.subr.mxu1 %v3455_v5  ;;  %v351_v23 = vpop.f32.mrf.mxu0  ;;  %v438_v28 = vpop.f32.mrf.mxu1 }
 0x13d   :  { %1904 = vmatpush2.msra.mxu0 %v1651_v30  ;;  %1829 = vmatpush2.msra.mxu1 %v3454_v8  ;;  %v439_v4 = vadd.f32 %v438_v28, %v349_v22 }
 0x13e   :  { %1905 = vmatprep.subr.mxu0 %v1650_v31  ;;  %1830 = vmatprep.subr.mxu1 %v3453_v11  ;;  %v355_v12 = vpop.f32.mrf.mxu0  ;;  %v440_v30 = vpop.f32.mrf.mxu1 }
 0x13f   :  { %1906 = vmatpush2.msra.mxu0 %v1649_v38  ;;  %1831 = vmatpush2.msra.mxu1 %v3452_v41  ;;  %v441_v8 = vadd.f32 %v440_v30, %v351_v23 }
 0x140   :  { %1907 = vmatprep.subr.mxu0 %v1648_v40  ;;  %1832 = vmatprep.subr.mxu1 %v3451_v15  ;;  %v357_v26 = vpop.f32.mrf.mxu0  ;;  %v444_v32 = vpop.f32.mrf.mxu1 }
 0x141   :  { %1908 = vmatpush2.msra.mxu0 %v1647_v43  ;;  %1833 = vmatpush2.msra.mxu1 %v3450_v44 }
 0x142   :  { %1909 = vmatprep.subr.mxu0 %v1646_v46  ;;  %1834 = vmatprep.subr.mxu1 %v3449_v47  ;;  %v446_v34 = vpop.f32.mrf.mxu1 }
 0x143   :  { %1910 = vmatpush2.msra.mxu0 %v1645_v48  ;;  %1835 = vmatpush2.msra.mxu1 %v3448_v25  ;;  %v361_v29 = vpop.f32.mrf.mxu0  ;;  %v447_v47 = vadd.f32 %v446_v34, %v357_v26 }
 0x144   :  { %1911 = vmatprep.subr.mxu0 %v1644_v50  ;;  %1836 = vmatprep.subr.mxu1 %v3447_v19  ;;  %v450_v37 = vpop.f32.mrf.mxu1 }
 0x145   :  { %1912 = vmatpush2.msra.mxu0 %v1643_v52  ;;  %1837 = vmatpush2.msra.mxu1 %v3446_v36  ;;  %v5726_v31 = vpop.f32.mrf.mxu0 }
 0x146   :  { %1913 = vmatprep.subr.mxu0 %v1642_v54  ;;  %2061 = vmatprep.subr.mxu1 %v3509_v6  ;;  %v452_v39 = vpop.f32.mrf.mxu1  ;;  %v451_v6 = vadd.f32 %v450_v37, %v361_v29 }
 0x147   :  { %1914 = vmatpush2.msra.mxu0 %v1641_v9  ;;  %v453_v29 = vadd.f32 %v452_v39, %v5726_v31  ;;  %v1510_v31 = vld [vmem:[%s6918_s1 + $0x8] sm:$0xff] }
 0x148   :  { %1915 = vmatprep.subr.mxu0 %v1640_v59 }
 0x149   :  { %1916 = vmatpush2.msra.mxu0 %v1639_v61 }
 0x14a   :  { %1917 = vmatprep.subr.mxu0 %v1638_v16  ;;  %v631_v33 = vpop.f32.mrf.mxu0 }
 0x14b   :  { %1918 = vmatpush2.msra.mxu0 %v1637_v1  ;;  %v435_v1 = vadd.f32 %v434_v27, %v345_v21  ;;  %v654_v2 = vadd.f32 %v631_v33, %v433_v62  ;;  %v1511_v62 = vld [vmem:[%s6918_s1 + $0x10] sm:$0xff] }
 0x14c   :  { %1919 = vmatprep.subr.mxu0 %v1636_v3  ;;  %v633_v35 = vpop.f32.mrf.mxu0 }
 0x14d   :  { %1920 = vmatpush2.msra.mxu0 %v1635_v56  ;;  %v838_v42 = vpop.f32.mrf.mxu1  ;;  %v655_v56 = vadd.f32 %v633_v35, %v435_v1 }
 0x14e   :  { %1921 = vmatprep.subr.mxu0 %v1634_v7  ;;  %v5730_v7 = vshrl.u32 %v1491_v0, 7 }
 0x14f   :  { %1922 = vmatpush2.msra.mxu0 %v1633_v10  ;;  %v840_v45 = vpop.f32.mrf.mxu1  ;;  %v861_v10 = vadd.f32 %v838_v42, %v654_v2 }
 0x150   :  { %1923 = vmatprep.subr.mxu0 %v1632_v13  ;;  %v637_v38 = vpop.f32.mrf.mxu0  ;;  %v862_v41 = vadd.f32 %v840_v45, %v655_v56  ;;  %v1493_v44 = vsub.s32 0, %v5730_v7  ;;  %v1497_v36 = vsub.s32 1, %v5730_v7  ;;  %v1512_v56 = vld [vmem:[%s6918_s1 + $0x18] sm:$0xff]  ;;  %v3003_v7 = vld [vmem:[%s6920_s2 + $0x8] sm:$0xff] }
 0x151   :  { %1924 = vmatpush2.msra.mxu0 %v1631_v14  ;;  %v656_v11 = vadd.f32 %v637_v38, %v439_v4 }
 0x152   :  { %1925 = vmatprep.subr.mxu0 %v1630_v17  ;;  %v639_v40 = vpop.f32.mrf.mxu0 }
 0x153   :  { %1926 = vmatpush2.msra.mxu0 %v1629_v18  ;;  %v844_v48 = vpop.f32.mrf.mxu1  ;;  %v657_v14 = vadd.f32 %v639_v40, %v441_v8  ;;  %v445_v18 = vadd.f32 %v444_v32, %v355_v12  ;;  %v1509_v40 = vld [vmem:[%s6918_s1] sm:$0xff] }
 0x154   :  { %2267 = vmatprep.subr.mxu0 %v3573_v63  ;;  %v1489_v63 = vld [vmem:[%s6917_s4] sm:$0x3]  ;;  %v863_v25 = vadd.f32 %v844_v48, %v656_v11 }
 0x155   :  { %v846_v50 = vpop.f32.mrf.mxu1  ;;  %v5739_v12 = vrot.slane %v1489_v63, %v1493_v44  ;;  %v5743_v35 = vrot.slane %v1489_v63, %v1497_v36 }
 0x156   :  { %v643_v43 = vpop.f32.mrf.mxu0  ;;  %v864_v23 = vadd.f32 %v846_v50, %v657_v14 }
 0x157   :  { %v658_v20 = vadd.f32 %v643_v43, %v445_v18 }
 0x158   :  { %v645_v46 = vpop.f32.mrf.mxu0 }
 0x159   :  { %v850_v52 = vpop.f32.mrf.mxu1  ;;  %v659_v21 = vadd.f32 %v645_v46, %v447_v47 }
 0x15a   :  { %v865_v37 = vadd.f32 %v850_v52, %v658_v20  ;;  %v1514_v20 = vld [vmem:[%s6918_s1 + $0x28] sm:$0xff] }
 0x15b   :  { %v852_v54 = vpop.f32.mrf.mxu1 }
 0x15c   :  { %v649_v49 = vpop.f32.mrf.mxu0  ;;  %v866_v38 = vadd.f32 %v852_v54, %v659_v21 }
 0x15d   :  { %v660_v26 = vadd.f32 %v649_v49, %v451_v6 }
 0x15e   :  { %v651_v51 = vpop.f32.mrf.mxu0 }
 0x15f   :  { %v856_v57 = vpop.f32.mrf.mxu1  ;;  %v661_v49 = vadd.f32 %v651_v51, %v453_v29 }
 0x160   :  { %v867_v50 = vadd.f32 %v856_v57, %v660_v26 }
 0x161   :  { %v5728_v58 = vpop.f32.mrf.mxu1 }
 0x162   :  { %v868_v2 = vadd.f32 %v5728_v58, %v661_v49 }
 0x192   :  { %v1045_v53 = vpop.f32.mrf.mxu0 }
 0x193   :  { %v1068_v15 = vadd.f32 %v1045_v53, %v861_v10 }
 0x194   :  { %v1047_v55 = vpop.f32.mrf.mxu0 }
 0x195   :  { %v1251_v60 = vpop.f32.mrf.mxu1  ;;  %v1069_v19 = vadd.f32 %v1047_v55, %v862_v41 }
 0x196   :  { %v1274_v24 = vadd.f32 %v1251_v60, %v1068_v15 }
 0x197   :  { %v1051_v9 = vpop.f32.mrf.mxu0  ;;  %v1253_v16 = vpop.f32.mrf.mxu1 }
 0x198   :  { %v1070_v27 = vadd.f32 %v1051_v9, %v863_v25  ;;  %v1275_v32 = vadd.f32 %v1253_v16, %v1069_v19  ;;  %v1513_v25 = vld [vmem:[%s6918_s1 + $0x20] sm:$0xff] }
 0x199   :  { %v1053_v59 = vpop.f32.mrf.mxu0  ;;  %v1257_v5 = vpop.f32.mrf.mxu1 }
 0x19a   :  { %v1071_v33 = vadd.f32 %v1053_v59, %v864_v23  ;;  %v1276_v43 = vadd.f32 %v1257_v5, %v1070_v27 }
 0x19b   :  { %v1259_v17 = vpop.f32.mrf.mxu1 }
 0x19c   :  { %v1057_v61 = vpop.f32.mrf.mxu0  ;;  %v1277_v52 = vadd.f32 %v1259_v17, %v1071_v33 }
 0x19d   :  { %v1263_v28 = vpop.f32.mrf.mxu1  ;;  %v1072_v53 = vadd.f32 %v1057_v61, %v865_v37 }
 0x19e   :  { %v1059_v3 = vpop.f32.mrf.mxu0 }
 0x19f   :  { %v1265_v45 = vpop.f32.mrf.mxu1  ;;  %v1073_v55 = vadd.f32 %v1059_v3, %v866_v38  ;;  %v1278_v3 = vadd.f32 %v1263_v28, %v1072_v53 }
 0x1a0   :  { %v1063_v13 = vpop.f32.mrf.mxu0 }
 0x1a1   :  { %v1074_v60 = vadd.f32 %v1063_v13, %v867_v50  ;;  %v1269_v51 = vpop.f32.mrf.mxu1  ;;  %v1279_v4 = vadd.f32 %v1265_v45, %v1073_v55 }
 0x1a2   :  { %v1065_v22 = vpop.f32.mrf.mxu0 }
 0x1a3   :  { %v1075_v41 = vadd.f32 %v1065_v22, %v868_v2  ;;  %v1280_v14 = vadd.f32 %v1269_v51, %v1074_v60  ;;  %v1271_v18 = vpop.f32.mrf.mxu1  ;;  %v3570_v51 = vld [vmem:[%s6916_s5 + $0x6e0] sm:$0xff] }
 0x1a5   :  { %v1281_v28 = vadd.f32 %v1271_v18, %v1075_v41 }
 0x1d4   :  { %v1458_v30 = vpop.f32.mrf.mxu0 }
 0x1d5   :  { %v1481_v34 = vadd.f32 %v1458_v30, %v1274_v24  ;;  %v1515_v30 = vld [vmem:[%s6918_s1 + $0x30] sm:$0xff] }
 0x1d6   :  { %v1460_v42 = vpop.f32.mrf.mxu0 }
 0x1d7   :  { %v1501_v46 = vadd.f32 %v5739_v12, %v1481_v34  ;;  %v1482_v48 = vadd.f32 %v1460_v42, %v1275_v32 }
 0x1d8   :  { %v1464_v39 = vpop.f32.mrf.mxu0 }
 0x1d9   :  { %v1517_v54 = vadd.f32 %v1509_v40, %v1501_v46  ;;  %v1502_v9 = vadd.f32 %v5743_v35, %v1482_v48  ;;  %v1483_v59 = vadd.f32 %v1464_v39, %v1276_v43  ;;  %v1516_v46 = vld [vmem:[%s6918_s1 + $0x38] sm:$0xff]  ;;  %v3572_v39 = vld [vmem:[%s6916_s5 + $0x6f0] sm:$0xff] }
 0x1da   :  { %v1466_v16 = vpop.f32.mrf.mxu0 }
 0x1db   :  { %v1525_v57 = vmax.f32 %v1517_v54, 0.0  ;;  %v1518_v61 = vadd.f32 %v1510_v31, %v1502_v9  ;;  %v1503_v0 = vadd.f32 %v5739_v12, %v1483_v59  ;;  %v1484_v1 = vadd.f32 %v1466_v16, %v1277_v52 }
 0x1dc   :  { %v1470_v5 = vpop.f32.mrf.mxu0 }
 0x1dd   :  { %v1553_v8 = vrot.slane %v1525_v57, 5  ;;  %v1526_v10 = vmax.f32 %v1518_v61, 0.0  ;;  %v1519_v11 = vadd.f32 %v1511_v62, %v1503_v0  ;;  %v1504_v13 = vadd.f32 %v5743_v35, %v1484_v1  ;;  %v3569_v0 = vld [vmem:[%s6916_s5 + $0x6d8] sm:$0xff] }
 0x1de   :  { %v1485_v15 = vadd.f32 %v1470_v5, %v1278_v3  ;;  %v1472_v17 = vpop.f32.mrf.mxu0  ;;  %v3568_v3 = vld [vmem:[%s6916_s5 + $0x6d0] sm:$0xff] }
 0x1df   :  { %1577 = vst [vmem:[#allocation3 + $0x48] sm:$0xf8] %v1553_v8  ;;  %v1554_v47 = vrot.slane %v1526_v10, 5  ;;  %v1527_v58 = vmax.f32 %v1519_v11, 0.0  ;;  %v1520_v63 = vadd.f32 %v1512_v56, %v1504_v13  ;;  %v1486_v19 = vadd.f32 %v1472_v17, %v1279_v4  ;;  %v3508_v56 = vld [vmem:[%s6916_s5 + $0x4f0] sm:$0xff]  ;;  %v3566_v13 = vld [vmem:[%s6916_s5 + $0x6c0] sm:$0xff] }
 0x1e0   :  { %v1505_v6 = vadd.f32 %v5739_v12, %v1485_v15  ;;  %v1476_v21 = vpop.f32.mrf.mxu0  ;;  %v3507_v17 = vld [vmem:[%s6916_s5 + $0x4e8] sm:$0xff] }
 0x1e1   :  { %1578 = vst [vmem:[#allocation3] sm:$0xf8] %v1554_v47  ;;  %v1555_v22 = vrot.slane %v1527_v58, 5  ;;  %v1528_v23 = vmax.f32 %v1520_v63, 0.0  ;;  %v1506_v24 = vadd.f32 %v5743_v35, %v1486_v19  ;;  %v1487_v27 = vadd.f32 %v1476_v21, %v1280_v14  ;;  %v3565_v14 = vld [vmem:[%s6916_s5 + $0x6b8] sm:$0xff]  ;;  %v3563_v58 = vld [vmem:[%s6916_s5 + $0x6a8] sm:$0xff] }
 0x1e2   :  { %v1521_v26 = vadd.f32 %v1513_v25, %v1505_v6  ;;  %v1478_v32 = vpop.f32.mrf.mxu0  ;;  %v3506_v25 = vld [vmem:[%s6916_s5 + $0x4e0] sm:$0xff]  ;;  %v3505_v21 = vld [vmem:[%s6916_s5 + $0x4d8] sm:$0xff] }
 0x1e3   :  { %v5775_v33 = vsel %vm54_vm0, %v1553_v8, %v1555_v22  ;;  %1581 = vst [vmem:[#allocation3 + $0x8] sm:$0x7] %v1555_v22  ;;  %v1557_v34 = vrot.slane %v1528_v23, 5  ;;  %v1522_v29 = vadd.f32 %v1514_v20, %v1506_v24  ;;  %v1507_v37 = vadd.f32 %v5739_v12, %v1487_v27  ;;  %v3567_v8 = vld [vmem:[%s6916_s5 + $0x6c8] sm:$0xff]  ;;  %v3562_v20 = vld [vmem:[%s6916_s5 + $0x6a0] sm:$0xff]  ;;  %v3561_v22 = vld [vmem:[%s6916_s5 + $0x698] sm:$0xff] }
 0x1e4   :  { %1579 = vst [vmem:[#allocation3 + $0x50] sm:$0xff] %v5775_v33  ;;  %v1529_v38 = vmax.f32 %v1521_v26, 0.0  ;;  %v1488_v40 = vadd.f32 %v1478_v32, %v1281_v28  ;;  %v1682_v57 = vrot.slane %v5775_v33, 1  ;;  %v3504_v24 = vld [vmem:[%s6916_s5 + $0x4d0] sm:$0xff] }
 0x1e5   :  { %v5780_v42 = vsel %vm54_vm0, %v1554_v47, %v1557_v34  ;;  %1582 = vst [vmem:[#allocation3 + $0x20] sm:$0x7] %v1557_v34  ;;  %v1530_v43 = vmax.f32 %v1522_v29, 0.0  ;;  %v1523_v45 = vadd.f32 %v1515_v30, %v1507_v37  ;;  %v3564_v47 = vld [vmem:[%s6916_s5 + $0x6b0] sm:$0xff]  ;;  %v3503_v30 = vld [vmem:[%s6916_s5 + $0x4c8] sm:$0xff] }
 0x1e6   :  { %1580 = vst [vmem:[#allocation3 + $0x30] sm:$0xff] %v5780_v42  ;;  %v1559_v48 = vrot.slane %v1529_v38, 5  ;;  %v1508_v49 = vadd.f32 %v5743_v35, %v1488_v40  ;;  %v1661_v12 = vld [vmem:[#allocation3 + $0x48] sm:$0xfe]  ;;  %v1685_v62 = vrot.slane %v5780_v42, 1  ;;  %v3560_v27 = vld [vmem:[%s6916_s5 + $0x690] sm:$0xff] }
 0x1e7   :  { %v1560_v50 = vrot.slane %v1530_v43, 5  ;;  %v1531_v53 = vmax.f32 %v1523_v45, 0.0  ;;  %v1681_v54 = vrot.slane %v1661_v12, 1  ;;  %v1589_v59 = vld [vmem:[#allocation3 + $0x48] sm:$0xff]  ;;  %v3502_v40 = vld [vmem:[%s6916_s5 + $0x4c0] sm:$0xff]  ;;  %v3501_v12 = vld [vmem:[%s6916_s5 + $0x4b8] sm:$0xff] }
 0x1e8   :  { %1583 = vst [vmem:[#allocation3 + $0x18] sm:$0xf8] %v1559_v48  ;;  %v1524_v55 = vadd.f32 %v1516_v46, %v1508_v49  ;;  %v1590_v31 = vld [vmem:[#allocation3] sm:$0xff]  ;;  %v3571_v35 = vld [vmem:[%s6916_s5 + $0x6e8] sm:$0xff]  ;;  %v2178_v46 = vrot.slane %v5780_v42, 3 }
 0x1e9   :  { %v1662_v52 = vld [vmem:[#allocation3] sm:$0xfe]  ;;  %1584 = vst [vmem:[#allocation3 + $0x40] sm:$0xf8] %v1560_v50  ;;  %v1561_v9 = vrot.slane %v1531_v53, 5  ;;  %1927 = vmatprep.mubr.f32.mxu0 %v1590_v31  ;;  %v1683_v4 = vsel %vm183_vm1, %v1681_v54, %v1682_v57  ;;  %v3559_v29 = vld [vmem:[%s6916_s5 + $0x688] sm:$0xff] }
 0x1ea   :  { %v1684_v60 = vrot.slane %v1662_v52, 1  ;;  %v1532_v16 = vmax.f32 %v1524_v55, 0.0  ;;  %1928 = vmatmul.mubr.f32.vlgmr.msra.gmra.mxu0 %v1589_v59  ;;  %v1663_v41 = vld [vmem:[#allocation3 + $0x8] sm:$0x1]  ;;  %v2159_v23 = vld [vmem:[#allocation3] sm:$0xf8] }
 0x1eb   :  { %v5799_v61 = vsel %vm54_vm0, %v1559_v48, %v1561_v9  ;;  %1587 = vst [vmem:[#allocation3 + $0x58] sm:$0x7] %v1561_v9  ;;  %2268 = vmatpush1.msra.mxu0 %v3572_v39  ;;  %1933 = vmatprep.mubr.f32.mxu0 %v5780_v42  ;;  %v1687_v19 = vrot.slane %v1663_v41, 1  ;;  %v2177_v37 = vrot.slane %v2159_v23, 3  ;;  %v3558_v43 = vld [vmem:[%s6916_s5 + $0x680] sm:$0xff]  ;;  %v3556_v31 = vld [vmem:[%s6916_s5 + $0x670] sm:$0xff] }
 0x1ec   :  { %v1686_v1 = vsel %vm183_vm1, %v1684_v60, %v1685_v62  ;;  %1585 = vst [vmem:[#allocation3 + $0x38] sm:$0xff] %v5799_v61  ;;  %v1563_v2 = vrot.slane %v1532_v16, 5  ;;  %2269 = vmatprep.subr.mxu0 %v3571_v35  ;;  %v1664_v5 = vld [vmem:[#allocation3 + $0x20] sm:$0x1]  ;;  %v1692_v55 = vrot.slane %v5799_v61, 1  ;;  %v3500_v52 = vld [vmem:[%s6916_s5 + $0x4b0] sm:$0xff] }
 0x1ed   :  { %1838 = vmatprep.mubr.f32.mxu1 %v1686_v1  ;;  %2270 = vmatpush1.msra.mxu0 %v3570_v51  ;;  %v1689_v10 = vrot.slane %v1664_v5, 1  ;;  %v1688_v26 = vsel %vm183_vm1, %v1682_v57, %v1687_v19  ;;  %v2179_v53 = vsel %vm678_vm3, %v2177_v37, %v2178_v46  ;;  %v1953_v9 = vld [vmem:[#allocation3] sm:$0xfc]  ;;  %v3499_v35 = vld [vmem:[%s6916_s5 + $0x4a8] sm:$0xff]  ;;  %v3497_v57 = vld [vmem:[%s6916_s5 + $0x498] sm:$0xff] }
 0x1ee   :  { %1839 = vmatmul.mubr.f32.vlgmr.msra.gmra.mxu1 %v1683_v4  ;;  %v5818_v11 = vsel %vm54_vm0, %v1560_v50, %v1563_v2  ;;  %1588 = vst [vmem:[#allocation3 + $0x10] sm:$0x7] %v1563_v2  ;;  %2271 = vmatprep.subr.mxu0 %v3569_v0  ;;  %v3557_v50 = vld [vmem:[%s6916_s5 + $0x678] sm:$0xff]  ;;  %v3555_v60 = vld [vmem:[%s6916_s5 + $0x668] sm:$0xff]  ;;  %v3554_v16 = vld [vmem:[%s6916_s5 + $0x660] sm:$0xff]  ;;  %v1971_v1 = vrot.slane %v1953_v9, 2 }
 0x1ef   :  { %1934 = vmatmul.mubr.f32.gmra.mxu0 %v5775_v33  ;;  %1586 = vst [vmem:[#allocation3 + $0x28] sm:$0xff] %v5818_v11  ;;  %2062 = vmatpush1.msra.mxu1 %v3508_v56  ;;  %v1690_v15 = vsel %vm183_vm1, %v1685_v62, %v1689_v10  ;;  %v1593_v63 = vld [vmem:[#allocation3 + $0x18] sm:$0xff]  ;;  %v1695_v38 = vrot.slane %v5818_v11, 1  ;;  %v3498_v62 = vld [vmem:[%s6916_s5 + $0x4a0] sm:$0xff]  ;;  %v3552_v2 = vld [vmem:[%s6916_s5 + $0x650] sm:$0xff]  ;;  %v1972_v4 = vrot.slane %v5780_v42, 2 }
 0x1f0   :  { %2272 = vmatpush1.msra.mxu0 %v3568_v3  ;;  %v1594_v18 = vld [vmem:[#allocation3 + $0x40] sm:$0xff]  ;;  %1844 = vmatprep.mubr.f32.mxu1 %v1690_v15  ;;  %v1665_v32 = vld [vmem:[#allocation3 + $0x18] sm:$0xfe]  ;;  %v3496_v3 = vld [vmem:[%s6916_s5 + $0x490] sm:$0xff] }
 0x1f1   :  { %2273 = vmatprep.subr.mxu0 %v3567_v8  ;;  %1939 = vmatprep.mubr.f32.mxu0 %v1594_v18  ;;  %v1666_v6 = vld [vmem:[#allocation3 + $0x40] sm:$0xfe]  ;;  %v1691_v49 = vrot.slane %v1665_v32, 1  ;;  %v3553_v0 = vld [vmem:[%s6916_s5 + $0x658] sm:$0xff]  ;;  %v3495_v5 = vld [vmem:[%s6916_s5 + $0x488] sm:$0xff]  ;;  %v1973_v10 = vsel %vm471_vm2, %v1971_v1, %v1972_v4 }
 0x1f2   :  { %2274 = vmatpush1.msra.mxu0 %v3566_v13  ;;  %2063 = vmatprep.subr.mxu1 %v3507_v17  ;;  %v1694_v28 = vrot.slane %v1666_v6, 1  ;;  %v1667_v39 = vld [vmem:[#allocation3 + $0x58] sm:$0x1]  ;;  %v3551_v8 = vld [vmem:[%s6916_s5 + $0x648] sm:$0xff]  ;;  %v3494_v13 = vld [vmem:[%s6916_s5 + $0x480] sm:$0xff] }
 0x1f3   :  { %2275 = vmatprep.subr.mxu0 %v3565_v14  ;;  %1940 = vmatmul.mubr.f32.gmra.mxu0 %v1593_v63  ;;  %v1693_v59 = vsel %vm183_vm1, %v1691_v49, %v1692_v55  ;;  %v1697_v51 = vrot.slane %v1667_v39, 1  ;;  %v3550_v41 = vld [vmem:[%s6916_s5 + $0x640] sm:$0xff]  ;;  %v3493_v14 = vld [vmem:[%s6916_s5 + $0x478] sm:$0xff]  ;;  %v3492_v17 = vld [vmem:[%s6916_s5 + $0x470] sm:$0xff] }
 0x1f4   :  { %2276 = vmatpush1.msra.mxu0 %v3564_v47  ;;  %2064 = vmatpush1.msra.mxu1 %v3506_v25  ;;  %v1696_v48 = vsel %vm183_vm1, %v1694_v28, %v1695_v38  ;;  %v3549_v15 = vld [vmem:[%s6916_s5 + $0x638] sm:$0xff]  ;;  %v3548_v18 = vld [vmem:[%s6916_s5 + $0x630] sm:$0xff]  ;;  %v3491_v47 = vld [vmem:[%s6916_s5 + $0x468] sm:$0xff] }
 0x1f5   :  { %2277 = vmatprep.subr.mxu0 %v3563_v58  ;;  %2065 = vmatprep.subr.mxu1 %v3505_v21  ;;  %v1668_v34 = vld [vmem:[#allocation3 + $0x10] sm:$0x1]  ;;  %v1698_v56 = vsel %vm183_vm1, %v1692_v55, %v1697_v51  ;;  %v3547_v58 = vld [vmem:[%s6916_s5 + $0x628] sm:$0xff]  ;;  %v3490_v63 = vld [vmem:[%s6916_s5 + $0x460] sm:$0xff] }
 0x1f6   :  { %2278 = vmatpush1.msra.mxu0 %v3562_v20  ;;  %1845 = vmatmul.mubr.f32.gmra.mxu1 %v1688_v26  ;;  %v1699_v45 = vrot.slane %v1668_v34, 1  ;;  %v3546_v25 = vld [vmem:[%s6916_s5 + $0x620] sm:$0xff]  ;;  %v3489_v19 = vld [vmem:[%s6916_s5 + $0x458] sm:$0xff]  ;;  %v3488_v20 = vld [vmem:[%s6916_s5 + $0x450] sm:$0xff] }
 0x1f7   :  { %2279 = vmatprep.subr.mxu0 %v3561_v22  ;;  %1945 = vmatprep.mubr.f32.mxu0 %v5818_v11  ;;  %v3545_v6 = vld [vmem:[%s6916_s5 + $0x618] sm:$0xff]  ;;  %v3544_v21 = vld [vmem:[%s6916_s5 + $0x610] sm:$0xff]  ;;  %v3487_v22 = vld [vmem:[%s6916_s5 + $0x448] sm:$0xff] }
 0x1f8   :  { %2066 = vmatpush1.msra.mxu1 %v3504_v24  ;;  %2280 = vmatpush1.msra.mxu0 %v3560_v27  ;;  %v1700_v54 = vsel %vm183_vm1, %v1695_v38, %v1699_v45  ;;  %v3543_v23 = vld [vmem:[%s6916_s5 + $0x608] sm:$0xff]  ;;  %v3486_v24 = vld [vmem:[%s6916_s5 + $0x440] sm:$0xff]  ;;  %v3485_v28 = vld [vmem:[%s6916_s5 + $0x438] sm:$0xff] }
 0x1f9   :  { %2067 = vmatprep.subr.mxu1 %v3503_v30  ;;  %1946 = vmatmul.mubr.f32.gmra.mxu0 %v5799_v61  ;;  %v3542_v27 = vld [vmem:[%s6916_s5 + $0x600] sm:$0xff]  ;;  %v3605_v26 = vld [vmem:[%s6916_s5 + $0x7f8] sm:$0xff]  ;;  %v3484_v30 = vld [vmem:[%s6916_s5 + $0x430] sm:$0xff] }
 0x1fa   :  { %2281 = vmatprep.subr.mxu0 %v3559_v29  ;;  %2068 = vmatpush1.msra.mxu1 %v3502_v40  ;;  %v3604_v32 = vld [vmem:[%s6916_s5 + $0x7f0] sm:$0xff]  ;;  %v3483_v34 = vld [vmem:[%s6916_s5 + $0x428] sm:$0xff]  ;;  %v3482_v37 = vld [vmem:[%s6916_s5 + $0x420] sm:$0xff] }
 0x1fb   :  { %2282 = vmatpush1.msra.mxu0 %v3558_v43  ;;  %2331 = vmatprep.mubr.f32.mxu0 %v2179_v53  ;;  %v3603_v29 = vld [vmem:[%s6916_s5 + $0x7e8] sm:$0xff]  ;;  %v3602_v38 = vld [vmem:[%s6916_s5 + $0x7e0] sm:$0xff]  ;;  %v3481_v40 = vld [vmem:[%s6916_s5 + $0x418] sm:$0xff] }
 0x1fc   :  { %1850 = vmatprep.mubr.f32.mxu1 %v1696_v48  ;;  %2069 = vmatprep.subr.mxu1 %v3501_v12  ;;  %v3601_v43 = vld [vmem:[%s6916_s5 + $0x7d8] sm:$0xff]  ;;  %v3480_v45 = vld [vmem:[%s6916_s5 + $0x410] sm:$0xff]  ;;  %v3479_v49 = vld [vmem:[%s6916_s5 + $0x408] sm:$0xff] }
 0x1fd   :  { %2283 = vmatprep.subr.mxu0 %v3557_v50  ;;  %1851 = vmatmul.mubr.f32.gmra.mxu1 %v1693_v59  ;;  %v3600_v48 = vld [vmem:[%s6916_s5 + $0x7d0] sm:$0xff]  ;;  %v3599_v12 = vld [vmem:[%s6916_s5 + $0x7c8] sm:$0xff]  ;;  %v3478_v50 = vld [vmem:[%s6916_s5 + $0x400] sm:$0xff] }
 0x1fe   :  { %2284 = vmatpush1.msra.mxu0 %v3556_v31  ;;  %2070 = vmatpush1.msra.mxu1 %v3500_v52  ;;  %v3598_v53 = vld [vmem:[%s6916_s5 + $0x7c0] sm:$0xff]  ;;  %v3541_v55 = vld [vmem:[%s6916_s5 + $0x5f8] sm:$0xff]  ;;  %v3540_v39 = vld [vmem:[%s6916_s5 + $0x5f0] sm:$0xff] }
 0x1ff   :  { %1856 = vmatprep.mubr.f32.mxu1 %v1700_v54  ;;  %2071 = vmatprep.subr.mxu1 %v3499_v35  ;;  %v3597_v31 = vld [vmem:[%s6916_s5 + $0x7b8] sm:$0xff]  ;;  %v3596_v52 = vld [vmem:[%s6916_s5 + $0x7b0] sm:$0xff]  ;;  %v3539_v54 = vld [vmem:[%s6916_s5 + $0x5e8] sm:$0xff] }
 0x200   :  { %2285 = vmatprep.subr.mxu0 %v3555_v60  ;;  %2072 = vmatpush1.msra.mxu1 %v3498_v62  ;;  %v3595_v9 = vld [vmem:[%s6916_s5 + $0x7a8] sm:$0xff]  ;;  %v3538_v59 = vld [vmem:[%s6916_s5 + $0x5e0] sm:$0xff]  ;;  %v3537_v60 = vld [vmem:[%s6916_s5 + $0x5d8] sm:$0xff] }
 0x201   :  { %2286 = vmatpush1.msra.mxu0 %v3554_v16  ;;  %2073 = vmatprep.subr.mxu1 %v3497_v57  ;;  %v3594_v35 = vld [vmem:[%s6916_s5 + $0x7a0] sm:$0xff]  ;;  %v3593_v62 = vld [vmem:[%s6916_s5 + $0x798] sm:$0xff]  ;;  %v3536_v16 = vld [vmem:[%s6916_s5 + $0x5d0] sm:$0xff] }
 0x202   :  { %2287 = vmatprep.subr.mxu0 %v3553_v0  ;;  %1857 = vmatmul.mubr.f32.gmra.mxu1 %v1698_v56  ;;  %v3592_v51 = vld [vmem:[%s6916_s5 + $0x790] sm:$0xff]  ;;  %v3535_v57 = vld [vmem:[%s6916_s5 + $0x5c8] sm:$0xff]  ;;  %v3534_v1 = vld [vmem:[%s6916_s5 + $0x5c0] sm:$0xff] }
 0x203   :  { %2288 = vmatpush1.msra.mxu0 %v3552_v2  ;;  %2074 = vmatpush1.msra.mxu1 %v3496_v3  ;;  %v3591_v0 = vld [vmem:[%s6916_s5 + $0x788] sm:$0xff]  ;;  %v3590_v2 = vld [vmem:[%s6916_s5 + $0x780] sm:$0xff]  ;;  %v3533_v3 = vld [vmem:[%s6916_s5 + $0x5b8] sm:$0xff] }
 0x204   :  { %2125 = vmatprep.mubr.f32.mxu1 %v1973_v10  ;;  %2075 = vmatprep.subr.mxu1 %v3495_v5  ;;  %v3589_v56 = vld [vmem:[%s6916_s5 + $0x778] sm:$0xff]  ;;  %v3532_v5 = vld [vmem:[%s6916_s5 + $0x5b0] sm:$0xff]  ;;  %v3531_v10 = vld [vmem:[%s6916_s5 + $0x5a8] sm:$0xff] }
 0x205   :  { %2289 = vmatprep.subr.mxu0 %v3551_v8  ;;  %2076 = vmatpush1.msra.mxu1 %v3494_v13  ;;  %v3588_v8 = vld [vmem:[%s6916_s5 + $0x770] sm:$0xff]  ;;  %v3587_v13 = vld [vmem:[%s6916_s5 + $0x768] sm:$0xff] }
 0x206   :  { %2290 = vmatpush1.msra.mxu0 %v3550_v41  ;;  %2077 = vmatprep.subr.mxu1 %v3493_v14  ;;  %v3530_v41 = vld [vmem:[%s6916_s5 + $0x5a0] sm:$0xff] }
 0x207   :  { %2291 = vmatprep.subr.mxu0 %v3549_v15  ;;  %2078 = vmatpush1.msra.mxu1 %v3492_v17  ;;  %v3586_v14 = vld [vmem:[%s6916_s5 + $0x760] sm:$0xff]  ;;  %v3529_v15 = vld [vmem:[%s6916_s5 + $0x598] sm:$0xff] }
 0x208   :  { %2292 = vmatpush1.msra.mxu0 %v3548_v18  ;;  %2079 = vmatprep.subr.mxu1 %v3491_v47  ;;  %v3585_v17 = vld [vmem:[%s6916_s5 + $0x758] sm:$0xff]  ;;  %v3528_v18 = vld [vmem:[%s6916_s5 + $0x590] sm:$0xff] }
 0x209   :  { %2293 = vmatprep.subr.mxu0 %v3547_v58  ;;  %2080 = vmatpush1.msra.mxu1 %v3490_v63  ;;  %v3584_v47 = vld [vmem:[%s6916_s5 + $0x750] sm:$0xff]  ;;  %v3527_v58 = vld [vmem:[%s6916_s5 + $0x588] sm:$0xff] }
 0x20a   :  { %2294 = vmatpush1.msra.mxu0 %v3546_v25  ;;  %2081 = vmatprep.subr.mxu1 %v3489_v19  ;;  %v3583_v63 = vld [vmem:[%s6916_s5 + $0x748] sm:$0xff]  ;;  %v3526_v25 = vld [vmem:[%s6916_s5 + $0x580] sm:$0xff] }
 0x20b   :  { %2295 = vmatprep.subr.mxu0 %v3545_v6  ;;  %2082 = vmatpush1.msra.mxu1 %v3488_v20  ;;  %v3582_v19 = vld [vmem:[%s6916_s5 + $0x740] sm:$0xff]  ;;  %v3525_v6 = vld [vmem:[%s6916_s5 + $0x578] sm:$0xff] }
 0x20c   :  { %2296 = vmatpush1.msra.mxu0 %v3544_v21  ;;  %2083 = vmatprep.subr.mxu1 %v3487_v22  ;;  %v3581_v20 = vld [vmem:[%s6916_s5 + $0x738] sm:$0xff]  ;;  %v3524_v21 = vld [vmem:[%s6916_s5 + $0x570] sm:$0xff] }
 0x20d   :  { %2297 = vmatprep.subr.mxu0 %v3543_v23  ;;  %2084 = vmatpush1.msra.mxu1 %v3486_v24  ;;  %v3580_v22 = vld [vmem:[%s6916_s5 + $0x730] sm:$0xff]  ;;  %v3523_v23 = vld [vmem:[%s6916_s5 + $0x568] sm:$0xff] }
 0x20e   :  { %2298 = vmatpush1.msra.mxu0 %v3542_v27  ;;  %2085 = vmatprep.subr.mxu1 %v3485_v28  ;;  %v3579_v24 = vld [vmem:[%s6916_s5 + $0x728] sm:$0xff]  ;;  %v3522_v27 = vld [vmem:[%s6916_s5 + $0x560] sm:$0xff] }
 0x20f   :  { %2299 = vmatprep.subr.mxu0 %v3605_v26  ;;  %2086 = vmatpush1.msra.mxu1 %v3484_v30  ;;  %v3578_v28 = vld [vmem:[%s6916_s5 + $0x720] sm:$0xff]  ;;  %v2158_v26 = vld [vmem:[#allocation3 + $0x48] sm:$0xf8]  ;;  %v3521_v30 = vld [vmem:[%s6916_s5 + $0x558] sm:$0xff] }
 0x210   :  { %2300 = vmatpush2.msra.mxu0 %v3604_v32  ;;  %2087 = vmatprep.subr.mxu1 %v3483_v34  ;;  %v3577_v32 = vld [vmem:[%s6916_s5 + $0x718] sm:$0xff]  ;;  %v3520_v34 = vld [vmem:[%s6916_s5 + $0x550] sm:$0xff] }
 0x211   :  { %2301 = vmatprep.subr.mxu0 %v3603_v29  ;;  %2088 = vmatpush1.msra.mxu1 %v3482_v37  ;;  %v3576_v29 = vld [vmem:[%s6916_s5 + $0x710] sm:$0xff]  ;;  %v2161_v37 = vld [vmem:[#allocation3 + $0x20] sm:$0x7] }
 0x212   :  { %2302 = vmatpush2.msra.mxu0 %v3602_v38  ;;  %2089 = vmatprep.subr.mxu1 %v3481_v40  ;;  %v3519_v38 = vld [vmem:[%s6916_s5 + $0x548] sm:$0xff] }
 0x213   :  { %2303 = vmatprep.subr.mxu0 %v3601_v43  ;;  %2090 = vmatpush1.msra.mxu1 %v3480_v45  ;;  %v3575_v40 = vld [vmem:[%s6916_s5 + $0x708] sm:$0xff]  ;;  %v2174_v43 = vrot.slane %v2158_v26, 3  ;;  %v3518_v45 = vld [vmem:[%s6916_s5 + $0x540] sm:$0xff] }
 0x214   :  { %2304 = vmatpush2.msra.mxu0 %v3600_v48  ;;  %2091 = vmatprep.subr.mxu1 %v3479_v49  ;;  %v3574_v48 = vld [vmem:[%s6916_s5 + $0x700] sm:$0xff]  ;;  %v3517_v49 = vld [vmem:[%s6916_s5 + $0x538] sm:$0xff] }
 0x215   :  { %2305 = vmatprep.subr.mxu0 %v3599_v12  ;;  %2092 = vmatpush1.msra.mxu1 %v3478_v50  ;;  %v2175_v12 = vrot.slane %v5775_v33, 3  ;;  %v2182_v50 = vrot.slane %v2161_v37, 3 }
 0x216   :  { %2306 = vmatpush2.msra.mxu0 %v3598_v53  ;;  %2093 = vmatprep.subr.mxu1 %v3541_v55  ;;  %v2160_v53 = vld [vmem:[#allocation3 + $0x8] sm:$0x7]  ;;  %v3701_v55 = vld [vmem:[%s6916_s5 + $0xaf8] sm:$0xff] }
 0x217   :  { %2307 = vmatprep.subr.mxu0 %v3597_v31  ;;  %2094 = vmatpush2.msra.mxu1 %v3540_v39  ;;  %v3516_v31 = vld [vmem:[%s6916_s5 + $0x530] sm:$0xff]  ;;  %v2176_v39 = vsel %vm678_vm3, %v2174_v43, %v2175_v12 }
 0x218   :  { %2308 = vmatpush2.msra.mxu0 %v3596_v52  ;;  %2095 = vmatprep.subr.mxu1 %v3539_v54  ;;  %v3700_v52 = vld [vmem:[%s6916_s5 + $0xaf0] sm:$0xff]  ;;  %v2163_v54 = vld [vmem:[#allocation3 + $0x40] sm:$0xf8] }
 0x219   :  { %2309 = vmatprep.subr.mxu0 %v3595_v9  ;;  %2096 = vmatpush2.msra.mxu1 %v3538_v59  ;;  %v3515_v9 = vld [vmem:[%s6916_s5 + $0x528] sm:$0xff] }
 0x21a   :  { %2310 = vmatpush2.msra.mxu0 %v3594_v35  ;;  %2097 = vmatprep.subr.mxu1 %v3537_v60  ;;  %v3699_v59 = vld [vmem:[%s6916_s5 + $0xae8] sm:$0xff]  ;;  %v2180_v35 = vrot.slane %v2160_v53, 3  ;;  %v2183_v60 = vsel %vm678_vm3, %v2178_v46, %v2182_v50  ;;  %v3697_v46 = vld [vmem:[%s6916_s5 + $0xad8] sm:$0xff] }
 0x21b   :  { %2311 = vmatprep.subr.mxu0 %v3593_v62  ;;  %2098 = vmatpush2.msra.mxu1 %v3536_v16  ;;  %v3514_v62 = vld [vmem:[%s6916_s5 + $0x520] sm:$0xff] }
 0x21c   :  { %2312 = vmatpush2.msra.mxu0 %v3592_v51  ;;  %2099 = vmatprep.subr.mxu1 %v3535_v57  ;;  %v3698_v16 = vld [vmem:[%s6916_s5 + $0xae0] sm:$0xff]  ;;  %v3513_v51 = vld [vmem:[%s6916_s5 + $0x518] sm:$0xff]  ;;  %v2187_v57 = vrot.slane %v2163_v54, 3  ;;  %v2590_v54 = vrot.slane %v5780_v42, 5 }
 0x21d   :  { %2313 = vmatprep.subr.mxu0 %v3591_v0  ;;  %2100 = vmatpush2.msra.mxu1 %v3534_v1  ;;  %v1952_v0 = vld [vmem:[#allocation3 + $0x48] sm:$0xfc]  ;;  %v2162_v1 = vld [vmem:[#allocation3 + $0x18] sm:$0xf8] }
 0x21e   :  { %2314 = vmatpush2.msra.mxu0 %v3590_v2  ;;  %2101 = vmatprep.subr.mxu1 %v3533_v3  ;;  %v3512_v2 = vld [vmem:[%s6916_s5 + $0x510] sm:$0xff]  ;;  %v2181_v3 = vsel %vm678_vm3, %v2175_v12, %v2180_v35  ;;  %v1956_v12 = vld [vmem:[#allocation3 + $0x18] sm:$0xfc] }
 0x21f   :  { %2315 = vmatprep.subr.mxu0 %v3589_v56  ;;  %2102 = vmatpush2.msra.mxu1 %v3532_v5  ;;  %v2188_v56 = vrot.slane %v5818_v11, 3  ;;  %v3696_v5 = vld [vmem:[%s6916_s5 + $0xad0] sm:$0xff]  ;;  %v1978_v35 = vrot.slane %v1956_v12, 2 }
 0x220   :  { %2316 = vmatpush2.msra.mxu0 %v3588_v8  ;;  %2103 = vmatprep.subr.mxu1 %v3531_v10  ;;  %v1955_v8 = vld [vmem:[#allocation3 + $0x20] sm:$0x3]  ;;  %v2165_v10 = vld [vmem:[#allocation3 + $0x10] sm:$0x7] }
 0x221   :  { %2317 = vmatprep.subr.mxu0 %v3587_v13  ;;  %2104 = vmatpush2.msra.mxu1 %v3530_v41  ;;  %v3511_v13 = vld [vmem:[%s6916_s5 + $0x508] sm:$0xff]  ;;  %v3612_v12 = vld [vmem:[%s6916_s5 + $0x830] sm:$0xff] }
 0x222   :  { %2318 = vmatpush2.msra.mxu0 %v3586_v14  ;;  %2105 = vmatprep.subr.mxu1 %v3529_v15  ;;  %v3695_v41 = vld [vmem:[%s6916_s5 + $0xac8] sm:$0xff]  ;;  %v1968_v14 = vrot.slane %v1952_v0, 2  ;;  %v2184_v15 = vrot.slane %v2162_v1, 3  ;;  %v3629_v0 = vld [vmem:[%s6916_s5 + $0x8b8] sm:$0xff] }
 0x223   :  { %2319 = vmatprep.subr.mxu0 %v3585_v17  ;;  %2106 = vmatpush2.msra.mxu1 %v3528_v18  ;;  %v2189_v17 = vsel %vm678_vm3, %v2187_v57, %v2188_v56  ;;  %v3510_v18 = vld [vmem:[%s6916_s5 + $0x500] sm:$0xff]  ;;  %v1979_v57 = vrot.slane %v5799_v61, 2  ;;  %v1958_v1 = vld [vmem:[#allocation3 + $0x58] sm:$0x3] }
 0x224   :  { %2320 = vmatpush2.msra.mxu0 %v3584_v47  ;;  %2107 = vmatprep.subr.mxu1 %v3527_v58  ;;  %v3694_v47 = vld [vmem:[%s6916_s5 + $0xac0] sm:$0xff]  ;;  %v1969_v58 = vrot.slane %v5775_v33, 2 }
 0x225   :  { %2321 = vmatprep.subr.mxu0 %v3583_v63  ;;  %2108 = vmatpush2.msra.mxu1 %v3526_v25  ;;  %v2185_v63 = vrot.slane %v5799_v61, 3  ;;  %v3637_v25 = vld [vmem:[%s6916_s5 + $0x8f8] sm:$0xff]  ;;  %v3684_v61 = vld [vmem:[%s6916_s5 + $0xa70] sm:$0xff] }
 0x226   :  { %2322 = vmatpush2.msra.mxu0 %v3582_v19  ;;  %2109 = vmatprep.subr.mxu1 %v3525_v6  ;;  %v1976_v19 = vrot.slane %v1955_v8, 2  ;;  %v2192_v6 = vrot.slane %v2165_v10, 3  ;;  %v1970_v33 = vsel %vm471_vm2, %v1968_v14, %v1969_v58  ;;  %v3627_v8 = vld [vmem:[%s6916_s5 + $0x8a8] sm:$0xff]  ;;  %v3682_v14 = vld [vmem:[%s6916_s5 + $0xa60] sm:$0xff] }
 0x227   :  { %2323 = vmatprep.subr.mxu0 %v3581_v20  ;;  %2110 = vmatpush2.msra.mxu1 %v3524_v21  ;;  %v3693_v20 = vld [vmem:[%s6916_s5 + $0xab8] sm:$0xff]  ;;  %v1954_v21 = vld [vmem:[#allocation3 + $0x8] sm:$0x3] }
 0x228   :  { %2324 = vmatpush2.msra.mxu0 %v3580_v22  ;;  %2111 = vmatprep.subr.mxu1 %v3523_v23  ;;  %v2164_v22 = vld [vmem:[#allocation3 + $0x58] sm:$0x7]  ;;  %v2186_v23 = vsel %vm678_vm3, %v2184_v15, %v2185_v63  ;;  %v1977_v26 = vsel %vm471_vm2, %v1972_v4, %v1976_v19  ;;  %v3690_v4 = vld [vmem:[%s6916_s5 + $0xaa0] sm:$0xff]  ;;  %v3683_v10 = vld [vmem:[%s6916_s5 + $0xa68] sm:$0xff] }
 0x229   :  { %2325 = vmatprep.subr.mxu0 %v3579_v24  ;;  %2112 = vmatpush2.msra.mxu1 %v3522_v27  ;;  %v3636_v24 = vld [vmem:[%s6916_s5 + $0x8f0] sm:$0xff]  ;;  %v2190_v37 = vrot.slane %v2164_v22, 3  ;;  %v3625_v15 = vld [vmem:[%s6916_s5 + $0x898] sm:$0xff]  ;;  %v3623_v19 = vld [vmem:[%s6916_s5 + $0x888] sm:$0xff] }
 0x22a   :  { %2326 = vmatpush2.msra.mxu0 %v3578_v28  ;;  %2113 = vmatprep.subr.mxu1 %v3521_v30  ;;  %v3692_v27 = vld [vmem:[%s6916_s5 + $0xab0] sm:$0xff]  ;;  %v1957_v28 = vld [vmem:[#allocation3 + $0x40] sm:$0xfc]  ;;  %v2193_v30 = vsel %vm678_vm3, %v2188_v56, %v2192_v6  ;;  %v3679_v6 = vld [vmem:[%s6916_s5 + $0xa48] sm:$0xff] }
 0x22b   :  { %2327 = vmatprep.subr.mxu0 %v3577_v32  ;;  %2114 = vmatpush2.msra.mxu1 %v3520_v34  ;;  %v3635_v32 = vld [vmem:[%s6916_s5 + $0x8e8] sm:$0xff]  ;;  %v1981_v43 = vrot.slane %v1957_v28, 2  ;;  %v2191_v53 = vsel %vm678_vm3, %v2185_v63, %v2190_v37  ;;  %v2365_v56 = vld [vmem:[#allocation3] sm:$0xf0]  ;;  %v2384_v63 = vrot.slane %v5780_v42, 4  ;;  %v3616_v37 = vld [vmem:[%s6916_s5 + $0x850] sm:$0xff] }
 0x22c   :  { %2328 = vmatpush2.msra.mxu0 %v3576_v29  ;;  %2115 = vmatprep.subr.mxu1 %v3519_v38  ;;  %v3691_v34 = vld [vmem:[%s6916_s5 + $0xaa8] sm:$0xff]  ;;  %v1974_v29 = vrot.slane %v1954_v21, 2  ;;  %v2571_v38 = vld [vmem:[#allocation3] sm:$0xe0]  ;;  %v3761_v42 = vld [vmem:[%s6916_s5 + $0xcd8] sm:$0xff] }
 0x22d   :  { %2329 = vmatprep.subr.mxu0 %v3575_v40  ;;  %2116 = vmatpush2.msra.mxu1 %v3518_v45  ;;  %v3634_v40 = vld [vmem:[%s6916_s5 + $0x8e0] sm:$0xff]  ;;  %v3633_v45 = vld [vmem:[%s6916_s5 + $0x8d8] sm:$0xff]  ;;  %v3619_v28 = vld [vmem:[%s6916_s5 + $0x868] sm:$0xff] }
 0x22e   :  { %2330 = vmatpush2.msra.mxu0 %v3574_v48  ;;  %2117 = vmatprep.subr.mxu1 %v3517_v49  ;;  %v3689_v48 = vld [vmem:[%s6916_s5 + $0xa98] sm:$0xff]  ;;  %v2589_v49 = vrot.slane %v2571_v38, 5  ;;  %v1975_v50 = vsel %vm471_vm2, %v1969_v58, %v1974_v29  ;;  %v3622_v21 = vld [vmem:[%s6916_s5 + $0x880] sm:$0xff]  ;;  %v3672_v38 = vld [vmem:[%s6916_s5 + $0xa10] sm:$0xff] }
 0x22f   :  { %2332 = vmatmul.mubr.f32.vlgmr.msra.gmra.mxu0 %v2176_v39  ;;  %2679 = vmatprep.subr.mxu0 %v3701_v55  ;;  %v1982_v55 = vrot.slane %v5818_v11, 2  ;;  %v1959_v39 = vld [vmem:[#allocation3 + $0x10] sm:$0x3]  ;;  %v3631_v11 = vld [vmem:[%s6916_s5 + $0x8c8] sm:$0xff]  ;;  %v3678_v22 = vld [vmem:[%s6916_s5 + $0xa40] sm:$0xff] }
 0x230   :  { %2118 = vmatpush2.msra.mxu1 %v3516_v31  ;;  %2337 = vmatprep.mubr.f32.mxu0 %v2183_v60  ;;  %v3632_v31 = vld [vmem:[%s6916_s5 + $0x8d0] sm:$0xff]  ;;  %v2591_v60 = vsel %vm54_vm0, %v2589_v49, %v2590_v54  ;;  %v3673_v29 = vld [vmem:[%s6916_s5 + $0xa18] sm:$0xff] }
 0x231   :  { %2680 = vmatpush1.msra.mxu0 %v3700_v52  ;;  %2119 = vmatprep.subr.mxu1 %v3515_v9  ;;  %v3688_v52 = vld [vmem:[%s6916_s5 + $0xa90] sm:$0xff]  ;;  %v1983_v9 = vsel %vm471_vm2, %v1981_v43, %v1982_v55  ;;  %v3614_v43 = vld [vmem:[%s6916_s5 + $0x840] sm:$0xff]  ;;  %v3733_v49 = vld [vmem:[%s6916_s5 + $0xbf8] sm:$0xff] }
 0x232   :  { %2681 = vmatprep.subr.mxu0 %v3699_v59  ;;  %2120 = vmatpush2.msra.mxu1 %v3514_v62  ;;  %v3687_v59 = vld [vmem:[%s6916_s5 + $0xa88] sm:$0xff]  ;;  %v3630_v62 = vld [vmem:[%s6916_s5 + $0x8c0] sm:$0xff] }
 0x233   :  { %2682 = vmatpush1.msra.mxu0 %v3698_v16  ;;  %2121 = vmatprep.subr.mxu1 %v3513_v51  ;;  %v3686_v16 = vld [vmem:[%s6916_s5 + $0xa80] sm:$0xff]  ;;  %v1986_v51 = vrot.slane %v1959_v39, 2 }
 0x234   :  { %2338 = vmatmul.mubr.f32.gmra.mxu0 %v2181_v3  ;;  %2683 = vmatprep.subr.mxu0 %v3697_v46  ;;  %v3685_v46 = vld [vmem:[%s6916_s5 + $0xa78] sm:$0xff]  ;;  %v3628_v3 = vld [vmem:[%s6916_s5 + $0x8b0] sm:$0xff]  ;;  %v3730_v39 = vld [vmem:[%s6916_s5 + $0xbe0] sm:$0xff] }
 0x235   :  { %2122 = vmatpush2.msra.mxu1 %v3512_v2  ;;  %2343 = vmatprep.mubr.f32.mxu0 %v2189_v17  ;;  %v1980_v2 = vsel %vm471_vm2, %v1978_v35, %v1979_v57  ;;  %v2383_v17 = vrot.slane %v2365_v56, 4  ;;  %v3607_v35 = vld [vmem:[%s6916_s5 + $0x808] sm:$0xff]  ;;  %v3665_v56 = vld [vmem:[%s6916_s5 + $0x9d8] sm:$0xff] }
 0x236   :  { %2684 = vmatpush1.msra.mxu0 %v3696_v5  ;;  %2123 = vmatprep.subr.mxu1 %v3511_v13  ;;  %v1987_v5 = vsel %vm471_vm2, %v1982_v55, %v1986_v51  ;;  %v1984_v13 = vrot.slane %v1958_v1, 2  ;;  %v3731_v55 = vld [vmem:[%s6916_s5 + $0xbe8] sm:$0xff]  ;;  %v3669_v51 = vld [vmem:[%s6916_s5 + $0x9f8] sm:$0xff]  ;;  %v3724_v1 = vld [vmem:[%s6916_s5 + $0xbb0] sm:$0xff] }
 0x237   :  { %2685 = vmatprep.subr.mxu0 %v3695_v41  ;;  %2124 = vmatpush2.msra.mxu1 %v3510_v18  ;;  %v3626_v41 = vld [vmem:[%s6916_s5 + $0x8a0] sm:$0xff]  ;;  %v3681_v18 = vld [vmem:[%s6916_s5 + $0xa58] sm:$0xff] }
 0x238   :  { %2686 = vmatpush1.msra.mxu0 %v3694_v47  ;;  %2126 = vmatmul.mubr.f32.vlgmr.msra.gmra.mxu1 %v1970_v33  ;;  %v3624_v47 = vld [vmem:[%s6916_s5 + $0x890] sm:$0xff]  ;;  %v1985_v58 = vsel %vm471_vm2, %v1979_v57, %v1984_v13  ;;  %v3621_v33 = vld [vmem:[%s6916_s5 + $0x878] sm:$0xff]  ;;  %v3663_v13 = vld [vmem:[%s6916_s5 + $0x9c8] sm:$0xff] }
 0x239   :  { %2344 = vmatmul.mubr.f32.gmra.mxu0 %v2186_v23  ;;  %2473 = vmatprep.subr.mxu1 %v3637_v25  ;;  %v3680_v25 = vld [vmem:[%s6916_s5 + $0xa50] sm:$0xff]  ;;  %v3677_v23 = vld [vmem:[%s6916_s5 + $0xa38] sm:$0xff] }
 0x23a   :  { %2687 = vmatprep.subr.mxu0 %v3693_v20  ;;  %2131 = vmatprep.mubr.f32.mxu1 %v1977_v26  ;;  %v2385_v20 = vsel %vm885_vm4, %v2383_v17, %v2384_v63  ;;  %v3675_v26 = vld [vmem:[%s6916_s5 + $0xa28] sm:$0xff]  ;;  %v3725_v57 = vld [vmem:[%s6916_s5 + $0xbb8] sm:$0xff] }
 0x23b   :  { %2349 = vmatprep.mubr.f32.mxu0 %v2193_v30  ;;  %2474 = vmatpush1.msra.mxu1 %v3636_v24  ;;  %v3620_v24 = vld [vmem:[%s6916_s5 + $0x870] sm:$0xff]  ;;  %v3618_v30 = vld [vmem:[%s6916_s5 + $0x860] sm:$0xff]  ;;  %v3661_v17 = vld [vmem:[%s6916_s5 + $0x9b8] sm:$0xff] }
 0x23c   :  { %2688 = vmatpush1.msra.mxu0 %v3692_v27  ;;  %2475 = vmatprep.subr.mxu1 %v3635_v32  ;;  %v3676_v27 = vld [vmem:[%s6916_s5 + $0xa30] sm:$0xff]  ;;  %v3674_v32 = vld [vmem:[%s6916_s5 + $0xa20] sm:$0xff] }
 0x23d   :  { %2689 = vmatprep.subr.mxu0 %v3691_v34  ;;  %2476 = vmatpush1.msra.mxu1 %v3634_v40  ;;  %v3617_v34 = vld [vmem:[%s6916_s5 + $0x858] sm:$0xff]  ;;  %v3615_v40 = vld [vmem:[%s6916_s5 + $0x848] sm:$0xff] }
 0x23e   :  { %2690 = vmatpush1.msra.mxu0 %v3690_v4  ;;  %2132 = vmatmul.mubr.f32.gmra.mxu1 %v1975_v50  ;;  %v3671_v4 = vld [vmem:[%s6916_s5 + $0xa08] sm:$0xff]  ;;  %v3732_v50 = vld [vmem:[%s6916_s5 + $0xbf0] sm:$0xff] }
 0x23f   :  { %2350 = vmatmul.mubr.f32.gmra.mxu0 %v2191_v53  ;;  %2477 = vmatprep.subr.mxu1 %v3633_v45  ;;  %v3670_v45 = vld [vmem:[%s6916_s5 + $0xa00] sm:$0xff]  ;;  %v3611_v53 = vld [vmem:[%s6916_s5 + $0x828] sm:$0xff] }
 0x240   :  { %2691 = vmatprep.subr.mxu0 %v3689_v48  ;;  %2137 = vmatprep.mubr.f32.mxu1 %v1983_v9  ;;  %v3613_v48 = vld [vmem:[%s6916_s5 + $0x838] sm:$0xff] }
 0x241   :  { %2478 = vmatpush1.msra.mxu1 %v3632_v31  ;;  %2692 = vmatpush1.msra.mxu0 %v3688_v52  ;;  %v3610_v31 = vld [vmem:[%s6916_s5 + $0x820] sm:$0xff]  ;;  %v3609_v52 = vld [vmem:[%s6916_s5 + $0x818] sm:$0xff] }
 0x242   :  { %2743 = vmatprep.mubr.f32.mxu0 %v2591_v60  ;;  %2479 = vmatprep.subr.mxu1 %v3631_v11  ;;  %v3729_v9 = vld [vmem:[%s6916_s5 + $0xbd8] sm:$0xff]  ;;  %v3608_v11 = vld [vmem:[%s6916_s5 + $0x810] sm:$0xff]  ;;  %v3727_v60 = vld [vmem:[%s6916_s5 + $0xbc8] sm:$0xff] }
 0x243   :  { %2693 = vmatprep.subr.mxu0 %v3687_v59  ;;  %2480 = vmatpush1.msra.mxu1 %v3630_v62  ;;  %v3728_v59 = vld [vmem:[%s6916_s5 + $0xbd0] sm:$0xff]  ;;  %v3606_v62 = vld [vmem:[%s6916_s5 + $0x800] sm:$0xff] }
 0x244   :  { %2694 = vmatpush1.msra.mxu0 %v3686_v16  ;;  %2138 = vmatmul.mubr.f32.gmra.mxu1 %v1980_v2  ;;  %v3726_v16 = vld [vmem:[%s6916_s5 + $0xbc0] sm:$0xff]  ;;  %v3723_v2 = vld [vmem:[%s6916_s5 + $0xba8] sm:$0xff] }
 0x245   :  { %2481 = vmatprep.subr.mxu1 %v3629_v0  ;;  %2695 = vmatprep.subr.mxu0 %v3685_v46  ;;  %v3668_v0 = vld [vmem:[%s6916_s5 + $0x9f0] sm:$0xff]  ;;  %v3667_v46 = vld [vmem:[%s6916_s5 + $0x9e8] sm:$0xff] }
 0x246   :  { %2143 = vmatprep.mubr.f32.mxu1 %v1987_v5  ;;  %2482 = vmatpush1.msra.mxu1 %v3628_v3  ;;  %v3666_v3 = vld [vmem:[%s6916_s5 + $0x9e0] sm:$0xff]  ;;  %v3721_v5 = vld [vmem:[%s6916_s5 + $0xb98] sm:$0xff] }
 0x247   :  { %2696 = vmatpush1.msra.mxu0 %v3684_v61  ;;  %2483 = vmatprep.subr.mxu1 %v3627_v8  ;;  %v3722_v61 = vld [vmem:[%s6916_s5 + $0xba0] sm:$0xff]  ;;  %v3664_v8 = vld [vmem:[%s6916_s5 + $0x9d0] sm:$0xff] }
 0x248   :  { %2697 = vmatprep.subr.mxu0 %v3683_v10  ;;  %2484 = vmatpush1.msra.mxu1 %v3626_v41  ;;  %v3720_v10 = vld [vmem:[%s6916_s5 + $0xb90] sm:$0xff]  ;;  %v3719_v41 = vld [vmem:[%s6916_s5 + $0xb88] sm:$0xff] }
 0x249   :  { %2698 = vmatpush1.msra.mxu0 %v3682_v14  ;;  %2144 = vmatmul.mubr.f32.gmra.mxu1 %v1985_v58  ;;  %v3662_v14 = vld [vmem:[%s6916_s5 + $0x9c0] sm:$0xff]  ;;  %v3716_v58 = vld [vmem:[%s6916_s5 + $0xb70] sm:$0xff] }
 0x24a   :  { %2485 = vmatprep.subr.mxu1 %v3625_v15  ;;  %2699 = vmatprep.subr.mxu0 %v3681_v18  ;;  %v3718_v15 = vld [vmem:[%s6916_s5 + $0xb80] sm:$0xff]  ;;  %v3717_v18 = vld [vmem:[%s6916_s5 + $0xb78] sm:$0xff] }
 0x24b   :  { %2486 = vmatpush1.msra.mxu1 %v3624_v47  ;;  %2537 = vmatprep.mubr.f32.mxu1 %v2385_v20  ;;  %v3660_v47 = vld [vmem:[%s6916_s5 + $0x9b0] sm:$0xff]  ;;  %v3714_v20 = vld [vmem:[%s6916_s5 + $0xb60] sm:$0xff] }
 0x24c   :  { %2700 = vmatpush1.msra.mxu0 %v3680_v25  ;;  %2487 = vmatprep.subr.mxu1 %v3623_v19  ;;  %v3659_v25 = vld [vmem:[%s6916_s5 + $0x9a8] sm:$0xff] }
 0x24d   :  { %2701 = vmatprep.subr.mxu0 %v3679_v6  ;;  %2488 = vmatpush1.msra.mxu1 %v3622_v21  ;;  %v3715_v19 = vld [vmem:[%s6916_s5 + $0xb68] sm:$0xff]  ;;  %v3658_v6 = vld [vmem:[%s6916_s5 + $0x9a0] sm:$0xff]  ;;  %v3657_v21 = vld [vmem:[%s6916_s5 + $0x998] sm:$0xff] }
 0x24e   :  { %2702 = vmatpush1.msra.mxu0 %v3678_v22  ;;  %2489 = vmatprep.subr.mxu1 %v3621_v33  ;;  %v3713_v22 = vld [vmem:[%s6916_s5 + $0xb58] sm:$0xff]  ;;  %v3656_v33 = vld [vmem:[%s6916_s5 + $0x990] sm:$0xff] }
 0x24f   :  { %2703 = vmatprep.subr.mxu0 %v3677_v23  ;;  %2490 = vmatpush1.msra.mxu1 %v3620_v24  ;;  %v3712_v23 = vld [vmem:[%s6916_s5 + $0xb50] sm:$0xff]  ;;  %v3655_v24 = vld [vmem:[%s6916_s5 + $0x988] sm:$0xff] }
 0x250   :  { %2704 = vmatpush1.msra.mxu0 %v3676_v27  ;;  %2491 = vmatprep.subr.mxu1 %v3619_v28  ;;  %v3711_v27 = vld [vmem:[%s6916_s5 + $0xb48] sm:$0xff]  ;;  %v3654_v28 = vld [vmem:[%s6916_s5 + $0x980] sm:$0xff] }
 0x251   :  { %2705 = vmatprep.subr.mxu0 %v3675_v26  ;;  %2492 = vmatpush1.msra.mxu1 %v3618_v30  ;;  %v3710_v26 = vld [vmem:[%s6916_s5 + $0xb40] sm:$0xff]  ;;  %v3653_v30 = vld [vmem:[%s6916_s5 + $0x978] sm:$0xff] }
 0x252   :  { %2706 = vmatpush1.msra.mxu0 %v3674_v32  ;;  %2493 = vmatprep.subr.mxu1 %v3617_v34  ;;  %v3709_v32 = vld [vmem:[%s6916_s5 + $0xb38] sm:$0xff]  ;;  %v3652_v34 = vld [vmem:[%s6916_s5 + $0x970] sm:$0xff] }
 0x253   :  { %2707 = vmatprep.subr.mxu0 %v3673_v29  ;;  %2494 = vmatpush1.msra.mxu1 %v3616_v37  ;;  %v3708_v29 = vld [vmem:[%s6916_s5 + $0xb30] sm:$0xff]  ;;  %v3651_v37 = vld [vmem:[%s6916_s5 + $0x968] sm:$0xff] }
 0x254   :  { %2708 = vmatpush1.msra.mxu0 %v3672_v38  ;;  %2495 = vmatprep.subr.mxu1 %v3615_v40  ;;  %v3707_v38 = vld [vmem:[%s6916_s5 + $0xb28] sm:$0xff]  ;;  %v3650_v40 = vld [vmem:[%s6916_s5 + $0x960] sm:$0xff] }
 0x255   :  { %2709 = vmatprep.subr.mxu0 %v3671_v4  ;;  %2496 = vmatpush1.msra.mxu1 %v3614_v43  ;;  %v3706_v4 = vld [vmem:[%s6916_s5 + $0xb20] sm:$0xff]  ;;  %v2570_v43 = vld [vmem:[#allocation3 + $0x48] sm:$0xe0] }
 0x256   :  { %2710 = vmatpush1.msra.mxu0 %v3670_v45  ;;  %2497 = vmatprep.subr.mxu1 %v3613_v48  ;;  %v3649_v45 = vld [vmem:[%s6916_s5 + $0x958] sm:$0xff] }
 0x257   :  { %2711 = vmatprep.subr.mxu0 %v3733_v49  ;;  %2498 = vmatpush1.msra.mxu1 %v3612_v12  ;;  %v3705_v48 = vld [vmem:[%s6916_s5 + $0xb18] sm:$0xff]  ;;  %v2573_v49 = vld [vmem:[#allocation3 + $0x20] sm:$0x1f]  ;;  %v3648_v12 = vld [vmem:[%s6916_s5 + $0x950] sm:$0xff] }
 0x258   :  { %2712 = vmatpush2.msra.mxu0 %v3732_v50  ;;  %2499 = vmatprep.subr.mxu1 %v3611_v53  ;;  %v3704_v50 = vld [vmem:[%s6916_s5 + $0xb10] sm:$0xff]  ;;  %v3647_v53 = vld [vmem:[%s6916_s5 + $0x948] sm:$0xff] }
 0x259   :  { %2713 = vmatprep.subr.mxu0 %v3731_v55  ;;  %2500 = vmatpush1.msra.mxu1 %v3610_v31  ;;  %v3703_v55 = vld [vmem:[%s6916_s5 + $0xb08] sm:$0xff]  ;;  %v2586_v31 = vrot.slane %v2570_v43, 5 }
 0x25a   :  { %2714 = vmatpush2.msra.mxu0 %v3730_v39  ;;  %2501 = vmatprep.subr.mxu1 %v3609_v52  ;;  %v3646_v39 = vld [vmem:[%s6916_s5 + $0x940] sm:$0xff] }
 0x25b   :  { %2715 = vmatprep.subr.mxu0 %v3729_v9  ;;  %2502 = vmatpush1.msra.mxu1 %v3608_v11  ;;  %v3702_v52 = vld [vmem:[%s6916_s5 + $0xb00] sm:$0xff]  ;;  %v2594_v9 = vrot.slane %v2573_v49, 5  ;;  %v2572_v11 = vld [vmem:[#allocation3 + $0x8] sm:$0x1f] }
 0x25c   :  { %2716 = vmatpush2.msra.mxu0 %v3728_v59  ;;  %2503 = vmatprep.subr.mxu1 %v3607_v35  ;;  %v3645_v59 = vld [vmem:[%s6916_s5 + $0x938] sm:$0xff]  ;;  %v6592_v35 = vld [vmem:[#allocation3 + $0x50] sm:$0xff]  ;;  %v3759_v49 = vld [vmem:[%s6916_s5 + $0xcc8] sm:$0xff] }
 0x25d   :  { %2717 = vmatprep.subr.mxu0 %v3727_v60  ;;  %2504 = vmatpush1.msra.mxu1 %v3606_v62  ;;  %v2587_v60 = vrot.slane %v6592_v35, 5  ;;  %v2575_v62 = vld [vmem:[#allocation3 + $0x40] sm:$0xe0] }
 0x25e   :  { %2718 = vmatpush2.msra.mxu0 %v3726_v16  ;;  %2505 = vmatprep.subr.mxu1 %v3669_v51  ;;  %v3644_v16 = vld [vmem:[%s6916_s5 + $0x930] sm:$0xff] }
 0x25f   :  { %2719 = vmatprep.subr.mxu0 %v3725_v57  ;;  %2506 = vmatpush2.msra.mxu1 %v3668_v0  ;;  %v2588_v51 = vsel %vm54_vm0, %v2586_v31, %v2587_v60  ;;  %v3643_v57 = vld [vmem:[%s6916_s5 + $0x928] sm:$0xff]  ;;  %v2592_v0 = vrot.slane %v2572_v11, 5  ;;  %v2370_v31 = vld [vmem:[#allocation3 + $0x58] sm:$0xf]  ;;  %v3756_v11 = vld [vmem:[%s6916_s5 + $0xcb0] sm:$0xff] }
 0x260   :  { %2720 = vmatpush2.msra.mxu0 %v3724_v1  ;;  %2507 = vmatprep.subr.mxu1 %v3667_v46  ;;  %v2595_v1 = vsel %vm54_vm0, %v2590_v54, %v2594_v9  ;;  %v3642_v46 = vld [vmem:[%s6916_s5 + $0x920] sm:$0xff]  ;;  %v6614_v54 = vld [vmem:[#allocation3 + $0x28] sm:$0xff] }
 0x261   :  { %2721 = vmatprep.subr.mxu0 %v3723_v2  ;;  %2508 = vmatpush2.msra.mxu1 %v3666_v3  ;;  %v2599_v2 = vrot.slane %v2575_v62, 5  ;;  %v2364_v3 = vld [vmem:[#allocation3 + $0x48] sm:$0xf0]  ;;  %v2394_v43 = vrot.slane %v6614_v54, 4  ;;  %v2777_v9 = vld [vmem:[#allocation3] sm:$0xc0] }
 0x262   :  { %2722 = vmatpush2.msra.mxu0 %v3722_v61  ;;  %2509 = vmatprep.subr.mxu1 %v3665_v56  ;;  %v2574_v61 = vld [vmem:[#allocation3 + $0x18] sm:$0xe0]  ;;  %v2396_v62 = vrot.slane %v2370_v31, 4  ;;  %v3774_v31 = vld [vmem:[%s6916_s5 + $0xd40] sm:$0xff] }
 0x263   :  { %2723 = vmatprep.subr.mxu0 %v3721_v5  ;;  %2510 = vmatpush2.msra.mxu1 %v3664_v8  ;;  %v3641_v56 = vld [vmem:[%s6916_s5 + $0x918] sm:$0xff]  ;;  %v2367_v5 = vld [vmem:[#allocation3 + $0x20] sm:$0xf]  ;;  %v3640_v8 = vld [vmem:[%s6916_s5 + $0x910] sm:$0xff] }
 0x264   :  { %2724 = vmatpush2.msra.mxu0 %v3720_v10  ;;  %2511 = vmatprep.subr.mxu1 %v3663_v13  ;;  %v2600_v10 = vrot.slane %v6614_v54, 5  ;;  %v2577_v13 = vld [vmem:[#allocation3 + $0x10] sm:$0x1f] }
 0x265   :  { %2725 = vmatprep.subr.mxu0 %v3719_v41  ;;  %2512 = vmatpush2.msra.mxu1 %v3662_v14  ;;  %v2593_v41 = vsel %vm54_vm0, %v2587_v60, %v2592_v0  ;;  %v3639_v14 = vld [vmem:[%s6916_s5 + $0x908] sm:$0xff]  ;;  %v3753_v0 = vld [vmem:[%s6916_s5 + $0xc98] sm:$0xff] }
 0x266   :  { %2726 = vmatpush2.msra.mxu0 %v3718_v15  ;;  %2513 = vmatprep.subr.mxu1 %v3661_v17  ;;  %v2380_v15 = vrot.slane %v2364_v3, 4  ;;  %v2596_v17 = vrot.slane %v2574_v61, 5  ;;  %v3755_v60 = vld [vmem:[%s6916_s5 + $0xca8] sm:$0xff] }
 0x267   :  { %2727 = vmatprep.subr.mxu0 %v3717_v18  ;;  %2514 = vmatpush2.msra.mxu1 %v3660_v47  ;;  %v2601_v18 = vsel %vm54_vm0, %v2599_v2, %v2600_v10  ;;  %v3638_v47 = vld [vmem:[%s6916_s5 + $0x900] sm:$0xff]  ;;  %v3751_v61 = vld [vmem:[%s6916_s5 + $0xc88] sm:$0xff] }
 0x268   :  { %2728 = vmatpush2.msra.mxu0 %v3716_v58  ;;  %2515 = vmatprep.subr.mxu1 %v3659_v25  ;;  %v2388_v58 = vrot.slane %v2367_v5, 4  ;;  %v2576_v25 = vld [vmem:[#allocation3 + $0x58] sm:$0x1f]  ;;  %v3750_v5 = vld [vmem:[%s6916_s5 + $0xc80] sm:$0xff] }
 0x269   :  { %2729 = vmatprep.subr.mxu0 %v3715_v19  ;;  %2516 = vmatpush2.msra.mxu1 %v3658_v6  ;;  %v2381_v19 = vrot.slane %v6592_v35, 4  ;;  %v6626_v6 = vld [vmem:[#allocation3 + $0x38] sm:$0xff] }
 0x26a   :  { %2730 = vmatpush2.msra.mxu0 %v3714_v20  ;;  %2517 = vmatprep.subr.mxu1 %v3657_v21  ;;  %v2597_v20 = vrot.slane %v6626_v6, 5  ;;  %v2604_v21 = vrot.slane %v2577_v13, 5  ;;  %v3747_v13 = vld [vmem:[%s6916_s5 + $0xc68] sm:$0xff] }
 0x26b   :  { %2731 = vmatprep.subr.mxu0 %v3713_v22  ;;  %2518 = vmatpush2.msra.mxu1 %v3656_v33  ;;  %v2366_v22 = vld [vmem:[#allocation3 + $0x8] sm:$0xf]  ;;  %v3765_v33 = vld [vmem:[%s6916_s5 + $0xcf8] sm:$0xff] }
 0x26c   :  { %2732 = vmatpush2.msra.mxu0 %v3712_v23  ;;  %2519 = vmatprep.subr.mxu1 %v3655_v24  ;;  %v2369_v23 = vld [vmem:[#allocation3 + $0x40] sm:$0xf0]  ;;  %v2382_v24 = vsel %vm885_vm4, %v2380_v15, %v2381_v19  ;;  %v3744_v15 = vld [vmem:[%s6916_s5 + $0xc50] sm:$0xff] }
 0x26d   :  { %2733 = vmatprep.subr.mxu0 %v3711_v27  ;;  %2520 = vmatpush2.msra.mxu1 %v3654_v28  ;;  %v2598_v27 = vsel %vm54_vm0, %v2596_v17, %v2597_v20  ;;  %v3764_v28 = vld [vmem:[%s6916_s5 + $0xcf0] sm:$0xff]  ;;  %v3743_v17 = vld [vmem:[%s6916_s5 + $0xc48] sm:$0xff] }
 0x26e   :  { %2734 = vmatpush2.msra.mxu0 %v3710_v26  ;;  %2521 = vmatprep.subr.mxu1 %v3653_v30  ;;  %v2602_v26 = vrot.slane %v2576_v25, 5  ;;  %v2389_v30 = vsel %vm885_vm4, %v2384_v63, %v2388_v58  ;;  %v2371_v63 = vld [vmem:[#allocation3 + $0x10] sm:$0xf]  ;;  %v3739_v25 = vld [vmem:[%s6916_s5 + $0xc28] sm:$0xff] }
 0x26f   :  { %2735 = vmatprep.subr.mxu0 %v3709_v32  ;;  %2522 = vmatpush2.msra.mxu1 %v3652_v34  ;;  %v3763_v32 = vld [vmem:[%s6916_s5 + $0xce8] sm:$0xff]  ;;  %v2386_v34 = vrot.slane %v2366_v22, 4  ;;  %v3740_v58 = vld [vmem:[%s6916_s5 + $0xc30] sm:$0xff] }
 0x270   :  { %2736 = vmatpush2.msra.mxu0 %v3708_v29  ;;  %2523 = vmatprep.subr.mxu1 %v3651_v37  ;;  %v2605_v29 = vsel %vm54_vm0, %v2600_v10, %v2604_v21  ;;  %v3762_v37 = vld [vmem:[%s6916_s5 + $0xce0] sm:$0xff]  ;;  %v3748_v10 = vld [vmem:[%s6916_s5 + $0xc70] sm:$0xff]  ;;  %v3735_v22 = vld [vmem:[%s6916_s5 + $0xc08] sm:$0xff] }
 0x271   :  { %2737 = vmatprep.subr.mxu0 %v3707_v38  ;;  %2524 = vmatpush2.msra.mxu1 %v3650_v40  ;;  %v2393_v38 = vrot.slane %v2369_v23, 4  ;;  %v2368_v40 = vld [vmem:[#allocation3 + $0x18] sm:$0xf0]  ;;  %v3736_v21 = vld [vmem:[%s6916_s5 + $0xc10] sm:$0xff] }
 0x272   :  { %2738 = vmatpush2.msra.mxu0 %v3706_v4  ;;  %2525 = vmatprep.subr.mxu1 %v3649_v45  ;;  %v2603_v4 = vsel %vm54_vm0, %v2597_v20, %v2602_v26  ;;  %v3760_v45 = vld [vmem:[%s6916_s5 + $0xcd0] sm:$0xff]  ;;  %v3737_v20 = vld [vmem:[%s6916_s5 + $0xc18] sm:$0xff] }
 0x273   :  { %2739 = vmatprep.subr.mxu0 %v3705_v48  ;;  %2526 = vmatpush2.msra.mxu1 %v3648_v12  ;;  %v2387_v48 = vsel %vm885_vm4, %v2381_v19, %v2386_v34  ;;  %v2390_v12 = vrot.slane %v2368_v40, 4  ;;  %v3738_v19 = vld [vmem:[%s6916_s5 + $0xc20] sm:$0xff]  ;;  %v3797_v23 = vld [vmem:[%s6916_s5 + $0xdf8] sm:$0xff] }
 0x274   :  { %2740 = vmatpush2.msra.mxu0 %v3704_v50  ;;  %2527 = vmatprep.subr.mxu1 %v3647_v53  ;;  %v2395_v50 = vsel %vm885_vm4, %v2393_v38, %v2394_v43  ;;  %v3758_v53 = vld [vmem:[%s6916_s5 + $0xcc0] sm:$0xff]  ;;  %v3793_v26 = vld [vmem:[%s6916_s5 + $0xdd8] sm:$0xff]  ;;  %v3787_v38 = vld [vmem:[%s6916_s5 + $0xda8] sm:$0xff] }
 0x275   :  { %2741 = vmatprep.subr.mxu0 %v3703_v55  ;;  %2528 = vmatpush2.msra.mxu1 %v3646_v39  ;;  %v2398_v55 = vrot.slane %v2371_v63, 4  ;;  %v2391_v39 = vrot.slane %v6626_v6, 4  ;;  %v3790_v34 = vld [vmem:[%s6916_s5 + $0xdc0] sm:$0xff]  ;;  %v3784_v63 = vld [vmem:[%s6916_s5 + $0xd90] sm:$0xff] }
 0x276   :  { %2742 = vmatpush2.msra.mxu0 %v3702_v52  ;;  %2529 = vmatprep.subr.mxu1 %v3645_v59  ;;  %v3757_v52 = vld [vmem:[%s6916_s5 + $0xcb8] sm:$0xff]  ;;  %v3786_v40 = vld [vmem:[%s6916_s5 + $0xda0] sm:$0xff] }
 0x277   :  { %2744 = vmatmul.mubr.f32.vlgmr.msra.gmra.mxu0 %v2588_v51  ;;  %2530 = vmatpush2.msra.mxu1 %v3644_v16  ;;  %v2392_v59 = vsel %vm885_vm4, %v2390_v12, %v2391_v39  ;;  %v2399_v16 = vsel %vm885_vm4, %v2394_v43, %v2398_v55  ;;  %v3754_v51 = vld [vmem:[%s6916_s5 + $0xca0] sm:$0xff]  ;;  %v2397_v3 = vsel %vm885_vm4, %v2391_v39, %v2396_v62  ;;  %v3775_v55 = vld [vmem:[%s6916_s5 + $0xd48] sm:$0xff]  ;;  %v3773_v39 = vld [vmem:[%s6916_s5 + $0xd38] sm:$0xff] }
 0x278   :  { %2749 = vmatprep.mubr.f32.mxu0 %v2595_v1  ;;  %2531 = vmatprep.subr.mxu1 %v3643_v57  ;;  %v2795_v57 = vrot.slane %v2777_v9, 6  ;;  %v3752_v1 = vld [vmem:[%s6916_s5 + $0xc90] sm:$0xff]  ;;  %v3782_v43 = vld [vmem:[%s6916_s5 + $0xd80] sm:$0xff]  ;;  %v3771_v9 = vld [vmem:[%s6916_s5 + $0xd28] sm:$0xff] }
 0x279   :  { %2532 = vmatpush2.msra.mxu1 %v3642_v46  ;;  %v6684_v46 = vld [vmem:[#allocation3 + $0x30] sm:$0xff]  ;;  %v3778_v12 = vld [vmem:[%s6916_s5 + $0xd60] sm:$0xff] }
 0x27a   :  { %2533 = vmatprep.subr.mxu1 %v3641_v56  ;;  %v2796_v2 = vrot.slane %v6684_v46, 6  ;;  %v2779_v62 = vld [vmem:[#allocation3 + $0x20] sm:$0x3f] }
 0x27b   :  { %2750 = vmatmul.mubr.f32.gmra.mxu0 %v2593_v41  ;;  %2534 = vmatpush2.msra.mxu1 %v3640_v8  ;;  %v3749_v8 = vld [vmem:[%s6916_s5 + $0xc78] sm:$0xff]  ;;  %v3746_v41 = vld [vmem:[%s6916_s5 + $0xc60] sm:$0xff] }
 0x27c   :  { %2755 = vmatprep.mubr.f32.mxu0 %v2601_v18  ;;  %2535 = vmatprep.subr.mxu1 %v3639_v14  ;;  %v2797_v56 = vsel %vm1298_vm5, %v2795_v57, %v2796_v2  ;;  %v3745_v14 = vld [vmem:[%s6916_s5 + $0xc58] sm:$0xff]  ;;  %v3742_v18 = vld [vmem:[%s6916_s5 + $0xc40] sm:$0xff] }
 0x27d   :  { %2536 = vmatpush2.msra.mxu1 %v3638_v47  ;;  %v3741_v47 = vld [vmem:[%s6916_s5 + $0xc38] sm:$0xff] }
 0x27e   :  { %2538 = vmatmul.mubr.f32.vlgmr.msra.gmra.mxu1 %v2382_v24  ;;  %2885 = vmatprep.subr.mxu1 %v3765_v33  ;;  %v3734_v33 = vld [vmem:[%s6916_s5 + $0xc00] sm:$0xff]  ;;  %v3796_v24 = vld [vmem:[%s6916_s5 + $0xdf0] sm:$0xff] }
 0x27f   :  { %2756 = vmatmul.mubr.f32.gmra.mxu0 %v2598_v27  ;;  %2543 = vmatprep.mubr.f32.mxu1 %v2389_v30  ;;  %v3795_v27 = vld [vmem:[%s6916_s5 + $0xde8] sm:$0xff]  ;;  %v3792_v30 = vld [vmem:[%s6916_s5 + $0xdd0] sm:$0xff] }
 0x280   :  { %2761 = vmatprep.mubr.f32.mxu0 %v2605_v29  ;;  %2886 = vmatpush1.msra.mxu1 %v3764_v28  ;;  %v3794_v28 = vld [vmem:[%s6916_s5 + $0xde0] sm:$0xff]  ;;  %v3789_v29 = vld [vmem:[%s6916_s5 + $0xdb8] sm:$0xff] }
 0x281   :  { %2887 = vmatprep.subr.mxu1 %v3763_v32  ;;  %v3791_v32 = vld [vmem:[%s6916_s5 + $0xdc8] sm:$0xff] }
 0x282   :  { %2888 = vmatpush1.msra.mxu1 %v3762_v37  ;;  %v3788_v37 = vld [vmem:[%s6916_s5 + $0xdb0] sm:$0xff] }
 0x283   :  { %2762 = vmatmul.mubr.f32.gmra.mxu0 %v2603_v4  ;;  %2544 = vmatmul.mubr.f32.gmra.mxu1 %v2387_v48  ;;  %v3783_v4 = vld [vmem:[%s6916_s5 + $0xd88] sm:$0xff]  ;;  %v3780_v48 = vld [vmem:[%s6916_s5 + $0xd70] sm:$0xff] }
 0x284   :  { %2889 = vmatprep.subr.mxu1 %v3761_v42  ;;  %2549 = vmatprep.mubr.f32.mxu1 %v2395_v50  ;;  %v3785_v42 = vld [vmem:[%s6916_s5 + $0xd98] sm:$0xff] }
 0x285   :  { %2890 = vmatpush1.msra.mxu1 %v3760_v45  ;;  %v3781_v45 = vld [vmem:[%s6916_s5 + $0xd78] sm:$0xff] }
 0x286   :  { %2891 = vmatprep.subr.mxu1 %v3759_v49  ;;  %v3779_v49 = vld [vmem:[%s6916_s5 + $0xd68] sm:$0xff]  ;;  %v3777_v50 = vld [vmem:[%s6916_s5 + $0xd58] sm:$0xff] }
 0x287   :  { %2892 = vmatpush1.msra.mxu1 %v3758_v53  ;;  %v3776_v53 = vld [vmem:[%s6916_s5 + $0xd50] sm:$0xff] }
 0x288   :  { %2550 = vmatmul.mubr.f32.gmra.mxu1 %v2392_v59  ;;  %2893 = vmatprep.subr.mxu1 %v3757_v52  ;;  %v3772_v52 = vld [vmem:[%s6916_s5 + $0xd30] sm:$0xff]  ;;  %v2776_v59 = vld [vmem:[#allocation3 + $0x48] sm:$0xc0] }
 0x289   :  { %2555 = vmatprep.mubr.f32.mxu1 %v2399_v16  ;;  %2894 = vmatpush1.msra.mxu1 %v3756_v11  ;;  %v3770_v11 = vld [vmem:[%s6916_s5 + $0xd20] sm:$0xff]  ;;  %v3768_v16 = vld [vmem:[%s6916_s5 + $0xd10] sm:$0xff]  ;;  %v2792_v57 = vrot.slane %v2776_v59, 6 }
 0x28a   :  { %2895 = vmatprep.subr.mxu1 %v3755_v60  ;;  %v3769_v60 = vld [vmem:[%s6916_s5 + $0xd18] sm:$0xff] }
 0x28b   :  { %2896 = vmatpush1.msra.mxu1 %v3754_v51  ;;  %v3767_v51 = vld [vmem:[%s6916_s5 + $0xd08] sm:$0xff] }
 0x28c   :  { %2556 = vmatmul.mubr.f32.gmra.mxu1 %v2397_v3  ;;  %2897 = vmatprep.subr.mxu1 %v3753_v0  ;;  %v3766_v0 = vld [vmem:[%s6916_s5 + $0xd00] sm:$0xff]  ;;  %v2778_v3 = vld [vmem:[#allocation3 + $0x8] sm:$0x3f] }
 0x28d   :  { %2898 = vmatpush1.msra.mxu1 %v3752_v1  ;;  %2949 = vmatprep.mubr.f32.mxu1 %v2797_v56  ;;  %v2800_v1 = vrot.slane %v2779_v62, 6  ;;  %v2781_v56 = vld [vmem:[#allocation3 + $0x40] sm:$0xc0] }
 0x28e   :  { %2899 = vmatprep.subr.mxu1 %v3751_v61  ;;  %v2793_v61 = vrot.slane %v6592_v35, 6 }
 0x28f   :  { %2900 = vmatpush1.msra.mxu1 %v3750_v5 }
 0x290   :  { %2901 = vmatprep.subr.mxu1 %v3749_v8  ;;  %v2794_v5 = vsel %vm1298_vm5, %v2792_v57, %v2793_v61  ;;  %v2798_v8 = vrot.slane %v2778_v3, 6 }
 0x291   :  { %2902 = vmatpush1.msra.mxu1 %v3748_v10  ;;  %v2801_v10 = vsel %vm1298_vm5, %v2796_v2, %v2800_v1 }
 0x292   :  { %2903 = vmatprep.subr.mxu1 %v3747_v13  ;;  %v2805_v13 = vrot.slane %v2781_v56, 6 }
 0x293   :  { %2904 = vmatpush1.msra.mxu1 %v3746_v41  ;;  %v2780_v41 = vld [vmem:[#allocation3 + $0x18] sm:$0xc0] }
 0x294   :  { %2905 = vmatprep.subr.mxu1 %v3745_v14  ;;  %v2783_v14 = vld [vmem:[#allocation3 + $0x10] sm:$0x3f]  ;;  %v2802_v35 = vrot.slane %v2780_v41, 6 }
 0x295   :  { %2906 = vmatpush1.msra.mxu1 %v3744_v15  ;;  %v2806_v15 = vrot.slane %v6614_v54, 6 }
 0x296   :  { %2907 = vmatprep.subr.mxu1 %v3743_v17  ;;  %v2799_v17 = vsel %vm1298_vm5, %v2793_v61, %v2798_v8 }
 0x297   :  { %2908 = vmatpush1.msra.mxu1 %v3742_v18  ;;  %v2807_v18 = vsel %vm1298_vm5, %v2805_v13, %v2806_v15 }
 0x298   :  { %2909 = vmatprep.subr.mxu1 %v3741_v47  ;;  %v2810_v47 = vrot.slane %v2783_v14, 6 }
 0x299   :  { %2910 = vmatpush1.msra.mxu1 %v3740_v58  ;;  %v2782_v58 = vld [vmem:[#allocation3 + $0x58] sm:$0x3f] }
 0x29a   :  { %2911 = vmatprep.subr.mxu1 %v3739_v25  ;;  %v2803_v25 = vrot.slane %v6626_v6, 6  ;;  %v2808_v2 = vrot.slane %v2782_v58, 6 }
 0x29b   :  { %2912 = vmatpush1.msra.mxu1 %v3738_v19  ;;  %v2811_v19 = vsel %vm1298_vm5, %v2806_v15, %v2810_v47 }
 0x29c   :  { %2913 = vmatprep.subr.mxu1 %v3737_v20  ;;  %v2804_v46 = vsel %vm1298_vm5, %v2802_v35, %v2803_v25  ;;  %v2809_v54 = vsel %vm1298_vm5, %v2803_v25, %v2808_v2 }
 0x29d   :  { %2914 = vmatpush1.msra.mxu1 %v3736_v21 }
 0x29e   :  { %2915 = vmatprep.subr.mxu1 %v3735_v22 }
 0x29f   :  { %2916 = vmatpush1.msra.mxu1 %v3734_v33 }
 0x2a0   :  { %2917 = vmatprep.subr.mxu1 %v3797_v23 }
 0x2a1   :  { %2918 = vmatpush2.msra.mxu1 %v3796_v24 }
 0x2a2   :  { %2919 = vmatprep.subr.mxu1 %v3795_v27 }
 0x2a3   :  { %2920 = vmatpush2.msra.mxu1 %v3794_v28 }
 0x2a4   :  { %2921 = vmatprep.subr.mxu1 %v3793_v26 }
 0x2a5   :  { %2922 = vmatpush2.msra.mxu1 %v3792_v30 }
 0x2a6   :  { %2923 = vmatprep.subr.mxu1 %v3791_v32 }
 0x2a7   :  { %2924 = vmatpush2.msra.mxu1 %v3790_v34 }
 0x2a8   :  { %2925 = vmatprep.subr.mxu1 %v3789_v29 }
 0x2a9   :  { %2926 = vmatpush2.msra.mxu1 %v3788_v37 }
 0x2aa   :  { %2927 = vmatprep.subr.mxu1 %v3787_v38  ;;  %v1929_v23 = vpop.f32.mrf.mxu0 }
 0x2ab   :  { %2928 = vmatpush2.msra.mxu1 %v3786_v40 }
 0x2ac   :  { %2929 = vmatprep.subr.mxu1 %v3785_v42  ;;  %v1931_v27 = vpop.f32.mrf.mxu0 }
 0x2ad   :  { %2930 = vmatpush2.msra.mxu1 %v3784_v63 }
 0x2ae   :  { %2931 = vmatprep.subr.mxu1 %v3783_v4  ;;  %v1840_v20 = vpop.f32.mrf.mxu1 }
 0x2af   :  { %2932 = vmatpush2.msra.mxu1 %v3782_v43  ;;  %v1935_v26 = vpop.f32.mrf.mxu0  ;;  %v1930_v57 = vadd.f32 %v1929_v23, %v1840_v20 }
 0x2b0   :  { %2933 = vmatprep.subr.mxu1 %v3781_v45  ;;  %v1842_v21 = vpop.f32.mrf.mxu1 }
 0x2b1   :  { %2934 = vmatpush2.msra.mxu1 %v3780_v48  ;;  %v1937_v30 = vpop.f32.mrf.mxu0  ;;  %v1932_v1 = vadd.f32 %v1931_v27, %v1842_v21 }
 0x2b2   :  { %2935 = vmatprep.subr.mxu1 %v3779_v49 }
 0x2b3   :  { %2936 = vmatpush2.msra.mxu1 %v3778_v12  ;;  %v1941_v34 = vpop.f32.mrf.mxu0 }
 0x2b4   :  { %2937 = vmatprep.subr.mxu1 %v3777_v50 }
 0x2b5   :  { %2938 = vmatpush2.msra.mxu1 %v3776_v53  ;;  %v1943_v37 = vpop.f32.mrf.mxu0 }
 0x2b6   :  { %2939 = vmatprep.subr.mxu1 %v3775_v55  ;;  %v1846_v22 = vpop.f32.mrf.mxu1 }
 0x2b7   :  { %2940 = vmatpush2.msra.mxu1 %v3774_v31  ;;  %v1936_v56 = vadd.f32 %v1935_v26, %v1846_v22 }
 0x2b8   :  { %2941 = vmatprep.subr.mxu1 %v3773_v39  ;;  %v1848_v33 = vpop.f32.mrf.mxu1 }
 0x2b9   :  { %2942 = vmatpush2.msra.mxu1 %v3772_v52  ;;  %v1947_v40 = vpop.f32.mrf.mxu0 }
 0x2ba   :  { %2943 = vmatprep.subr.mxu1 %v3771_v9 }
 0x2bb   :  { %2944 = vmatpush2.msra.mxu1 %v3770_v11  ;;  %v1949_v63 = vpop.f32.mrf.mxu0 }
 0x2bc   :  { %2945 = vmatprep.subr.mxu1 %v3769_v60 }
 0x2bd   :  { %2946 = vmatpush2.msra.mxu1 %v3768_v16  ;;  %v1852_v24 = vpop.f32.mrf.mxu1 }
 0x2be   :  { %2947 = vmatprep.subr.mxu1 %v3767_v51  ;;  %v1942_v14 = vadd.f32 %v1941_v34, %v1852_v24 }
 0x2bf   :  { %2948 = vmatpush2.msra.mxu1 %v3766_v0  ;;  %v1854_v28 = vpop.f32.mrf.mxu1 }
 0x2c0   :  { %2950 = vmatmul.mubr.f32.vlgmr.msra.gmra.mxu1 %v2794_v5  ;;  %v1944_v47 = vadd.f32 %v1943_v37, %v1854_v28 }
 0x2c1   :  { %2955 = vmatprep.mubr.f32.mxu1 %v2801_v10  ;;  %v1938_v10 = vadd.f32 %v1937_v30, %v1848_v33 }
 0x2c2   :  { %v1858_v6 = vpop.f32.mrf.mxu1 }
 0x2c4   :  { %2956 = vmatmul.mubr.f32.gmra.mxu1 %v2799_v17  ;;  %v1860_v32 = vpop.f32.mrf.mxu1 }
 0x2c5   :  { %2961 = vmatprep.mubr.f32.mxu1 %v2807_v18  ;;  %v1950_v27 = vadd.f32 %v1949_v63, %v1860_v32 }
 0x2c8   :  { %2962 = vmatmul.mubr.f32.gmra.mxu1 %v2804_v46  ;;  %v2982_v46 = vld [vmem:[%s6919_s6] sm:$0x3] }
 0x2c9   :  { %2967 = vmatprep.mubr.f32.mxu1 %v2811_v19  ;;  %v6858_v24 = vrot.slane %v2982_v46, %v1493_v44 }
 0x2cc   :  { %2968 = vmatmul.mubr.f32.gmra.mxu1 %v2809_v54  ;;  %v1948_v54 = vadd.f32 %v1947_v40, %v1858_v6  ;;  %v2991_v6 = vrot.slane %v2982_v46, %v1497_v36 }
 0x2ef   :  { %v2333_v43 = vpop.f32.mrf.mxu0 }
 0x2f1   :  { %v2335_v48 = vpop.f32.mrf.mxu0 }
 0x2f4   :  { %v2339_v12 = vpop.f32.mrf.mxu0 }
 0x2f6   :  { %v2341_v53 = vpop.f32.mrf.mxu0 }
 0x2f8   :  { %v2127_v29 = vpop.f32.mrf.mxu1 }
 0x2f9   :  { %v2345_v31 = vpop.f32.mrf.mxu0  ;;  %v2150_v3 = vadd.f32 %v2127_v29, %v1930_v57 }
 0x2fa   :  { %v2129_v38 = vpop.f32.mrf.mxu1 }
 0x2fb   :  { %v2347_v52 = vpop.f32.mrf.mxu0  ;;  %v2151_v5 = vadd.f32 %v2129_v38, %v1932_v1  ;;  %v2356_v41 = vadd.f32 %v2333_v43, %v2150_v3  ;;  %v3002_v43 = vld [vmem:[%s6920_s2] sm:$0xff] }
 0x2fd   :  { %v2357_v18 = vadd.f32 %v2335_v48, %v2151_v5 }
 0x2fe   :  { %v2133_v42 = vpop.f32.mrf.mxu1 }
 0x2ff   :  { %v2351_v11 = vpop.f32.mrf.mxu0  ;;  %v2152_v13 = vadd.f32 %v2133_v42, %v1936_v56 }
 0x300   :  { %v2135_v4 = vpop.f32.mrf.mxu1 }
 0x301   :  { %v2353_v60 = vpop.f32.mrf.mxu0  ;;  %v2153_v17 = vadd.f32 %v2135_v4, %v1938_v10  ;;  %v2358_v19 = vadd.f32 %v2339_v12, %v2152_v13 }
 0x303   :  { %v2359_v33 = vadd.f32 %v2341_v53, %v2153_v17 }
 0x304   :  { %v2139_v45 = vpop.f32.mrf.mxu1 }
 0x305   :  { %v2154_v58 = vadd.f32 %v2139_v45, %v1942_v14 }
 0x306   :  { %v2141_v49 = vpop.f32.mrf.mxu1 }
 0x307   :  { %v2155_v20 = vadd.f32 %v2141_v49, %v1944_v47  ;;  %v2360_v30 = vadd.f32 %v2345_v31, %v2154_v58 }
 0x309   :  { %v2145_v50 = vpop.f32.mrf.mxu1  ;;  %v2361_v4 = vadd.f32 %v2347_v52, %v2155_v20  ;;  %v3004_v52 = vld [vmem:[%s6920_s2 + $0x10] sm:$0xff] }
 0x30a   :  { %v2156_v28 = vadd.f32 %v2145_v50, %v1948_v54 }
 0x30b   :  { %v2147_v55 = vpop.f32.mrf.mxu1 }
 0x30c   :  { %v2157_v40 = vadd.f32 %v2147_v55, %v1950_v27  ;;  %v2362_v12 = vadd.f32 %v2351_v11, %v2156_v28 }
 0x337   :  { %v2745_v16 = vpop.f32.mrf.mxu0 }
 0x339   :  { %v2747_v0 = vpop.f32.mrf.mxu0 }
 0x33b   :  { %v2751_v8 = vpop.f32.mrf.mxu0 }
 0x33d   :  { %v2753_v25 = vpop.f32.mrf.mxu0 }
 0x33e   :  { %v2539_v39 = vpop.f32.mrf.mxu1 }
 0x33f   :  { %v2562_v35 = vadd.f32 %v2539_v39, %v2356_v41  ;;  %v2757_v26 = vpop.f32.mrf.mxu0  ;;  %v2363_v39 = vadd.f32 %v2353_v60, %v2157_v40  ;;  %v3005_v60 = vld [vmem:[%s6920_s2 + $0x18] sm:$0xff] }
 0x340   :  { %v2541_v9 = vpop.f32.mrf.mxu1 }
 0x341   :  { %v2563_v2 = vadd.f32 %v2541_v9, %v2357_v18  ;;  %v2768_v23 = vadd.f32 %v2745_v16, %v2562_v35  ;;  %v2759_v48 = vpop.f32.mrf.mxu0  ;;  %v3007_v35 = vld [vmem:[%s6920_s2 + $0x28] sm:$0xff] }
 0x343   :  { %v2545_v59 = vpop.f32.mrf.mxu1  ;;  %v2769_v38 = vadd.f32 %v2747_v0, %v2563_v2  ;;  %v2763_v57 = vpop.f32.mrf.mxu0  ;;  %v3008_v2 = vld [vmem:[%s6920_s2 + $0x30] sm:$0xff] }
 0x344   :  { %v2564_v22 = vadd.f32 %v2545_v59, %v2358_v19 }
 0x345   :  { %v2547_v62 = vpop.f32.mrf.mxu1  ;;  %v2765_v17 = vpop.f32.mrf.mxu0 }
 0x346   :  { %v2565_v29 = vadd.f32 %v2547_v62, %v2359_v33  ;;  %v2770_v45 = vadd.f32 %v2751_v8, %v2564_v22  ;;  %v3006_v8 = vld [vmem:[%s6920_s2 + $0x20] sm:$0xff]  ;;  %v3009_v22 = vld [vmem:[%s6920_s2 + $0x38] sm:$0xff] }
 0x348   :  { %v2551_v51 = vpop.f32.mrf.mxu1  ;;  %v2771_v31 = vadd.f32 %v2753_v25, %v2565_v29 }
 0x349   :  { %v2566_v42 = vadd.f32 %v2551_v51, %v2360_v30 }
 0x34a   :  { %v2553_v61 = vpop.f32.mrf.mxu1 }
 0x34b   :  { %v2567_v49 = vadd.f32 %v2553_v61, %v2361_v4  ;;  %v2772_v59 = vadd.f32 %v2757_v26, %v2566_v42 }
 0x34c   :  { %v2557_v15 = vpop.f32.mrf.mxu1 }
 0x34d   :  { %v2568_v62 = vadd.f32 %v2557_v15, %v2362_v12  ;;  %v2773_v1 = vadd.f32 %v2759_v48, %v2567_v49 }
 0x34e   :  { %v2559_v21 = vpop.f32.mrf.mxu1 }
 0x34f   :  { %v2569_v3 = vadd.f32 %v2559_v21, %v2363_v39  ;;  %v2774_v15 = vadd.f32 %v2763_v57, %v2568_v62 }
 0x351   :  { %v2775_v46 = vadd.f32 %v2765_v17, %v2569_v3 }
 0x380   :  { %v2951_v34 = vpop.f32.mrf.mxu1 }
 0x381   :  { %v2974_v37 = vadd.f32 %v2951_v34, %v2768_v23 }
 0x382   :  { %v2953_v44 = vpop.f32.mrf.mxu1 }
 0x383   :  { %v2994_v32 = vadd.f32 %v6858_v24, %v2974_v37  ;;  %v2975_v63 = vadd.f32 %v2953_v44, %v2769_v38 }
 0x384   :  { %v2957_v36 = vpop.f32.mrf.mxu1 }
 0x385   :  { %v3010_v50 = vadd.f32 %v3002_v43, %v2994_v32  ;;  %v2995_v53 = vadd.f32 %v2991_v6, %v2975_v63  ;;  %v2976_v55 = vadd.f32 %v2957_v36, %v2770_v45 }
 0x386   :  { %v2959_v9 = vpop.f32.mrf.mxu1 }
 0x387   :  { %3018 = vst [vmem:[%s6921_s7] sm:$0xff] %v3010_v50  ;;  %v3011_v11 = vadd.f32 %v3003_v7, %v2995_v53  ;;  %v2996_v16 = vadd.f32 %v6858_v24, %v2976_v55  ;;  %v2977_v51 = vadd.f32 %v2959_v9, %v2771_v31 }
 0x388   :  { %v2963_v0 = vpop.f32.mrf.mxu1 }
 0x389   :  { %3019 = vst [vmem:[%s6921_s7 + $0x8] sm:$0xff] %v3011_v11  ;;  %v3012_v61 = vadd.f32 %v3004_v52, %v2996_v16  ;;  %v2997_v56 = vadd.f32 %v2991_v6, %v2977_v51  ;;  %v2978_v5 = vadd.f32 %v2963_v0, %v2772_v59 }
 0x38a   :  { %v2965_v10 = vpop.f32.mrf.mxu1 }
 0x38b   :  { %3020 = vst [vmem:[%s6921_s7 + $0x10] sm:$0xff] %v3012_v61  ;;  %v3013_v13 = vadd.f32 %v3005_v60, %v2997_v56  ;;  %v2998_v41 = vadd.f32 %v6858_v24, %v2978_v5  ;;  %v2979_v14 = vadd.f32 %v2965_v10, %v2773_v1 }
 0x38c   :  { %v2969_v18 = vpop.f32.mrf.mxu1 }
 0x38d   :  { %3021 = vst [vmem:[%s6921_s7 + $0x18] sm:$0xff] %v3013_v13  ;;  %v3014_v47 = vadd.f32 %v3006_v8, %v2998_v41  ;;  %v2999_v58 = vadd.f32 %v2991_v6, %v2979_v14  ;;  %v2980_v25 = vadd.f32 %v2969_v18, %v2774_v15 }
 0x38e   :  { %v2971_v19 = vpop.f32.mrf.mxu1 }
 0x38f   :  { %3022 = vst [vmem:[%s6921_s7 + $0x20] sm:$0xff] %v3014_v47  ;;  %v3015_v54 = vadd.f32 %v3007_v35, %v2999_v58  ;;  %v3000_v20 = vadd.f32 %v6858_v24, %v2980_v25  ;;  %v2981_v21 = vadd.f32 %v2971_v19, %v2775_v46 }
 0x391   :  { %3023 = vst [vmem:[%s6921_s7 + $0x28] sm:$0xff] %v3015_v54  ;;  %v3016_v33 = vadd.f32 %v3008_v2, %v3000_v20  ;;  %v3001_v23 = vadd.f32 %v2991_v6, %v2981_v21 }
 0x393   :  { %3024 = vst [vmem:[%s6921_s7 + $0x30] sm:$0xff] %v3016_v33  ;;  %v3017_v27 = vadd.f32 %v3009_v22, %v3001_v23 }
 0x395   :  { %3025 = vst [vmem:[%s6921_s7 + $0x38] sm:$0xff] %v3017_v27 }

</bundles_post_ra>
